<compile_context>
chip_gen: v6e
topology: v6e:2x2x1
jax: 0.10.0
libtpu: 0.0.40
codegen_flags: <defaults>
</compile_context>

<pallas_src>
from functools import partial

import jax
import jax.numpy as jnp
from jax.experimental import pallas as pl
from jax.experimental.pallas import tpu as pltpu


def _round_up(n, m):
    return ((n + m - 1) // m) * m


def _pick_time_chunk(seq_len, target=16):
    for c in range(min(seq_len, target), 0, -1):
        if seq_len % c == 0:
            return c
    return seq_len


# ----------------------------- fused forward kernel ---------------------------
def _fused_lstm_kernel(*refs, n_layer, seq_len, t_chunk, b_tile, h_pad):
    """refs layout:
         x_ref (S, Bt, Dp),
         (w_ih_t, w_hh_t, b) * n_layer,
         w_cls_t, b_cls,
         out_ref (Bt, Cp),
         g_scr   (2, Tc, Bt, 4*Hp)   -- double-buffered hoisted gate chunks
         h_bufs  [(S, Bt, Hp)] * k   -- ping-pong inter-layer hidden sequences
    """
    S, Tc, Bt, Hp = seq_len, t_chunk, b_tile, h_pad
    n_chunks = S // Tc

    x_ref = refs[0]
    layer_refs = refs[1:1 + 3 * n_layer]
    w_cls_ref = refs[1 + 3 * n_layer]
    b_cls_ref = refs[2 + 3 * n_layer]
    out_ref = refs[3 + 3 * n_layer]
    g_scr = refs[4 + 3 * n_layer]
    h_bufs = refs[5 + 3 * n_layer:]

    def sigmoid(v):
        # 1 EUP push (tanh) + cheap VPU ops, vs 2 EUP pushes (exp + recip).
        return 0.5 * jnp.tanh(0.5 * v) + 0.5

    def project_chunk(in_ref, w_ih_ref, b_ref, ck, slot):
        """g_scr[slot] = X[chunk ck] @ W_ih^T + (b_ih + b_hh). One MXU matmul."""
        mm_dtype = w_ih_ref.dtype
        xin = in_ref[ck * Tc:(ck + 1) * Tc].reshape(Tc * Bt, -1)
        g = jnp.dot(xin.astype(mm_dtype), w_ih_ref[...],
                    preferred_element_type=jnp.float32) + b_ref[...]
        g_scr[slot] = g.reshape(Tc, Bt, 4 * Hp)

    def lstm_layer(in_ref, w_ih_ref, w_hh_ref, b_ref, out_seq_ref):
        mm_dtype = w_hh_ref.dtype
        # Prologue: project the first time chunk.
        project_chunk(in_ref, w_ih_ref, b_ref, 0, 0)

        h = jnp.zeros((Bt, Hp), jnp.float32)
        c_state = jnp.zeros((Bt, Hp), jnp.float32)

        for ck in range(n_chunks):
            slot = ck & 1
            # Issue the NEXT chunk's (independent) input projection before the
            # recurrence so its MXU work overlaps the VPU/EUP-bound serial loop.
            if ck + 1 < n_chunks:
                project_chunk(in_ref, w_ih_ref, b_ref, ck + 1, 1 - slot)

            def step(t, carry, slot=slot, base=ck * Tc):
                h_prev, c_prev = carry
                gates = g_scr[slot, t] + jnp.dot(
                    h_prev.astype(mm_dtype), w_hh_ref[...],
                    preferred_element_type=jnp.float32)
                # Hp is a multiple of 128 -> each gate slice is whole vregs.
                i = sigmoid(gates[:, 0 * Hp:1 * Hp])
                f = sigmoid(gates[:, 1 * Hp:2 * Hp])
                g = jnp.tanh(gates[:, 2 * Hp:3 * Hp])
                o = sigmoid(gates[:, 3 * Hp:4 * Hp])
                c_new = f * c_prev + i * g
                h_new = o * jnp.tanh(c_new)
                if out_seq_ref is not None:
                    out_seq_ref[base + t] = h_new
                return (h_new, c_new)

            # Partial unroll: LLO visibility without blowing up vreg live ranges.
            h, c_state = jax.lax.fori_loop(0, Tc, step, (h, c_state),
                                           unroll=min(Tc, 4))
        return h

    in_ref = x_ref
    h_last = None
    for l in range(n_layer):
        w_ih_ref, w_hh_ref, b_ref = layer_refs[3 * l:3 * l + 3]
        last = (l == n_layer - 1)
        # Last layer's sequence is never materialized (classifier needs h[-1]).
        out_seq_ref = None if last else h_bufs[l % len(h_bufs)]
        h_last = lstm_layer(in_ref, w_ih_ref, w_hh_ref, b_ref, out_seq_ref)
        in_ref = out_seq_ref

    out_ref[...] = (jnp.dot(h_last.astype(w_cls_ref.dtype), w_cls_ref[...],
                            preferred_element_type=jnp.float32) + b_cls_ref[...])


# --------------------------------- wrapper ------------------------------------
def rnn_forward(packed, x, n_class, *, num_cores=1, t_chunk=None):
    """x: (B, S, in_dim) batch-first (PyTorch convention). Returns (B, n_class)."""
    B, S, D = x.shape
    layers = packed["layers"]
    n_layer = len(layers)
    Dp = layers[0]["w_ih_t"].shape[0]
    Hp = layers[0]["w_hh_t"].shape[0]
    Cp = packed["cls_w_t"].shape[1]

    # Per-core batch tile (sublane-aligned); grid axis = batch tiles ("parallel").
    Bt = _round_up(max(1, -(-B // num_cores)), 8)
    Bp = Bt * num_cores
    Tc = t_chunk if t_chunk is not None else _pick_time_chunk(S)
    assert S % Tc == 0, (S, Tc)

    # time-major, zero-padded to (S, Bp, Dp) -> (8,128)-aligned tiles
    x_tm = jnp.transpose(x, (1, 0, 2)).astype(jnp.float32)
    x_p = jnp.pad(x_tm, ((0, 0), (0, Bp - B), (0, Dp - D)))

    in_specs = [pl.BlockSpec((S, Bt, Dp), lambda i: (0, i, 0))]
    args = [x_p]
    for layer in layers:
        d_in_pad = layer["w_ih_t"].shape[0]
        in_specs += [
            pl.BlockSpec((d_in_pad, 4 * Hp), lambda i: (0, 0)),
            pl.BlockSpec((Hp, 4 * Hp), lambda i: (0, 0)),
            pl.BlockSpec((1, 4 * Hp), lambda i: (0, 0)),
        ]
        args += [layer["w_ih_t"], layer["w_hh_t"], layer["b"]]
    in_specs += [
        pl.BlockSpec((Hp, Cp), lambda i: (0, 0)),
        pl.BlockSpec((1, Cp), lambda i: (0, 0)),
    ]
    args += [packed["cls_w_t"], packed["cls_b"]]

    n_h_bufs = 0 if n_layer == 1 else (1 if n_layer == 2 else 2)
    scratch_shapes = [pltpu.VMEM((2, Tc, Bt, 4 * Hp), jnp.float32)]
    scratch_shapes += [pltpu.VMEM((S, Bt, Hp), jnp.float32)] * n_h_bufs

    # Explicit scoped-VMEM budget (v5e's default is only 16 MiB; v7x phys 64 MiB).
    arg_bytes = sum(int(a.size) * a.dtype.itemsize for a in args)
    scratch_bytes = (2 * Tc * Bt * 4 * Hp + n_h_bufs * S * Bt * Hp) * 4
    out_bytes = Bt * Cp * 4
    vmem_limit = 2 * (arg_bytes + out_bytes) + scratch_bytes + (4 << 20)
    vmem_limit = int(min(max(vmem_limit, 16 << 20), 64 << 20))

    out = pl.pallas_call(
        partial(_fused_lstm_kernel, n_layer=n_layer, seq_len=S,
                t_chunk=Tc, b_tile=Bt, h_pad=Hp),
        out_shape=jax.ShapeDtypeStruct((Bp, Cp), jnp.float32),
        grid_spec=pltpu.PrefetchScalarGridSpec(
            num_scalar_prefetch=0,
            grid=(num_cores,),                 # batch tiles; independent rows
            in_specs=in_specs,
            out_specs=pl.BlockSpec((Bt, Cp), lambda i: (i, 0)),
            scratch_shapes=scratch_shapes,
        ),
        compiler_params=pltpu.CompilerParams(
            dimension_semantics=("parallel",),
            vmem_limit_bytes=vmem_limit),
    )(*args)
    return out[:B, :n_class]


# ------------------------ param init (PyTorch layout) --------------------------
def init_params(key, in_dim, hidden_dim, n_layer, n_class):
    k = 1.0 / jnp.sqrt(hidden_dim)
    params = {"lstm": []}
    for l in range(n_layer):
        d_in = in_dim if l == 0 else hidden_dim
        key, k1, k2, k3, k4 = jax.random.split(key, 5)
        params["lstm"].append({
            "w_ih": jax.random.uniform(k1, (4 * hidden_dim, d_in), jnp.float32, -k, k),
            "w_hh": jax.random.uniform(k2, (4 * hidden_dim, hidden_dim), jnp.float32, -k, k),
            "b_ih": jax.random.uniform(k3, (4 * hidden_dim,), jnp.float32, -k, k),
            "b_hh": jax.random.uniform(k4, (4 * hidden_dim,), jnp.float32, -k, k),
        })
    key, k5, k6 = jax.random.split(key, 3)
    params["cls_w"] = jax.random.uniform(k5, (n_class, hidden_dim), jnp.float32, -k, k)
    params["cls_b"] = jax.random.uniform(k6, (n_class,), jnp.float32, -k, k)
    return params


# -------------------- pack: pad per-gate + pre-transpose for MXU ----------------
def _pad_gate_rows(w, H, Hp, d_in, d_pad):
    """(4H, d_in) -> (4Hp, d_pad), padding each gate block independently."""
    blocks = []
    for g in range(4):
        blk = w[g * H:(g + 1) * H, :]
        blocks.append(jnp.pad(blk, ((0, Hp - H), (0, d_pad - d_in))))
    return jnp.concatenate(blocks, axis=0)


def _pad_gate_vec(b, H, Hp):
    return jnp.concatenate(
        [jnp.pad(b[g * H:(g + 1) * H], (0, Hp - H)) for g in range(4)])


def pack_params(params, in_dim, hidden_dim, n_class, use_bf16=False):
    """use_bf16=True casts matmul weight operands to bf16 (v6e/v7x MXU-native);
    biases, accumulation and h/c state stay f32."""
    H = hidden_dim
    Hp = _round_up(H, 128)
    Cp = _round_up(n_class, 128)
    mm_dtype = jnp.bfloat16 if use_bf16 else jnp.float32
    packed = {"layers": []}
    for l, layer in enumerate(params["lstm"]):
        d_in = in_dim if l == 0 else hidden_dim
        d_pad = _round_up(d_in, 128) if l == 0 else Hp
        w_ih_p = _pad_gate_rows(layer["w_ih"], H, Hp, d_in, d_pad)   # (4Hp, d_pad)
        w_hh_p = _pad_gate_rows(layer["w_hh"], H, Hp, H, Hp)         # (4Hp, Hp)
        b_p = _pad_gate_vec(layer["b_ih"] + layer["b_hh"], H, Hp)    # (4Hp,)
        packed["layers"].append({
            "w_ih_t": jnp.asarray(w_ih_p.T, dtype=mm_dtype),   # (d_pad, 4Hp)
            "w_hh_t": jnp.asarray(w_hh_p.T, dtype=mm_dtype),   # (Hp, 4Hp)
            "b": b_p[None, :].astype(jnp.float32),              # (1, 4Hp)
        })
    cls_w_p = jnp.pad(params["cls_w"], ((0, Cp - n_class), (0, Hp - H)))
    cls_b_p = jnp.pad(params["cls_b"], (0, Cp - n_class))
    packed["cls_w_t"] = jnp.asarray(cls_w_p.T, dtype=mm_dtype)  # (Hp, Cp)
    packed["cls_b"] = cls_b_p[None, :].astype(jnp.float32)      # (1, Cp)
    return packed


# ----------------------------- pure-JAX reference ------------------------------
def rnn_reference(params, x):
    h_seq = jnp.transpose(x, (1, 0, 2)).astype(jnp.float32)   # (S, B, D)
    B = h_seq.shape[1]
    for layer in params["lstm"]:
        H = layer["w_hh"].shape[1]
        w_ih_t, w_hh_t = layer["w_ih"].T, layer["w_hh"].T
        b = (layer["b_ih"] + layer["b_hh"])[None, :]

        def step(carry, x_t, w_ih_t=w_ih_t, w_hh_t=w_hh_t, b=b, H=H):
            h, c = carry
            gates = x_t @ w_ih_t + h @ w_hh_t + b
            i = jax.nn.sigmoid(gates[:, 0 * H:1 * H])
            f = jax.nn.sigmoid(gates[:, 1 * H:2 * H])
            g = jnp.tanh(gates[:, 2 * H:3 * H])
            o = jax.nn.sigmoid(gates[:, 3 * H:4 * H])
            c_new = f * c + i * g
            h_new = o * jnp.tanh(c_new)
            return (h_new, c_new), h_new

        init = (jnp.zeros((B, H), jnp.float32), jnp.zeros((B, H), jnp.float32))
        _, h_seq = jax.lax.scan(step, init, h_seq)
    return h_seq[-1] @ params["cls_w"].T + params["cls_b"][None, :]


# ------------------------------------ main -------------------------------------
if __name__ == "__main__":
    in_dim, hidden_dim, n_layer, n_class = 16, 32, 2, 10
    batch, seq = 2, 8

    key = jax.random.PRNGKey(0)
    key, kp, kx = jax.random.split(key, 3)
    params = init_params(kp, in_dim, hidden_dim, n_layer, n_class)
    x = jax.random.normal(kx, (batch, seq, in_dim), jnp.float32)
    ref = jax.block_until_ready(rnn_reference(params, x))

    # 1) f32 matmul operands, batch split across 2 cores (v7x megacore path),
    #    time-chunked + double-buffered projection (Tc=4 -> 2 chunks).
    packed_f32 = pack_params(params, in_dim, hidden_dim, n_class, use_bf16=False)
    fwd_f32 = jax.jit(partial(rnn_forward, n_class=n_class, num_cores=2, t_chunk=4))
    out_f32 = jax.block_until_ready(fwd_f32(packed_f32, x))
    assert out_f32.shape == (batch, n_class), out_f32.shape
    assert jnp.allclose(out_f32, ref, atol=1e-4, rtol=1e-4), \
        f"f32 max abs diff {jnp.max(jnp.abs(out_f32 - ref))}"

    # 2) bf16 matmul operands (v6e/v7x MXU-native), f32 accumulation and state.
    packed_bf16 = pack_params(params, in_dim, hidden_dim, n_class, use_bf16=True)
    fwd_bf16 = jax.jit(partial(rnn_forward, n_class=n_class, num_cores=1, t_chunk=4))
    out_bf16 = jax.block_until_ready(fwd_bf16(packed_bf16, x))
    assert out_bf16.shape == (batch, n_class), out_bf16.shape
    assert jnp.allclose(out_bf16, ref, atol=5e-2, rtol=5e-2), \
        f"bf16 max abs diff {jnp.max(jnp.abs(out_bf16 - ref))}"

    print("KERNEL_OK")
</pallas_src>

<mosaic_0001>
module attributes {stable_mosaic.version = 11 : i64} {
  func.func @_fused_lstm_kernel(%arg0: i32, %arg1: memref<8x8x128xf32, #tpu.memory_space<vmem>>, %arg2: memref<128x512xf32, #tpu.memory_space<vmem>>, %arg3: memref<128x512xf32, #tpu.memory_space<vmem>>, %arg4: memref<1x512xf32, #tpu.memory_space<vmem>>, %arg5: memref<128x512xf32, #tpu.memory_space<vmem>>, %arg6: memref<128x512xf32, #tpu.memory_space<vmem>>, %arg7: memref<1x512xf32, #tpu.memory_space<vmem>>, %arg8: memref<128x128xf32, #tpu.memory_space<vmem>>, %arg9: memref<1x128xf32, #tpu.memory_space<vmem>>, %arg10: memref<8x128xf32, #tpu.memory_space<vmem>>, %arg11: memref<2x4x8x512xf32, #tpu.memory_space<vmem>>, %arg12: memref<8x8x128xf32, #tpu.memory_space<vmem>>) attributes {dimension_semantics = [#tpu.dimension_semantics<parallel>], iteration_bounds = array<i64: 2>, scalar_prefetch = 0 : i64, scratch_operands = 2 : i64, tpu.core_type = #tpu.core_type<tc>, window_params = [{transform_indices = @transform_0, window_bounds = array<i64: 8, 8, 128>}, {pipeline_mode = #tpu.pipeline_mode<synchronous>, transform_indices = @transform_1, window_bounds = array<i64: 128, 512>}, {pipeline_mode = #tpu.pipeline_mode<synchronous>, transform_indices = @transform_2, window_bounds = array<i64: 128, 512>}, {pipeline_mode = #tpu.pipeline_mode<synchronous>, transform_indices = @transform_3, window_bounds = array<i64: 1, 512>}, {pipeline_mode = #tpu.pipeline_mode<synchronous>, transform_indices = @transform_4, window_bounds = array<i64: 128, 512>}, {pipeline_mode = #tpu.pipeline_mode<synchronous>, transform_indices = @transform_5, window_bounds = array<i64: 128, 512>}, {pipeline_mode = #tpu.pipeline_mode<synchronous>, transform_indices = @transform_6, window_bounds = array<i64: 1, 512>}, {pipeline_mode = #tpu.pipeline_mode<synchronous>, transform_indices = @transform_7, window_bounds = array<i64: 128, 128>}, {pipeline_mode = #tpu.pipeline_mode<synchronous>, transform_indices = @transform_8, window_bounds = array<i64: 1, 128>}, {transform_indices = @transform_9, window_bounds = array<i64: 8, 128>}]} {
    %c0 = arith.constant 0 : index
    %c0_0 = arith.constant 0 : index
    %c0_1 = arith.constant 0 : index
    %0 = vector.load %arg1[%c0, %c0_0, %c0_1] : memref<8x8x128xf32, #tpu.memory_space<vmem>>, vector<4x8x128xf32>
    %1 = vector.shape_cast %0 : vector<4x8x128xf32> to vector<32x128xf32>
    %c0_2 = arith.constant 0 : index
    %c0_3 = arith.constant 0 : index
    %2 = vector.load %arg2[%c0_2, %c0_3] : memref<128x512xf32, #tpu.memory_space<vmem>>, vector<128x512xf32>
    %cst = arith.constant dense<0.000000e+00> : vector<32x512xf32>
    %3 = tpu.matmul %1, %2, %cst {dimension_numbers = #tpu.dot_dimension_numbers<[1], [0], [0], [1], [0, 0, 1, 1], [], []>} : vector<32x128xf32>, vector<128x512xf32>, vector<32x512xf32> -> vector<32x512xf32>
    %c0_4 = arith.constant 0 : index
    %c0_5 = arith.constant 0 : index
    %4 = vector.load %arg4[%c0_4, %c0_5] : memref<1x512xf32, #tpu.memory_space<vmem>>, vector<1x512xf32>
    %5 = vector.broadcast %4 : vector<1x512xf32> to vector<32x512xf32>
    %6 = arith.addf %3, %5 : vector<32x512xf32>
    %7 = vector.shape_cast %6 : vector<32x512xf32> to vector<4x8x512xf32>
    %c0_6 = arith.constant 0 : index
    %c0_7 = arith.constant 0 : index
    %c0_8 = arith.constant 0 : index
    %c0_9 = arith.constant 0 : index
    %8 = vector.load %arg11[%c0_6, %c0_7, %c0_8, %c0_9] : memref<2x4x8x512xf32, #tpu.memory_space<vmem>>, vector<1x4x8x512xf32>
    %9 = vector.shape_cast %8 : vector<1x4x8x512xf32> to vector<4x8x512xf32>
    %10 = vector.shape_cast %7 : vector<4x8x512xf32> to vector<1x4x8x512xf32>
    tpu.vector_store %arg11[%c0_6, %c0_7, %c0_8, %c0_9], %10 {strides = array<i32>} : memref<2x4x8x512xf32, #tpu.memory_space<vmem>>, vector<1x4x8x512xf32>,
    %cst_10 = arith.constant 0.000000e+00 : f32
    %11 = vector.broadcast %cst_10 : f32 to vector<8x128xf32>
    %cst_11 = arith.constant 0.000000e+00 : f32
    %12 = vector.broadcast %cst_11 : f32 to vector<8x128xf32>
    %c4 = arith.constant 4 : index
    %c0_12 = arith.constant 0 : index
    %c0_13 = arith.constant 0 : index
    %13 = vector.load %arg1[%c4, %c0_12, %c0_13] : memref<8x8x128xf32, #tpu.memory_space<vmem>>, vector<4x8x128xf32>
    %14 = vector.shape_cast %13 : vector<4x8x128xf32> to vector<32x128xf32>
    %c0_14 = arith.constant 0 : index
    %c0_15 = arith.constant 0 : index
    %15 = vector.load %arg2[%c0_14, %c0_15] : memref<128x512xf32, #tpu.memory_space<vmem>>, vector<128x512xf32>
    %cst_16 = arith.constant dense<0.000000e+00> : vector<32x512xf32>
    %16 = tpu.matmul %14, %15, %cst_16 {dimension_numbers = #tpu.dot_dimension_numbers<[1], [0], [0], [1], [0, 0, 1, 1], [], []>} : vector<32x128xf32>, vector<128x512xf32>, vector<32x512xf32> -> vector<32x512xf32>
    %c0_17 = arith.constant 0 : index
    %c0_18 = arith.constant 0 : index
    %17 = vector.load %arg4[%c0_17, %c0_18] : memref<1x512xf32, #tpu.memory_space<vmem>>, vector<1x512xf32>
    %18 = vector.broadcast %17 : vector<1x512xf32> to vector<32x512xf32>
    %19 = arith.addf %16, %18 : vector<32x512xf32>
    %20 = vector.shape_cast %19 : vector<32x512xf32> to vector<4x8x512xf32>
    %c1 = arith.constant 1 : index
    %c0_19 = arith.constant 0 : index
    %c0_20 = arith.constant 0 : index
    %c0_21 = arith.constant 0 : index
    %21 = vector.load %arg11[%c1, %c0_19, %c0_20, %c0_21] : memref<2x4x8x512xf32, #tpu.memory_space<vmem>>, vector<1x4x8x512xf32>
    %22 = vector.shape_cast %21 : vector<1x4x8x512xf32> to vector<4x8x512xf32>
    %23 = vector.shape_cast %20 : vector<4x8x512xf32> to vector<1x4x8x512xf32>
    tpu.vector_store %arg11[%c1, %c0_19, %c0_20, %c0_21], %23 {strides = array<i32>} : memref<2x4x8x512xf32, #tpu.memory_space<vmem>>, vector<1x4x8x512xf32>,
    %c0_i32 = arith.constant 0 : i32
    %c0_22 = arith.constant 0 : index
    %24 = arith.index_cast %c0_i32 : i32 to index
    %c0_23 = arith.constant 0 : index
    %c0_24 = arith.constant 0 : index
    %25 = vector.load %arg11[%c0_22, %24, %c0_23, %c0_24] : memref<2x4x8x512xf32, #tpu.memory_space<vmem>>, vector<1x1x8x512xf32>
    %26 = vector.shape_cast %25 : vector<1x1x8x512xf32> to vector<8x512xf32>
    %c0_25 = arith.constant 0 : index
    %c0_26 = arith.constant 0 : index
    %27 = vector.load %arg3[%c0_25, %c0_26] : memref<128x512xf32, #tpu.memory_space<vmem>>, vector<128x512xf32>
    %cst_27 = arith.constant dense<0.000000e+00> : vector<8x512xf32>
    %28 = tpu.matmul %11, %27, %cst_27 {dimension_numbers = #tpu.dot_dimension_numbers<[1], [0], [0], [1], [0, 0, 1, 1], [], []>} : vector<8x128xf32>, vector<128x512xf32>, vector<8x512xf32> -> vector<8x512xf32>
    %29 = arith.addf %26, %28 : vector<8x512xf32>
    %30 = vector.extract_strided_slice %29 {offsets = [0, 0], sizes = [8, 128], strides = [1, 1]} : vector<8x512xf32> to vector<8x128xf32>
    %cst_28 = arith.constant 5.000000e-01 : f32
    %31 = vector.broadcast %cst_28 : f32 to vector<8x128xf32>
    %32 = arith.mulf %31, %30 : vector<8x128xf32>
    %33 = math.tanh %32 : vector<8x128xf32>
    %cst_29 = arith.constant 5.000000e-01 : f32
    %34 = vector.broadcast %cst_29 : f32 to vector<8x128xf32>
    %35 = arith.mulf %34, %33 : vector<8x128xf32>
    %cst_30 = arith.constant 5.000000e-01 : f32
    %36 = vector.broadcast %cst_30 : f32 to vector<8x128xf32>
    %37 = arith.addf %35, %36 : vector<8x128xf32>
    %38 = vector.extract_strided_slice %29 {offsets = [0, 128], sizes = [8, 128], strides = [1, 1]} : vector<8x512xf32> to vector<8x128xf32>
    %cst_31 = arith.constant 5.000000e-01 : f32
    %39 = vector.broadcast %cst_31 : f32 to vector<8x128xf32>
    %40 = arith.mulf %39, %38 : vector<8x128xf32>
    %41 = math.tanh %40 : vector<8x128xf32>
    %cst_32 = arith.constant 5.000000e-01 : f32
    %42 = vector.broadcast %cst_32 : f32 to vector<8x128xf32>
    %43 = arith.mulf %42, %41 : vector<8x128xf32>
    %cst_33 = arith.constant 5.000000e-01 : f32
    %44 = vector.broadcast %cst_33 : f32 to vector<8x128xf32>
    %45 = arith.addf %43, %44 : vector<8x128xf32>
    %46 = vector.extract_strided_slice %29 {offsets = [0, 256], sizes = [8, 128], strides = [1, 1]} : vector<8x512xf32> to vector<8x128xf32>
    %47 = math.tanh %46 : vector<8x128xf32>
    %48 = vector.extract_strided_slice %29 {offsets = [0, 384], sizes = [8, 128], strides = [1, 1]} : vector<8x512xf32> to vector<8x128xf32>
    %cst_34 = arith.constant 5.000000e-01 : f32
    %49 = vector.broadcast %cst_34 : f32 to vector<8x128xf32>
    %50 = arith.mulf %49, %48 : vector<8x128xf32>
    %51 = math.tanh %50 : vector<8x128xf32>
    %cst_35 = arith.constant 5.000000e-01 : f32
    %52 = vector.broadcast %cst_35 : f32 to vector<8x128xf32>
    %53 = arith.mulf %52, %51 : vector<8x128xf32>
    %cst_36 = arith.constant 5.000000e-01 : f32
    %54 = vector.broadcast %cst_36 : f32 to vector<8x128xf32>
    %55 = arith.addf %53, %54 : vector<8x128xf32>
    %56 = arith.mulf %45, %12 : vector<8x128xf32>
    %57 = arith.mulf %37, %47 : vector<8x128xf32>
    %58 = arith.addf %56, %57 : vector<8x128xf32>
    %59 = math.tanh %58 : vector<8x128xf32>
    %60 = arith.mulf %55, %59 : vector<8x128xf32>
    %c0_i32_37 = arith.constant 0 : i32
    %61 = arith.addi %c0_i32_37, %c0_i32 : i32
    %62 = arith.index_cast %61 : i32 to index
    %c0_38 = arith.constant 0 : index
    %c0_39 = arith.constant 0 : index
    %63 = vector.load %arg12[%62, %c0_38, %c0_39] : memref<8x8x128xf32, #tpu.memory_space<vmem>>, vector<1x8x128xf32>
    %64 = vector.shape_cast %63 : vector<1x8x128xf32> to vector<8x128xf32>
    %65 = vector.shape_cast %60 : vector<8x128xf32> to vector<1x8x128xf32>
    tpu.vector_store %arg12[%62, %c0_38, %c0_39], %65 {strides = array<i32>} : memref<8x8x128xf32, #tpu.memory_space<vmem>>, vector<1x8x128xf32>,
    %c1_i32 = arith.constant 1 : i32
    %c0_40 = arith.constant 0 : index
    %66 = arith.index_cast %c1_i32 : i32 to index
    %c0_41 = arith.constant 0 : index
    %c0_42 = arith.constant 0 : index
    %67 = vector.load %arg11[%c0_40, %66, %c0_41, %c0_42] : memref<2x4x8x512xf32, #tpu.memory_space<vmem>>, vector<1x1x8x512xf32>
    %68 = vector.shape_cast %67 : vector<1x1x8x512xf32> to vector<8x512xf32>
    %c0_43 = arith.constant 0 : index
    %c0_44 = arith.constant 0 : index
    %69 = vector.load %arg3[%c0_43, %c0_44] : memref<128x512xf32, #tpu.memory_space<vmem>>, vector<128x512xf32>
    %cst_45 = arith.constant dense<0.000000e+00> : vector<8x512xf32>
    %70 = tpu.matmul %60, %69, %cst_45 {dimension_numbers = #tpu.dot_dimension_numbers<[1], [0], [0], [1], [0, 0, 1, 1], [], []>} : vector<8x128xf32>, vector<128x512xf32>, vector<8x512xf32> -> vector<8x512xf32>
    %71 = arith.addf %68, %70 : vector<8x512xf32>
    %72 = vector.extract_strided_slice %71 {offsets = [0, 0], sizes = [8, 128], strides = [1, 1]} : vector<8x512xf32> to vector<8x128xf32>
    %cst_46 = arith.constant 5.000000e-01 : f32
    %73 = vector.broadcast %cst_46 : f32 to vector<8x128xf32>
    %74 = arith.mulf %73, %72 : vector<8x128xf32>
    %75 = math.tanh %74 : vector<8x128xf32>
    %cst_47 = arith.constant 5.000000e-01 : f32
    %76 = vector.broadcast %cst_47 : f32 to vector<8x128xf32>
    %77 = arith.mulf %76, %75 : vector<8x128xf32>
    %cst_48 = arith.constant 5.000000e-01 : f32
    %78 = vector.broadcast %cst_48 : f32 to vector<8x128xf32>
    %79 = arith.addf %77, %78 : vector<8x128xf32>
    %80 = vector.extract_strided_slice %71 {offsets = [0, 128], sizes = [8, 128], strides = [1, 1]} : vector<8x512xf32> to vector<8x128xf32>
    %cst_49 = arith.constant 5.000000e-01 : f32
    %81 = vector.broadcast %cst_49 : f32 to vector<8x128xf32>
    %82 = arith.mulf %81, %80 : vector<8x128xf32>
    %83 = math.tanh %82 : vector<8x128xf32>
    %cst_50 = arith.constant 5.000000e-01 : f32
    %84 = vector.broadcast %cst_50 : f32 to vector<8x128xf32>
    %85 = arith.mulf %84, %83 : vector<8x128xf32>
    %cst_51 = arith.constant 5.000000e-01 : f32
    %86 = vector.broadcast %cst_51 : f32 to vector<8x128xf32>
    %87 = arith.addf %85, %86 : vector<8x128xf32>
    %88 = vector.extract_strided_slice %71 {offsets = [0, 256], sizes = [8, 128], strides = [1, 1]} : vector<8x512xf32> to vector<8x128xf32>
    %89 = math.tanh %88 : vector<8x128xf32>
    %90 = vector.extract_strided_slice %71 {offsets = [0, 384], sizes = [8, 128], strides = [1, 1]} : vector<8x512xf32> to vector<8x128xf32>
    %cst_52 = arith.constant 5.000000e-01 : f32
    %91 = vector.broadcast %cst_52 : f32 to vector<8x128xf32>
    %92 = arith.mulf %91, %90 : vector<8x128xf32>
    %93 = math.tanh %92 : vector<8x128xf32>
    %cst_53 = arith.constant 5.000000e-01 : f32
    %94 = vector.broadcast %cst_53 : f32 to vector<8x128xf32>
    %95 = arith.mulf %94, %93 : vector<8x128xf32>
    %cst_54 = arith.constant 5.000000e-01 : f32
    %96 = vector.broadcast %cst_54 : f32 to vector<8x128xf32>
    %97 = arith.addf %95, %96 : vector<8x128xf32>
    %98 = arith.mulf %87, %58 : vector<8x128xf32>
    %99 = arith.mulf %79, %89 : vector<8x128xf32>
    %100 = arith.addf %98, %99 : vector<8x128xf32>
    %101 = math.tanh %100 : vector<8x128xf32>
    %102 = arith.mulf %97, %101 : vector<8x128xf32>
    %c0_i32_55 = arith.constant 0 : i32
    %103 = arith.addi %c0_i32_55, %c1_i32 : i32
    %104 = arith.index_cast %103 : i32 to index
    %c0_56 = arith.constant 0 : index
    %c0_57 = arith.constant 0 : index
    %105 = vector.load %arg12[%104, %c0_56, %c0_57] : memref<8x8x128xf32, #tpu.memory_space<vmem>>, vector<1x8x128xf32>
    %106 = vector.shape_cast %105 : vector<1x8x128xf32> to vector<8x128xf32>
    %107 = vector.shape_cast %102 : vector<8x128xf32> to vector<1x8x128xf32>
    tpu.vector_store %arg12[%104, %c0_56, %c0_57], %107 {strides = array<i32>} : memref<8x8x128xf32, #tpu.memory_space<vmem>>, vector<1x8x128xf32>,
    %c2_i32 = arith.constant 2 : i32
    %c0_58 = arith.constant 0 : index
    %108 = arith.index_cast %c2_i32 : i32 to index
    %c0_59 = arith.constant 0 : index
    %c0_60 = arith.constant 0 : index
    %109 = vector.load %arg11[%c0_58, %108, %c0_59, %c0_60] : memref<2x4x8x512xf32, #tpu.memory_space<vmem>>, vector<1x1x8x512xf32>
    %110 = vector.shape_cast %109 : vector<1x1x8x512xf32> to vector<8x512xf32>
    %c0_61 = arith.constant 0 : index
    %c0_62 = arith.constant 0 : index
    %111 = vector.load %arg3[%c0_61, %c0_62] : memref<128x512xf32, #tpu.memory_space<vmem>>, vector<128x512xf32>
    %cst_63 = arith.constant dense<0.000000e+00> : vector<8x512xf32>
    %112 = tpu.matmul %102, %111, %cst_63 {dimension_numbers = #tpu.dot_dimension_numbers<[1], [0], [0], [1], [0, 0, 1, 1], [], []>} : vector<8x128xf32>, vector<128x512xf32>, vector<8x512xf32> -> vector<8x512xf32>
    %113 = arith.addf %110, %112 : vector<8x512xf32>
    %114 = vector.extract_strided_slice %113 {offsets = [0, 0], sizes = [8, 128], strides = [1, 1]} : vector<8x512xf32> to vector<8x128xf32>
    %cst_64 = arith.constant 5.000000e-01 : f32
    %115 = vector.broadcast %cst_64 : f32 to vector<8x128xf32>
    %116 = arith.mulf %115, %114 : vector<8x128xf32>
    %117 = math.tanh %116 : vector<8x128xf32>
    %cst_65 = arith.constant 5.000000e-01 : f32
    %118 = vector.broadcast %cst_65 : f32 to vector<8x128xf32>
    %119 = arith.mulf %118, %117 : vector<8x128xf32>
    %cst_66 = arith.constant 5.000000e-01 : f32
    %120 = vector.broadcast %cst_66 : f32 to vector<8x128xf32>
    %121 = arith.addf %119, %120 : vector<8x128xf32>
    %122 = vector.extract_strided_slice %113 {offsets = [0, 128], sizes = [8, 128], strides = [1, 1]} : vector<8x512xf32> to vector<8x128xf32>
    %cst_67 = arith.constant 5.000000e-01 : f32
    %123 = vector.broadcast %cst_67 : f32 to vector<8x128xf32>
    %124 = arith.mulf %123, %122 : vector<8x128xf32>
    %125 = math.tanh %124 : vector<8x128xf32>
    %cst_68 = arith.constant 5.000000e-01 : f32
    %126 = vector.broadcast %cst_68 : f32 to vector<8x128xf32>
    %127 = arith.mulf %126, %125 : vector<8x128xf32>
    %cst_69 = arith.constant 5.000000e-01 : f32
    %128 = vector.broadcast %cst_69 : f32 to vector<8x128xf32>
    %129 = arith.addf %127, %128 : vector<8x128xf32>
    %130 = vector.extract_strided_slice %113 {offsets = [0, 256], sizes = [8, 128], strides = [1, 1]} : vector<8x512xf32> to vector<8x128xf32>
    %131 = math.tanh %130 : vector<8x128xf32>
    %132 = vector.extract_strided_slice %113 {offsets = [0, 384], sizes = [8, 128], strides = [1, 1]} : vector<8x512xf32> to vector<8x128xf32>
    %cst_70 = arith.constant 5.000000e-01 : f32
    %133 = vector.broadcast %cst_70 : f32 to vector<8x128xf32>
    %134 = arith.mulf %133, %132 : vector<8x128xf32>
    %135 = math.tanh %134 : vector<8x128xf32>
    %cst_71 = arith.constant 5.000000e-01 : f32
    %136 = vector.broadcast %cst_71 : f32 to vector<8x128xf32>
    %137 = arith.mulf %136, %135 : vector<8x128xf32>
    %cst_72 = arith.constant 5.000000e-01 : f32
    %138 = vector.broadcast %cst_72 : f32 to vector<8x128xf32>
    %139 = arith.addf %137, %138 : vector<8x128xf32>
    %140 = arith.mulf %129, %100 : vector<8x128xf32>
    %141 = arith.mulf %121, %131 : vector<8x128xf32>
    %142 = arith.addf %140, %141 : vector<8x128xf32>
    %143 = math.tanh %142 : vector<8x128xf32>
    %144 = arith.mulf %139, %143 : vector<8x128xf32>
    %c0_i32_73 = arith.constant 0 : i32
    %145 = arith.addi %c0_i32_73, %c2_i32 : i32
    %146 = arith.index_cast %145 : i32 to index
    %c0_74 = arith.constant 0 : index
    %c0_75 = arith.constant 0 : index
    %147 = vector.load %arg12[%146, %c0_74, %c0_75] : memref<8x8x128xf32, #tpu.memory_space<vmem>>, vector<1x8x128xf32>
    %148 = vector.shape_cast %147 : vector<1x8x128xf32> to vector<8x128xf32>
    %149 = vector.shape_cast %144 : vector<8x128xf32> to vector<1x8x128xf32>
    tpu.vector_store %arg12[%146, %c0_74, %c0_75], %149 {strides = array<i32>} : memref<8x8x128xf32, #tpu.memory_space<vmem>>, vector<1x8x128xf32>,
    %c3_i32 = arith.constant 3 : i32
    %c0_76 = arith.constant 0 : index
    %150 = arith.index_cast %c3_i32 : i32 to index
    %c0_77 = arith.constant 0 : index
    %c0_78 = arith.constant 0 : index
    %151 = vector.load %arg11[%c0_76, %150, %c0_77, %c0_78] : memref<2x4x8x512xf32, #tpu.memory_space<vmem>>, vector<1x1x8x512xf32>
    %152 = vector.shape_cast %151 : vector<1x1x8x512xf32> to vector<8x512xf32>
    %c0_79 = arith.constant 0 : index
    %c0_80 = arith.constant 0 : index
    %153 = vector.load %arg3[%c0_79, %c0_80] : memref<128x512xf32, #tpu.memory_space<vmem>>, vector<128x512xf32>
    %cst_81 = arith.constant dense<0.000000e+00> : vector<8x512xf32>
    %154 = tpu.matmul %144, %153, %cst_81 {dimension_numbers = #tpu.dot_dimension_numbers<[1], [0], [0], [1], [0, 0, 1, 1], [], []>} : vector<8x128xf32>, vector<128x512xf32>, vector<8x512xf32> -> vector<8x512xf32>
    %155 = arith.addf %152, %154 : vector<8x512xf32>
    %156 = vector.extract_strided_slice %155 {offsets = [0, 0], sizes = [8, 128], strides = [1, 1]} : vector<8x512xf32> to vector<8x128xf32>
    %cst_82 = arith.constant 5.000000e-01 : f32
    %157 = vector.broadcast %cst_82 : f32 to vector<8x128xf32>
    %158 = arith.mulf %157, %156 : vector<8x128xf32>
    %159 = math.tanh %158 : vector<8x128xf32>
    %cst_83 = arith.constant 5.000000e-01 : f32
    %160 = vector.broadcast %cst_83 : f32 to vector<8x128xf32>
    %161 = arith.mulf %160, %159 : vector<8x128xf32>
    %cst_84 = arith.constant 5.000000e-01 : f32
    %162 = vector.broadcast %cst_84 : f32 to vector<8x128xf32>
    %163 = arith.addf %161, %162 : vector<8x128xf32>
    %164 = vector.extract_strided_slice %155 {offsets = [0, 128], sizes = [8, 128], strides = [1, 1]} : vector<8x512xf32> to vector<8x128xf32>
    %cst_85 = arith.constant 5.000000e-01 : f32
    %165 = vector.broadcast %cst_85 : f32 to vector<8x128xf32>
    %166 = arith.mulf %165, %164 : vector<8x128xf32>
    %167 = math.tanh %166 : vector<8x128xf32>
    %cst_86 = arith.constant 5.000000e-01 : f32
    %168 = vector.broadcast %cst_86 : f32 to vector<8x128xf32>
    %169 = arith.mulf %168, %167 : vector<8x128xf32>
    %cst_87 = arith.constant 5.000000e-01 : f32
    %170 = vector.broadcast %cst_87 : f32 to vector<8x128xf32>
    %171 = arith.addf %169, %170 : vector<8x128xf32>
    %172 = vector.extract_strided_slice %155 {offsets = [0, 256], sizes = [8, 128], strides = [1, 1]} : vector<8x512xf32> to vector<8x128xf32>
    %173 = math.tanh %172 : vector<8x128xf32>
    %174 = vector.extract_strided_slice %155 {offsets = [0, 384], sizes = [8, 128], strides = [1, 1]} : vector<8x512xf32> to vector<8x128xf32>
    %cst_88 = arith.constant 5.000000e-01 : f32
    %175 = vector.broadcast %cst_88 : f32 to vector<8x128xf32>
    %176 = arith.mulf %175, %174 : vector<8x128xf32>
    %177 = math.tanh %176 : vector<8x128xf32>
    %cst_89 = arith.constant 5.000000e-01 : f32
    %178 = vector.broadcast %cst_89 : f32 to vector<8x128xf32>
    %179 = arith.mulf %178, %177 : vector<8x128xf32>
    %cst_90 = arith.constant 5.000000e-01 : f32
    %180 = vector.broadcast %cst_90 : f32 to vector<8x128xf32>
    %181 = arith.addf %179, %180 : vector<8x128xf32>
    %182 = arith.mulf %171, %142 : vector<8x128xf32>
    %183 = arith.mulf %163, %173 : vector<8x128xf32>
    %184 = arith.addf %182, %183 : vector<8x128xf32>
    %185 = math.tanh %184 : vector<8x128xf32>
    %186 = arith.mulf %181, %185 : vector<8x128xf32>
    %c0_i32_91 = arith.constant 0 : i32
    %187 = arith.addi %c0_i32_91, %c3_i32 : i32
    %188 = arith.index_cast %187 : i32 to index
    %c0_92 = arith.constant 0 : index
    %c0_93 = arith.constant 0 : index
    %189 = vector.load %arg12[%188, %c0_92, %c0_93] : memref<8x8x128xf32, #tpu.memory_space<vmem>>, vector<1x8x128xf32>
    %190 = vector.shape_cast %189 : vector<1x8x128xf32> to vector<8x128xf32>
    %191 = vector.shape_cast %186 : vector<8x128xf32> to vector<1x8x128xf32>
    tpu.vector_store %arg12[%188, %c0_92, %c0_93], %191 {strides = array<i32>} : memref<8x8x128xf32, #tpu.memory_space<vmem>>, vector<1x8x128xf32>,
    %c4_i32 = arith.constant 4 : i32
    %c0_i32_94 = arith.constant 0 : i32
    %c1_95 = arith.constant 1 : index
    %192 = arith.index_cast %c0_i32_94 : i32 to index
    %c0_96 = arith.constant 0 : index
    %c0_97 = arith.constant 0 : index
    %193 = vector.load %arg11[%c1_95, %192, %c0_96, %c0_97] : memref<2x4x8x512xf32, #tpu.memory_space<vmem>>, vector<1x1x8x512xf32>
    %194 = vector.shape_cast %193 : vector<1x1x8x512xf32> to vector<8x512xf32>
    %c0_98 = arith.constant 0 : index
    %c0_99 = arith.constant 0 : index
    %195 = vector.load %arg3[%c0_98, %c0_99] : memref<128x512xf32, #tpu.memory_space<vmem>>, vector<128x512xf32>
    %cst_100 = arith.constant dense<0.000000e+00> : vector<8x512xf32>
    %196 = tpu.matmul %186, %195, %cst_100 {dimension_numbers = #tpu.dot_dimension_numbers<[1], [0], [0], [1], [0, 0, 1, 1], [], []>} : vector<8x128xf32>, vector<128x512xf32>, vector<8x512xf32> -> vector<8x512xf32>
    %197 = arith.addf %194, %196 : vector<8x512xf32>
    %198 = vector.extract_strided_slice %197 {offsets = [0, 0], sizes = [8, 128], strides = [1, 1]} : vector<8x512xf32> to vector<8x128xf32>
    %cst_101 = arith.constant 5.000000e-01 : f32
    %199 = vector.broadcast %cst_101 : f32 to vector<8x128xf32>
    %200 = arith.mulf %199, %198 : vector<8x128xf32>
    %201 = math.tanh %200 : vector<8x128xf32>
    %cst_102 = arith.constant 5.000000e-01 : f32
    %202 = vector.broadcast %cst_102 : f32 to vector<8x128xf32>
    %203 = arith.mulf %202, %201 : vector<8x128xf32>
    %cst_103 = arith.constant 5.000000e-01 : f32
    %204 = vector.broadcast %cst_103 : f32 to vector<8x128xf32>
    %205 = arith.addf %203, %204 : vector<8x128xf32>
    %206 = vector.extract_strided_slice %197 {offsets = [0, 128], sizes = [8, 128], strides = [1, 1]} : vector<8x512xf32> to vector<8x128xf32>
    %cst_104 = arith.constant 5.000000e-01 : f32
    %207 = vector.broadcast %cst_104 : f32 to vector<8x128xf32>
    %208 = arith.mulf %207, %206 : vector<8x128xf32>
    %209 = math.tanh %208 : vector<8x128xf32>
    %cst_105 = arith.constant 5.000000e-01 : f32
    %210 = vector.broadcast %cst_105 : f32 to vector<8x128xf32>
    %211 = arith.mulf %210, %209 : vector<8x128xf32>
    %cst_106 = arith.constant 5.000000e-01 : f32
    %212 = vector.broadcast %cst_106 : f32 to vector<8x128xf32>
    %213 = arith.addf %211, %212 : vector<8x128xf32>
    %214 = vector.extract_strided_slice %197 {offsets = [0, 256], sizes = [8, 128], strides = [1, 1]} : vector<8x512xf32> to vector<8x128xf32>
    %215 = math.tanh %214 : vector<8x128xf32>
    %216 = vector.extract_strided_slice %197 {offsets = [0, 384], sizes = [8, 128], strides = [1, 1]} : vector<8x512xf32> to vector<8x128xf32>
    %cst_107 = arith.constant 5.000000e-01 : f32
    %217 = vector.broadcast %cst_107 : f32 to vector<8x128xf32>
    %218 = arith.mulf %217, %216 : vector<8x128xf32>
    %219 = math.tanh %218 : vector<8x128xf32>
    %cst_108 = arith.constant 5.000000e-01 : f32
    %220 = vector.broadcast %cst_108 : f32 to vector<8x128xf32>
    %221 = arith.mulf %220, %219 : vector<8x128xf32>
    %cst_109 = arith.constant 5.000000e-01 : f32
    %222 = vector.broadcast %cst_109 : f32 to vector<8x128xf32>
    %223 = arith.addf %221, %222 : vector<8x128xf32>
    %224 = arith.mulf %213, %184 : vector<8x128xf32>
    %225 = arith.mulf %205, %215 : vector<8x128xf32>
    %226 = arith.addf %224, %225 : vector<8x128xf32>
    %227 = math.tanh %226 : vector<8x128xf32>
    %228 = arith.mulf %223, %227 : vector<8x128xf32>
    %c4_i32_110 = arith.constant 4 : i32
    %229 = arith.addi %c4_i32_110, %c0_i32_94 : i32
    %230 = arith.index_cast %229 : i32 to index
    %c0_111 = arith.constant 0 : index
    %c0_112 = arith.constant 0 : index
    %231 = vector.load %arg12[%230, %c0_111, %c0_112] : memref<8x8x128xf32, #tpu.memory_space<vmem>>, vector<1x8x128xf32>
    %232 = vector.shape_cast %231 : vector<1x8x128xf32> to vector<8x128xf32>
    %233 = vector.shape_cast %228 : vector<8x128xf32> to vector<1x8x128xf32>
    tpu.vector_store %arg12[%230, %c0_111, %c0_112], %233 {strides = array<i32>} : memref<8x8x128xf32, #tpu.memory_space<vmem>>, vector<1x8x128xf32>,
    %c1_i32_113 = arith.constant 1 : i32
    %c1_114 = arith.constant 1 : index
    %234 = arith.index_cast %c1_i32_113 : i32 to index
    %c0_115 = arith.constant 0 : index
    %c0_116 = arith.constant 0 : index
    %235 = vector.load %arg11[%c1_114, %234, %c0_115, %c0_116] : memref<2x4x8x512xf32, #tpu.memory_space<vmem>>, vector<1x1x8x512xf32>
    %236 = vector.shape_cast %235 : vector<1x1x8x512xf32> to vector<8x512xf32>
    %c0_117 = arith.constant 0 : index
    %c0_118 = arith.constant 0 : index
    %237 = vector.load %arg3[%c0_117, %c0_118] : memref<128x512xf32, #tpu.memory_space<vmem>>, vector<128x512xf32>
    %cst_119 = arith.constant dense<0.000000e+00> : vector<8x512xf32>
    %238 = tpu.matmul %228, %237, %cst_119 {dimension_numbers = #tpu.dot_dimension_numbers<[1], [0], [0], [1], [0, 0, 1, 1], [], []>} : vector<8x128xf32>, vector<128x512xf32>, vector<8x512xf32> -> vector<8x512xf32>
    %239 = arith.addf %236, %238 : vector<8x512xf32>
    %240 = vector.extract_strided_slice %239 {offsets = [0, 0], sizes = [8, 128], strides = [1, 1]} : vector<8x512xf32> to vector<8x128xf32>
    %cst_120 = arith.constant 5.000000e-01 : f32
    %241 = vector.broadcast %cst_120 : f32 to vector<8x128xf32>
    %242 = arith.mulf %241, %240 : vector<8x128xf32>
    %243 = math.tanh %242 : vector<8x128xf32>
    %cst_121 = arith.constant 5.000000e-01 : f32
    %244 = vector.broadcast %cst_121 : f32 to vector<8x128xf32>
    %245 = arith.mulf %244, %243 : vector<8x128xf32>
    %cst_122 = arith.constant 5.000000e-01 : f32
    %246 = vector.broadcast %cst_122 : f32 to vector<8x128xf32>
    %247 = arith.addf %245, %246 : vector<8x128xf32>
    %248 = vector.extract_strided_slice %239 {offsets = [0, 128], sizes = [8, 128], strides = [1, 1]} : vector<8x512xf32> to vector<8x128xf32>
    %cst_123 = arith.constant 5.000000e-01 : f32
    %249 = vector.broadcast %cst_123 : f32 to vector<8x128xf32>
    %250 = arith.mulf %249, %248 : vector<8x128xf32>
    %251 = math.tanh %250 : vector<8x128xf32>
    %cst_124 = arith.constant 5.000000e-01 : f32
    %252 = vector.broadcast %cst_124 : f32 to vector<8x128xf32>
    %253 = arith.mulf %252, %251 : vector<8x128xf32>
    %cst_125 = arith.constant 5.000000e-01 : f32
    %254 = vector.broadcast %cst_125 : f32 to vector<8x128xf32>
    %255 = arith.addf %253, %254 : vector<8x128xf32>
    %256 = vector.extract_strided_slice %239 {offsets = [0, 256], sizes = [8, 128], strides = [1, 1]} : vector<8x512xf32> to vector<8x128xf32>
    %257 = math.tanh %256 : vector<8x128xf32>
    %258 = vector.extract_strided_slice %239 {offsets = [0, 384], sizes = [8, 128], strides = [1, 1]} : vector<8x512xf32> to vector<8x128xf32>
    %cst_126 = arith.constant 5.000000e-01 : f32
    %259 = vector.broadcast %cst_126 : f32 to vector<8x128xf32>
    %260 = arith.mulf %259, %258 : vector<8x128xf32>
    %261 = math.tanh %260 : vector<8x128xf32>
    %cst_127 = arith.constant 5.000000e-01 : f32
    %262 = vector.broadcast %cst_127 : f32 to vector<8x128xf32>
    %263 = arith.mulf %262, %261 : vector<8x128xf32>
    %cst_128 = arith.constant 5.000000e-01 : f32
    %264 = vector.broadcast %cst_128 : f32 to vector<8x128xf32>
    %265 = arith.addf %263, %264 : vector<8x128xf32>
    %266 = arith.mulf %255, %226 : vector<8x128xf32>
    %267 = arith.mulf %247, %257 : vector<8x128xf32>
    %268 = arith.addf %266, %267 : vector<8x128xf32>
    %269 = math.tanh %268 : vector<8x128xf32>
    %270 = arith.mulf %265, %269 : vector<8x128xf32>
    %c4_i32_129 = arith.constant 4 : i32
    %271 = arith.addi %c4_i32_129, %c1_i32_113 : i32
    %272 = arith.index_cast %271 : i32 to index
    %c0_130 = arith.constant 0 : index
    %c0_131 = arith.constant 0 : index
    %273 = vector.load %arg12[%272, %c0_130, %c0_131] : memref<8x8x128xf32, #tpu.memory_space<vmem>>, vector<1x8x128xf32>
    %274 = vector.shape_cast %273 : vector<1x8x128xf32> to vector<8x128xf32>
    %275 = vector.shape_cast %270 : vector<8x128xf32> to vector<1x8x128xf32>
    tpu.vector_store %arg12[%272, %c0_130, %c0_131], %275 {strides = array<i32>} : memref<8x8x128xf32, #tpu.memory_space<vmem>>, vector<1x8x128xf32>,
    %c2_i32_132 = arith.constant 2 : i32
    %c1_133 = arith.constant 1 : index
    %276 = arith.index_cast %c2_i32_132 : i32 to index
    %c0_134 = arith.constant 0 : index
    %c0_135 = arith.constant 0 : index
    %277 = vector.load %arg11[%c1_133, %276, %c0_134, %c0_135] : memref<2x4x8x512xf32, #tpu.memory_space<vmem>>, vector<1x1x8x512xf32>
    %278 = vector.shape_cast %277 : vector<1x1x8x512xf32> to vector<8x512xf32>
    %c0_136 = arith.constant 0 : index
    %c0_137 = arith.constant 0 : index
    %279 = vector.load %arg3[%c0_136, %c0_137] : memref<128x512xf32, #tpu.memory_space<vmem>>, vector<128x512xf32>
    %cst_138 = arith.constant dense<0.000000e+00> : vector<8x512xf32>
    %280 = tpu.matmul %270, %279, %cst_138 {dimension_numbers = #tpu.dot_dimension_numbers<[1], [0], [0], [1], [0, 0, 1, 1], [], []>} : vector<8x128xf32>, vector<128x512xf32>, vector<8x512xf32> -> vector<8x512xf32>
    %281 = arith.addf %278, %280 : vector<8x512xf32>
    %282 = vector.extract_strided_slice %281 {offsets = [0, 0], sizes = [8, 128], strides = [1, 1]} : vector<8x512xf32> to vector<8x128xf32>
    %cst_139 = arith.constant 5.000000e-01 : f32
    %283 = vector.broadcast %cst_139 : f32 to vector<8x128xf32>
    %284 = arith.mulf %283, %282 : vector<8x128xf32>
    %285 = math.tanh %284 : vector<8x128xf32>
    %cst_140 = arith.constant 5.000000e-01 : f32
    %286 = vector.broadcast %cst_140 : f32 to vector<8x128xf32>
    %287 = arith.mulf %286, %285 : vector<8x128xf32>
    %cst_141 = arith.constant 5.000000e-01 : f32
    %288 = vector.broadcast %cst_141 : f32 to vector<8x128xf32>
    %289 = arith.addf %287, %288 : vector<8x128xf32>
    %290 = vector.extract_strided_slice %281 {offsets = [0, 128], sizes = [8, 128], strides = [1, 1]} : vector<8x512xf32> to vector<8x128xf32>
    %cst_142 = arith.constant 5.000000e-01 : f32
    %291 = vector.broadcast %cst_142 : f32 to vector<8x128xf32>
    %292 = arith.mulf %291, %290 : vector<8x128xf32>
    %293 = math.tanh %292 : vector<8x128xf32>
    %cst_143 = arith.constant 5.000000e-01 : f32
    %294 = vector.broadcast %cst_143 : f32 to vector<8x128xf32>
    %295 = arith.mulf %294, %293 : vector<8x128xf32>
    %cst_144 = arith.constant 5.000000e-01 : f32
    %296 = vector.broadcast %cst_144 : f32 to vector<8x128xf32>
    %297 = arith.addf %295, %296 : vector<8x128xf32>
    %298 = vector.extract_strided_slice %281 {offsets = [0, 256], sizes = [8, 128], strides = [1, 1]} : vector<8x512xf32> to vector<8x128xf32>
    %299 = math.tanh %298 : vector<8x128xf32>
    %300 = vector.extract_strided_slice %281 {offsets = [0, 384], sizes = [8, 128], strides = [1, 1]} : vector<8x512xf32> to vector<8x128xf32>
    %cst_145 = arith.constant 5.000000e-01 : f32
    %301 = vector.broadcast %cst_145 : f32 to vector<8x128xf32>
    %302 = arith.mulf %301, %300 : vector<8x128xf32>
    %303 = math.tanh %302 : vector<8x128xf32>
    %cst_146 = arith.constant 5.000000e-01 : f32
    %304 = vector.broadcast %cst_146 : f32 to vector<8x128xf32>
    %305 = arith.mulf %304, %303 : vector<8x128xf32>
    %cst_147 = arith.constant 5.000000e-01 : f32
    %306 = vector.broadcast %cst_147 : f32 to vector<8x128xf32>
    %307 = arith.addf %305, %306 : vector<8x128xf32>
    %308 = arith.mulf %297, %268 : vector<8x128xf32>
    %309 = arith.mulf %289, %299 : vector<8x128xf32>
    %310 = arith.addf %308, %309 : vector<8x128xf32>
    %311 = math.tanh %310 : vector<8x128xf32>
    %312 = arith.mulf %307, %311 : vector<8x128xf32>
    %c4_i32_148 = arith.constant 4 : i32
    %313 = arith.addi %c4_i32_148, %c2_i32_132 : i32
    %314 = arith.index_cast %313 : i32 to index
    %c0_149 = arith.constant 0 : index
    %c0_150 = arith.constant 0 : index
    %315 = vector.load %arg12[%314, %c0_149, %c0_150] : memref<8x8x128xf32, #tpu.memory_space<vmem>>, vector<1x8x128xf32>
    %316 = vector.shape_cast %315 : vector<1x8x128xf32> to vector<8x128xf32>
    %317 = vector.shape_cast %312 : vector<8x128xf32> to vector<1x8x128xf32>
    tpu.vector_store %arg12[%314, %c0_149, %c0_150], %317 {strides = array<i32>} : memref<8x8x128xf32, #tpu.memory_space<vmem>>, vector<1x8x128xf32>,
    %c3_i32_151 = arith.constant 3 : i32
    %c1_152 = arith.constant 1 : index
    %318 = arith.index_cast %c3_i32_151 : i32 to index
    %c0_153 = arith.constant 0 : index
    %c0_154 = arith.constant 0 : index
    %319 = vector.load %arg11[%c1_152, %318, %c0_153, %c0_154] : memref<2x4x8x512xf32, #tpu.memory_space<vmem>>, vector<1x1x8x512xf32>
    %320 = vector.shape_cast %319 : vector<1x1x8x512xf32> to vector<8x512xf32>
    %c0_155 = arith.constant 0 : index
    %c0_156 = arith.constant 0 : index
    %321 = vector.load %arg3[%c0_155, %c0_156] : memref<128x512xf32, #tpu.memory_space<vmem>>, vector<128x512xf32>
    %cst_157 = arith.constant dense<0.000000e+00> : vector<8x512xf32>
    %322 = tpu.matmul %312, %321, %cst_157 {dimension_numbers = #tpu.dot_dimension_numbers<[1], [0], [0], [1], [0, 0, 1, 1], [], []>} : vector<8x128xf32>, vector<128x512xf32>, vector<8x512xf32> -> vector<8x512xf32>
    %323 = arith.addf %320, %322 : vector<8x512xf32>
    %324 = vector.extract_strided_slice %323 {offsets = [0, 0], sizes = [8, 128], strides = [1, 1]} : vector<8x512xf32> to vector<8x128xf32>
    %cst_158 = arith.constant 5.000000e-01 : f32
    %325 = vector.broadcast %cst_158 : f32 to vector<8x128xf32>
    %326 = arith.mulf %325, %324 : vector<8x128xf32>
    %327 = math.tanh %326 : vector<8x128xf32>
    %cst_159 = arith.constant 5.000000e-01 : f32
    %328 = vector.broadcast %cst_159 : f32 to vector<8x128xf32>
    %329 = arith.mulf %328, %327 : vector<8x128xf32>
    %cst_160 = arith.constant 5.000000e-01 : f32
    %330 = vector.broadcast %cst_160 : f32 to vector<8x128xf32>
    %331 = arith.addf %329, %330 : vector<8x128xf32>
    %332 = vector.extract_strided_slice %323 {offsets = [0, 128], sizes = [8, 128], strides = [1, 1]} : vector<8x512xf32> to vector<8x128xf32>
    %cst_161 = arith.constant 5.000000e-01 : f32
    %333 = vector.broadcast %cst_161 : f32 to vector<8x128xf32>
    %334 = arith.mulf %333, %332 : vector<8x128xf32>
    %335 = math.tanh %334 : vector<8x128xf32>
    %cst_162 = arith.constant 5.000000e-01 : f32
    %336 = vector.broadcast %cst_162 : f32 to vector<8x128xf32>
    %337 = arith.mulf %336, %335 : vector<8x128xf32>
    %cst_163 = arith.constant 5.000000e-01 : f32
    %338 = vector.broadcast %cst_163 : f32 to vector<8x128xf32>
    %339 = arith.addf %337, %338 : vector<8x128xf32>
    %340 = vector.extract_strided_slice %323 {offsets = [0, 256], sizes = [8, 128], strides = [1, 1]} : vector<8x512xf32> to vector<8x128xf32>
    %341 = math.tanh %340 : vector<8x128xf32>
    %342 = vector.extract_strided_slice %323 {offsets = [0, 384], sizes = [8, 128], strides = [1, 1]} : vector<8x512xf32> to vector<8x128xf32>
    %cst_164 = arith.constant 5.000000e-01 : f32
    %343 = vector.broadcast %cst_164 : f32 to vector<8x128xf32>
    %344 = arith.mulf %343, %342 : vector<8x128xf32>
    %345 = math.tanh %344 : vector<8x128xf32>
    %cst_165 = arith.constant 5.000000e-01 : f32
    %346 = vector.broadcast %cst_165 : f32 to vector<8x128xf32>
    %347 = arith.mulf %346, %345 : vector<8x128xf32>
    %cst_166 = arith.constant 5.000000e-01 : f32
    %348 = vector.broadcast %cst_166 : f32 to vector<8x128xf32>
    %349 = arith.addf %347, %348 : vector<8x128xf32>
    %350 = arith.mulf %339, %310 : vector<8x128xf32>
    %351 = arith.mulf %331, %341 : vector<8x128xf32>
    %352 = arith.addf %350, %351 : vector<8x128xf32>
    %353 = math.tanh %352 : vector<8x128xf32>
    %354 = arith.mulf %349, %353 : vector<8x128xf32>
    %c4_i32_167 = arith.constant 4 : i32
    %355 = arith.addi %c4_i32_167, %c3_i32_151 : i32
    %356 = arith.index_cast %355 : i32 to index
    %c0_168 = arith.constant 0 : index
    %c0_169 = arith.constant 0 : index
    %357 = vector.load %arg12[%356, %c0_168, %c0_169] : memref<8x8x128xf32, #tpu.memory_space<vmem>>, vector<1x8x128xf32>
    %358 = vector.shape_cast %357 : vector<1x8x128xf32> to vector<8x128xf32>
    %359 = vector.shape_cast %354 : vector<8x128xf32> to vector<1x8x128xf32>
    tpu.vector_store %arg12[%356, %c0_168, %c0_169], %359 {strides = array<i32>} : memref<8x8x128xf32, #tpu.memory_space<vmem>>, vector<1x8x128xf32>,
    %c4_i32_170 = arith.constant 4 : i32
    %c0_171 = arith.constant 0 : index
    %c0_172 = arith.constant 0 : index
    %c0_173 = arith.constant 0 : index
    %360 = vector.load %arg12[%c0_171, %c0_172, %c0_173] : memref<8x8x128xf32, #tpu.memory_space<vmem>>, vector<4x8x128xf32>
    %361 = vector.shape_cast %360 : vector<4x8x128xf32> to vector<32x128xf32>
    %c0_174 = arith.constant 0 : index
    %c0_175 = arith.constant 0 : index
    %362 = vector.load %arg5[%c0_174, %c0_175] : memref<128x512xf32, #tpu.memory_space<vmem>>, vector<128x512xf32>
    %cst_176 = arith.constant dense<0.000000e+00> : vector<32x512xf32>
    %363 = tpu.matmul %361, %362, %cst_176 {dimension_numbers = #tpu.dot_dimension_numbers<[1], [0], [0], [1], [0, 0, 1, 1], [], []>} : vector<32x128xf32>, vector<128x512xf32>, vector<32x512xf32> -> vector<32x512xf32>
    %c0_177 = arith.constant 0 : index
    %c0_178 = arith.constant 0 : index
    %364 = vector.load %arg7[%c0_177, %c0_178] : memref<1x512xf32, #tpu.memory_space<vmem>>, vector<1x512xf32>
    %365 = vector.broadcast %364 : vector<1x512xf32> to vector<32x512xf32>
    %366 = arith.addf %363, %365 : vector<32x512xf32>
    %367 = vector.shape_cast %366 : vector<32x512xf32> to vector<4x8x512xf32>
    %c0_179 = arith.constant 0 : index
    %c0_180 = arith.constant 0 : index
    %c0_181 = arith.constant 0 : index
    %c0_182 = arith.constant 0 : index
    %368 = vector.load %arg11[%c0_179, %c0_180, %c0_181, %c0_182] : memref<2x4x8x512xf32, #tpu.memory_space<vmem>>, vector<1x4x8x512xf32>
    %369 = vector.shape_cast %368 : vector<1x4x8x512xf32> to vector<4x8x512xf32>
    %370 = vector.shape_cast %367 : vector<4x8x512xf32> to vector<1x4x8x512xf32>
    tpu.vector_store %arg11[%c0_179, %c0_180, %c0_181, %c0_182], %370 {strides = array<i32>} : memref<2x4x8x512xf32, #tpu.memory_space<vmem>>, vector<1x4x8x512xf32>,
    %cst_183 = arith.constant 0.000000e+00 : f32
    %371 = vector.broadcast %cst_183 : f32 to vector<8x128xf32>
    %cst_184 = arith.constant 0.000000e+00 : f32
    %372 = vector.broadcast %cst_184 : f32 to vector<8x128xf32>
    %c4_185 = arith.constant 4 : index
    %c0_186 = arith.constant 0 : index
    %c0_187 = arith.constant 0 : index
    %373 = vector.load %arg12[%c4_185, %c0_186, %c0_187] : memref<8x8x128xf32, #tpu.memory_space<vmem>>, vector<4x8x128xf32>
    %374 = vector.shape_cast %373 : vector<4x8x128xf32> to vector<32x128xf32>
    %c0_188 = arith.constant 0 : index
    %c0_189 = arith.constant 0 : index
    %375 = vector.load %arg5[%c0_188, %c0_189] : memref<128x512xf32, #tpu.memory_space<vmem>>, vector<128x512xf32>
    %cst_190 = arith.constant dense<0.000000e+00> : vector<32x512xf32>
    %376 = tpu.matmul %374, %375, %cst_190 {dimension_numbers = #tpu.dot_dimension_numbers<[1], [0], [0], [1], [0, 0, 1, 1], [], []>} : vector<32x128xf32>, vector<128x512xf32>, vector<32x512xf32> -> vector<32x512xf32>
    %c0_191 = arith.constant 0 : index
    %c0_192 = arith.constant 0 : index
    %377 = vector.load %arg7[%c0_191, %c0_192] : memref<1x512xf32, #tpu.memory_space<vmem>>, vector<1x512xf32>
    %378 = vector.broadcast %377 : vector<1x512xf32> to vector<32x512xf32>
    %379 = arith.addf %376, %378 : vector<32x512xf32>
    %380 = vector.shape_cast %379 : vector<32x512xf32> to vector<4x8x512xf32>
    %c1_193 = arith.constant 1 : index
    %c0_194 = arith.constant 0 : index
    %c0_195 = arith.constant 0 : index
    %c0_196 = arith.constant 0 : index
    %381 = vector.load %arg11[%c1_193, %c0_194, %c0_195, %c0_196] : memref<2x4x8x512xf32, #tpu.memory_space<vmem>>, vector<1x4x8x512xf32>
    %382 = vector.shape_cast %381 : vector<1x4x8x512xf32> to vector<4x8x512xf32>
    %383 = vector.shape_cast %380 : vector<4x8x512xf32> to vector<1x4x8x512xf32>
    tpu.vector_store %arg11[%c1_193, %c0_194, %c0_195, %c0_196], %383 {strides = array<i32>} : memref<2x4x8x512xf32, #tpu.memory_space<vmem>>, vector<1x4x8x512xf32>,
    %c0_i32_197 = arith.constant 0 : i32
    %c0_198 = arith.constant 0 : index
    %384 = arith.index_cast %c0_i32_197 : i32 to index
    %c0_199 = arith.constant 0 : index
    %c0_200 = arith.constant 0 : index
    %385 = vector.load %arg11[%c0_198, %384, %c0_199, %c0_200] : memref<2x4x8x512xf32, #tpu.memory_space<vmem>>, vector<1x1x8x512xf32>
    %386 = vector.shape_cast %385 : vector<1x1x8x512xf32> to vector<8x512xf32>
    %c0_201 = arith.constant 0 : index
    %c0_202 = arith.constant 0 : index
    %387 = vector.load %arg6[%c0_201, %c0_202] : memref<128x512xf32, #tpu.memory_space<vmem>>, vector<128x512xf32>
    %cst_203 = arith.constant dense<0.000000e+00> : vector<8x512xf32>
    %388 = tpu.matmul %371, %387, %cst_203 {dimension_numbers = #tpu.dot_dimension_numbers<[1], [0], [0], [1], [0, 0, 1, 1], [], []>} : vector<8x128xf32>, vector<128x512xf32>, vector<8x512xf32> -> vector<8x512xf32>
    %389 = arith.addf %386, %388 : vector<8x512xf32>
    %390 = vector.extract_strided_slice %389 {offsets = [0, 0], sizes = [8, 128], strides = [1, 1]} : vector<8x512xf32> to vector<8x128xf32>
    %cst_204 = arith.constant 5.000000e-01 : f32
    %391 = vector.broadcast %cst_204 : f32 to vector<8x128xf32>
    %392 = arith.mulf %391, %390 : vector<8x128xf32>
    %393 = math.tanh %392 : vector<8x128xf32>
    %cst_205 = arith.constant 5.000000e-01 : f32
    %394 = vector.broadcast %cst_205 : f32 to vector<8x128xf32>
    %395 = arith.mulf %394, %393 : vector<8x128xf32>
    %cst_206 = arith.constant 5.000000e-01 : f32
    %396 = vector.broadcast %cst_206 : f32 to vector<8x128xf32>
    %397 = arith.addf %395, %396 : vector<8x128xf32>
    %398 = vector.extract_strided_slice %389 {offsets = [0, 128], sizes = [8, 128], strides = [1, 1]} : vector<8x512xf32> to vector<8x128xf32>
    %cst_207 = arith.constant 5.000000e-01 : f32
    %399 = vector.broadcast %cst_207 : f32 to vector<8x128xf32>
    %400 = arith.mulf %399, %398 : vector<8x128xf32>
    %401 = math.tanh %400 : vector<8x128xf32>
    %cst_208 = arith.constant 5.000000e-01 : f32
    %402 = vector.broadcast %cst_208 : f32 to vector<8x128xf32>
    %403 = arith.mulf %402, %401 : vector<8x128xf32>
    %cst_209 = arith.constant 5.000000e-01 : f32
    %404 = vector.broadcast %cst_209 : f32 to vector<8x128xf32>
    %405 = arith.addf %403, %404 : vector<8x128xf32>
    %406 = vector.extract_strided_slice %389 {offsets = [0, 256], sizes = [8, 128], strides = [1, 1]} : vector<8x512xf32> to vector<8x128xf32>
    %407 = math.tanh %406 : vector<8x128xf32>
    %408 = vector.extract_strided_slice %389 {offsets = [0, 384], sizes = [8, 128], strides = [1, 1]} : vector<8x512xf32> to vector<8x128xf32>
    %cst_210 = arith.constant 5.000000e-01 : f32
    %409 = vector.broadcast %cst_210 : f32 to vector<8x128xf32>
    %410 = arith.mulf %409, %408 : vector<8x128xf32>
    %411 = math.tanh %410 : vector<8x128xf32>
    %cst_211 = arith.constant 5.000000e-01 : f32
    %412 = vector.broadcast %cst_211 : f32 to vector<8x128xf32>
    %413 = arith.mulf %412, %411 : vector<8x128xf32>
    %cst_212 = arith.constant 5.000000e-01 : f32
    %414 = vector.broadcast %cst_212 : f32 to vector<8x128xf32>
    %415 = arith.addf %413, %414 : vector<8x128xf32>
    %416 = arith.mulf %405, %372 : vector<8x128xf32>
    %417 = arith.mulf %397, %407 : vector<8x128xf32>
    %418 = arith.addf %416, %417 : vector<8x128xf32>
    %419 = math.tanh %418 : vector<8x128xf32>
    %420 = arith.mulf %415, %419 : vector<8x128xf32>
    %c1_i32_213 = arith.constant 1 : i32
    %c0_214 = arith.constant 0 : index
    %421 = arith.index_cast %c1_i32_213 : i32 to index
    %c0_215 = arith.constant 0 : index
    %c0_216 = arith.constant 0 : index
    %422 = vector.load %arg11[%c0_214, %421, %c0_215, %c0_216] : memref<2x4x8x512xf32, #tpu.memory_space<vmem>>, vector<1x1x8x512xf32>
    %423 = vector.shape_cast %422 : vector<1x1x8x512xf32> to vector<8x512xf32>
    %c0_217 = arith.constant 0 : index
    %c0_218 = arith.constant 0 : index
    %424 = vector.load %arg6[%c0_217, %c0_218] : memref<128x512xf32, #tpu.memory_space<vmem>>, vector<128x512xf32>
    %cst_219 = arith.constant dense<0.000000e+00> : vector<8x512xf32>
    %425 = tpu.matmul %420, %424, %cst_219 {dimension_numbers = #tpu.dot_dimension_numbers<[1], [0], [0], [1], [0, 0, 1, 1], [], []>} : vector<8x128xf32>, vector<128x512xf32>, vector<8x512xf32> -> vector<8x512xf32>
    %426 = arith.addf %423, %425 : vector<8x512xf32>
    %427 = vector.extract_strided_slice %426 {offsets = [0, 0], sizes = [8, 128], strides = [1, 1]} : vector<8x512xf32> to vector<8x128xf32>
    %cst_220 = arith.constant 5.000000e-01 : f32
    %428 = vector.broadcast %cst_220 : f32 to vector<8x128xf32>
    %429 = arith.mulf %428, %427 : vector<8x128xf32>
    %430 = math.tanh %429 : vector<8x128xf32>
    %cst_221 = arith.constant 5.000000e-01 : f32
    %431 = vector.broadcast %cst_221 : f32 to vector<8x128xf32>
    %432 = arith.mulf %431, %430 : vector<8x128xf32>
    %cst_222 = arith.constant 5.000000e-01 : f32
    %433 = vector.broadcast %cst_222 : f32 to vector<8x128xf32>
    %434 = arith.addf %432, %433 : vector<8x128xf32>
    %435 = vector.extract_strided_slice %426 {offsets = [0, 128], sizes = [8, 128], strides = [1, 1]} : vector<8x512xf32> to vector<8x128xf32>
    %cst_223 = arith.constant 5.000000e-01 : f32
    %436 = vector.broadcast %cst_223 : f32 to vector<8x128xf32>
    %437 = arith.mulf %436, %435 : vector<8x128xf32>
    %438 = math.tanh %437 : vector<8x128xf32>
    %cst_224 = arith.constant 5.000000e-01 : f32
    %439 = vector.broadcast %cst_224 : f32 to vector<8x128xf32>
    %440 = arith.mulf %439, %438 : vector<8x128xf32>
    %cst_225 = arith.constant 5.000000e-01 : f32
    %441 = vector.broadcast %cst_225 : f32 to vector<8x128xf32>
    %442 = arith.addf %440, %441 : vector<8x128xf32>
    %443 = vector.extract_strided_slice %426 {offsets = [0, 256], sizes = [8, 128], strides = [1, 1]} : vector<8x512xf32> to vector<8x128xf32>
    %444 = math.tanh %443 : vector<8x128xf32>
    %445 = vector.extract_strided_slice %426 {offsets = [0, 384], sizes = [8, 128], strides = [1, 1]} : vector<8x512xf32> to vector<8x128xf32>
    %cst_226 = arith.constant 5.000000e-01 : f32
    %446 = vector.broadcast %cst_226 : f32 to vector<8x128xf32>
    %447 = arith.mulf %446, %445 : vector<8x128xf32>
    %448 = math.tanh %447 : vector<8x128xf32>
    %cst_227 = arith.constant 5.000000e-01 : f32
    %449 = vector.broadcast %cst_227 : f32 to vector<8x128xf32>
    %450 = arith.mulf %449, %448 : vector<8x128xf32>
    %cst_228 = arith.constant 5.000000e-01 : f32
    %451 = vector.broadcast %cst_228 : f32 to vector<8x128xf32>
    %452 = arith.addf %450, %451 : vector<8x128xf32>
    %453 = arith.mulf %442, %418 : vector<8x128xf32>
    %454 = arith.mulf %434, %444 : vector<8x128xf32>
    %455 = arith.addf %453, %454 : vector<8x128xf32>
    %456 = math.tanh %455 : vector<8x128xf32>
    %457 = arith.mulf %452, %456 : vector<8x128xf32>
    %c2_i32_229 = arith.constant 2 : i32
    %c0_230 = arith.constant 0 : index
    %458 = arith.index_cast %c2_i32_229 : i32 to index
    %c0_231 = arith.constant 0 : index
    %c0_232 = arith.constant 0 : index
    %459 = vector.load %arg11[%c0_230, %458, %c0_231, %c0_232] : memref<2x4x8x512xf32, #tpu.memory_space<vmem>>, vector<1x1x8x512xf32>
    %460 = vector.shape_cast %459 : vector<1x1x8x512xf32> to vector<8x512xf32>
    %c0_233 = arith.constant 0 : index
    %c0_234 = arith.constant 0 : index
    %461 = vector.load %arg6[%c0_233, %c0_234] : memref<128x512xf32, #tpu.memory_space<vmem>>, vector<128x512xf32>
    %cst_235 = arith.constant dense<0.000000e+00> : vector<8x512xf32>
    %462 = tpu.matmul %457, %461, %cst_235 {dimension_numbers = #tpu.dot_dimension_numbers<[1], [0], [0], [1], [0, 0, 1, 1], [], []>} : vector<8x128xf32>, vector<128x512xf32>, vector<8x512xf32> -> vector<8x512xf32>
    %463 = arith.addf %460, %462 : vector<8x512xf32>
    %464 = vector.extract_strided_slice %463 {offsets = [0, 0], sizes = [8, 128], strides = [1, 1]} : vector<8x512xf32> to vector<8x128xf32>
    %cst_236 = arith.constant 5.000000e-01 : f32
    %465 = vector.broadcast %cst_236 : f32 to vector<8x128xf32>
    %466 = arith.mulf %465, %464 : vector<8x128xf32>
    %467 = math.tanh %466 : vector<8x128xf32>
    %cst_237 = arith.constant 5.000000e-01 : f32
    %468 = vector.broadcast %cst_237 : f32 to vector<8x128xf32>
    %469 = arith.mulf %468, %467 : vector<8x128xf32>
    %cst_238 = arith.constant 5.000000e-01 : f32
    %470 = vector.broadcast %cst_238 : f32 to vector<8x128xf32>
    %471 = arith.addf %469, %470 : vector<8x128xf32>
    %472 = vector.extract_strided_slice %463 {offsets = [0, 128], sizes = [8, 128], strides = [1, 1]} : vector<8x512xf32> to vector<8x128xf32>
    %cst_239 = arith.constant 5.000000e-01 : f32
    %473 = vector.broadcast %cst_239 : f32 to vector<8x128xf32>
    %474 = arith.mulf %473, %472 : vector<8x128xf32>
    %475 = math.tanh %474 : vector<8x128xf32>
    %cst_240 = arith.constant 5.000000e-01 : f32
    %476 = vector.broadcast %cst_240 : f32 to vector<8x128xf32>
    %477 = arith.mulf %476, %475 : vector<8x128xf32>
    %cst_241 = arith.constant 5.000000e-01 : f32
    %478 = vector.broadcast %cst_241 : f32 to vector<8x128xf32>
    %479 = arith.addf %477, %478 : vector<8x128xf32>
    %480 = vector.extract_strided_slice %463 {offsets = [0, 256], sizes = [8, 128], strides = [1, 1]} : vector<8x512xf32> to vector<8x128xf32>
    %481 = math.tanh %480 : vector<8x128xf32>
    %482 = vector.extract_strided_slice %463 {offsets = [0, 384], sizes = [8, 128], strides = [1, 1]} : vector<8x512xf32> to vector<8x128xf32>
    %cst_242 = arith.constant 5.000000e-01 : f32
    %483 = vector.broadcast %cst_242 : f32 to vector<8x128xf32>
    %484 = arith.mulf %483, %482 : vector<8x128xf32>
    %485 = math.tanh %484 : vector<8x128xf32>
    %cst_243 = arith.constant 5.000000e-01 : f32
    %486 = vector.broadcast %cst_243 : f32 to vector<8x128xf32>
    %487 = arith.mulf %486, %485 : vector<8x128xf32>
    %cst_244 = arith.constant 5.000000e-01 : f32
    %488 = vector.broadcast %cst_244 : f32 to vector<8x128xf32>
    %489 = arith.addf %487, %488 : vector<8x128xf32>
    %490 = arith.mulf %479, %455 : vector<8x128xf32>
    %491 = arith.mulf %471, %481 : vector<8x128xf32>
    %492 = arith.addf %490, %491 : vector<8x128xf32>
    %493 = math.tanh %492 : vector<8x128xf32>
    %494 = arith.mulf %489, %493 : vector<8x128xf32>
    %c3_i32_245 = arith.constant 3 : i32
    %c0_246 = arith.constant 0 : index
    %495 = arith.index_cast %c3_i32_245 : i32 to index
    %c0_247 = arith.constant 0 : index
    %c0_248 = arith.constant 0 : index
    %496 = vector.load %arg11[%c0_246, %495, %c0_247, %c0_248] : memref<2x4x8x512xf32, #tpu.memory_space<vmem>>, vector<1x1x8x512xf32>
    %497 = vector.shape_cast %496 : vector<1x1x8x512xf32> to vector<8x512xf32>
    %c0_249 = arith.constant 0 : index
    %c0_250 = arith.constant 0 : index
    %498 = vector.load %arg6[%c0_249, %c0_250] : memref<128x512xf32, #tpu.memory_space<vmem>>, vector<128x512xf32>
    %cst_251 = arith.constant dense<0.000000e+00> : vector<8x512xf32>
    %499 = tpu.matmul %494, %498, %cst_251 {dimension_numbers = #tpu.dot_dimension_numbers<[1], [0], [0], [1], [0, 0, 1, 1], [], []>} : vector<8x128xf32>, vector<128x512xf32>, vector<8x512xf32> -> vector<8x512xf32>
    %500 = arith.addf %497, %499 : vector<8x512xf32>
    %501 = vector.extract_strided_slice %500 {offsets = [0, 0], sizes = [8, 128], strides = [1, 1]} : vector<8x512xf32> to vector<8x128xf32>
    %cst_252 = arith.constant 5.000000e-01 : f32
    %502 = vector.broadcast %cst_252 : f32 to vector<8x128xf32>
    %503 = arith.mulf %502, %501 : vector<8x128xf32>
    %504 = math.tanh %503 : vector<8x128xf32>
    %cst_253 = arith.constant 5.000000e-01 : f32
    %505 = vector.broadcast %cst_253 : f32 to vector<8x128xf32>
    %506 = arith.mulf %505, %504 : vector<8x128xf32>
    %cst_254 = arith.constant 5.000000e-01 : f32
    %507 = vector.broadcast %cst_254 : f32 to vector<8x128xf32>
    %508 = arith.addf %506, %507 : vector<8x128xf32>
    %509 = vector.extract_strided_slice %500 {offsets = [0, 128], sizes = [8, 128], strides = [1, 1]} : vector<8x512xf32> to vector<8x128xf32>
    %cst_255 = arith.constant 5.000000e-01 : f32
    %510 = vector.broadcast %cst_255 : f32 to vector<8x128xf32>
    %511 = arith.mulf %510, %509 : vector<8x128xf32>
    %512 = math.tanh %511 : vector<8x128xf32>
    %cst_256 = arith.constant 5.000000e-01 : f32
    %513 = vector.broadcast %cst_256 : f32 to vector<8x128xf32>
    %514 = arith.mulf %513, %512 : vector<8x128xf32>
    %cst_257 = arith.constant 5.000000e-01 : f32
    %515 = vector.broadcast %cst_257 : f32 to vector<8x128xf32>
    %516 = arith.addf %514, %515 : vector<8x128xf32>
    %517 = vector.extract_strided_slice %500 {offsets = [0, 256], sizes = [8, 128], strides = [1, 1]} : vector<8x512xf32> to vector<8x128xf32>
    %518 = math.tanh %517 : vector<8x128xf32>
    %519 = vector.extract_strided_slice %500 {offsets = [0, 384], sizes = [8, 128], strides = [1, 1]} : vector<8x512xf32> to vector<8x128xf32>
    %cst_258 = arith.constant 5.000000e-01 : f32
    %520 = vector.broadcast %cst_258 : f32 to vector<8x128xf32>
    %521 = arith.mulf %520, %519 : vector<8x128xf32>
    %522 = math.tanh %521 : vector<8x128xf32>
    %cst_259 = arith.constant 5.000000e-01 : f32
    %523 = vector.broadcast %cst_259 : f32 to vector<8x128xf32>
    %524 = arith.mulf %523, %522 : vector<8x128xf32>
    %cst_260 = arith.constant 5.000000e-01 : f32
    %525 = vector.broadcast %cst_260 : f32 to vector<8x128xf32>
    %526 = arith.addf %524, %525 : vector<8x128xf32>
    %527 = arith.mulf %516, %492 : vector<8x128xf32>
    %528 = arith.mulf %508, %518 : vector<8x128xf32>
    %529 = arith.addf %527, %528 : vector<8x128xf32>
    %530 = math.tanh %529 : vector<8x128xf32>
    %531 = arith.mulf %526, %530 : vector<8x128xf32>
    %c4_i32_261 = arith.constant 4 : i32
    %c0_i32_262 = arith.constant 0 : i32
    %c1_263 = arith.constant 1 : index
    %532 = arith.index_cast %c0_i32_262 : i32 to index
    %c0_264 = arith.constant 0 : index
    %c0_265 = arith.constant 0 : index
    %533 = vector.load %arg11[%c1_263, %532, %c0_264, %c0_265] : memref<2x4x8x512xf32, #tpu.memory_space<vmem>>, vector<1x1x8x512xf32>
    %534 = vector.shape_cast %533 : vector<1x1x8x512xf32> to vector<8x512xf32>
    %c0_266 = arith.constant 0 : index
    %c0_267 = arith.constant 0 : index
    %535 = vector.load %arg6[%c0_266, %c0_267] : memref<128x512xf32, #tpu.memory_space<vmem>>, vector<128x512xf32>
    %cst_268 = arith.constant dense<0.000000e+00> : vector<8x512xf32>
    %536 = tpu.matmul %531, %535, %cst_268 {dimension_numbers = #tpu.dot_dimension_numbers<[1], [0], [0], [1], [0, 0, 1, 1], [], []>} : vector<8x128xf32>, vector<128x512xf32>, vector<8x512xf32> -> vector<8x512xf32>
    %537 = arith.addf %534, %536 : vector<8x512xf32>
    %538 = vector.extract_strided_slice %537 {offsets = [0, 0], sizes = [8, 128], strides = [1, 1]} : vector<8x512xf32> to vector<8x128xf32>
    %cst_269 = arith.constant 5.000000e-01 : f32
    %539 = vector.broadcast %cst_269 : f32 to vector<8x128xf32>
    %540 = arith.mulf %539, %538 : vector<8x128xf32>
    %541 = math.tanh %540 : vector<8x128xf32>
    %cst_270 = arith.constant 5.000000e-01 : f32
    %542 = vector.broadcast %cst_270 : f32 to vector<8x128xf32>
    %543 = arith.mulf %542, %541 : vector<8x128xf32>
    %cst_271 = arith.constant 5.000000e-01 : f32
    %544 = vector.broadcast %cst_271 : f32 to vector<8x128xf32>
    %545 = arith.addf %543, %544 : vector<8x128xf32>
    %546 = vector.extract_strided_slice %537 {offsets = [0, 128], sizes = [8, 128], strides = [1, 1]} : vector<8x512xf32> to vector<8x128xf32>
    %cst_272 = arith.constant 5.000000e-01 : f32
    %547 = vector.broadcast %cst_272 : f32 to vector<8x128xf32>
    %548 = arith.mulf %547, %546 : vector<8x128xf32>
    %549 = math.tanh %548 : vector<8x128xf32>
    %cst_273 = arith.constant 5.000000e-01 : f32
    %550 = vector.broadcast %cst_273 : f32 to vector<8x128xf32>
    %551 = arith.mulf %550, %549 : vector<8x128xf32>
    %cst_274 = arith.constant 5.000000e-01 : f32
    %552 = vector.broadcast %cst_274 : f32 to vector<8x128xf32>
    %553 = arith.addf %551, %552 : vector<8x128xf32>
    %554 = vector.extract_strided_slice %537 {offsets = [0, 256], sizes = [8, 128], strides = [1, 1]} : vector<8x512xf32> to vector<8x128xf32>
    %555 = math.tanh %554 : vector<8x128xf32>
    %556 = vector.extract_strided_slice %537 {offsets = [0, 384], sizes = [8, 128], strides = [1, 1]} : vector<8x512xf32> to vector<8x128xf32>
    %cst_275 = arith.constant 5.000000e-01 : f32
    %557 = vector.broadcast %cst_275 : f32 to vector<8x128xf32>
    %558 = arith.mulf %557, %556 : vector<8x128xf32>
    %559 = math.tanh %558 : vector<8x128xf32>
    %cst_276 = arith.constant 5.000000e-01 : f32
    %560 = vector.broadcast %cst_276 : f32 to vector<8x128xf32>
    %561 = arith.mulf %560, %559 : vector<8x128xf32>
    %cst_277 = arith.constant 5.000000e-01 : f32
    %562 = vector.broadcast %cst_277 : f32 to vector<8x128xf32>
    %563 = arith.addf %561, %562 : vector<8x128xf32>
    %564 = arith.mulf %553, %529 : vector<8x128xf32>
    %565 = arith.mulf %545, %555 : vector<8x128xf32>
    %566 = arith.addf %564, %565 : vector<8x128xf32>
    %567 = math.tanh %566 : vector<8x128xf32>
    %568 = arith.mulf %563, %567 : vector<8x128xf32>
    %c1_i32_278 = arith.constant 1 : i32
    %c1_279 = arith.constant 1 : index
    %569 = arith.index_cast %c1_i32_278 : i32 to index
    %c0_280 = arith.constant 0 : index
    %c0_281 = arith.constant 0 : index
    %570 = vector.load %arg11[%c1_279, %569, %c0_280, %c0_281] : memref<2x4x8x512xf32, #tpu.memory_space<vmem>>, vector<1x1x8x512xf32>
    %571 = vector.shape_cast %570 : vector<1x1x8x512xf32> to vector<8x512xf32>
    %c0_282 = arith.constant 0 : index
    %c0_283 = arith.constant 0 : index
    %572 = vector.load %arg6[%c0_282, %c0_283] : memref<128x512xf32, #tpu.memory_space<vmem>>, vector<128x512xf32>
    %cst_284 = arith.constant dense<0.000000e+00> : vector<8x512xf32>
    %573 = tpu.matmul %568, %572, %cst_284 {dimension_numbers = #tpu.dot_dimension_numbers<[1], [0], [0], [1], [0, 0, 1, 1], [], []>} : vector<8x128xf32>, vector<128x512xf32>, vector<8x512xf32> -> vector<8x512xf32>
    %574 = arith.addf %571, %573 : vector<8x512xf32>
    %575 = vector.extract_strided_slice %574 {offsets = [0, 0], sizes = [8, 128], strides = [1, 1]} : vector<8x512xf32> to vector<8x128xf32>
    %cst_285 = arith.constant 5.000000e-01 : f32
    %576 = vector.broadcast %cst_285 : f32 to vector<8x128xf32>
    %577 = arith.mulf %576, %575 : vector<8x128xf32>
    %578 = math.tanh %577 : vector<8x128xf32>
    %cst_286 = arith.constant 5.000000e-01 : f32
    %579 = vector.broadcast %cst_286 : f32 to vector<8x128xf32>
    %580 = arith.mulf %579, %578 : vector<8x128xf32>
    %cst_287 = arith.constant 5.000000e-01 : f32
    %581 = vector.broadcast %cst_287 : f32 to vector<8x128xf32>
    %582 = arith.addf %580, %581 : vector<8x128xf32>
    %583 = vector.extract_strided_slice %574 {offsets = [0, 128], sizes = [8, 128], strides = [1, 1]} : vector<8x512xf32> to vector<8x128xf32>
    %cst_288 = arith.constant 5.000000e-01 : f32
    %584 = vector.broadcast %cst_288 : f32 to vector<8x128xf32>
    %585 = arith.mulf %584, %583 : vector<8x128xf32>
    %586 = math.tanh %585 : vector<8x128xf32>
    %cst_289 = arith.constant 5.000000e-01 : f32
    %587 = vector.broadcast %cst_289 : f32 to vector<8x128xf32>
    %588 = arith.mulf %587, %586 : vector<8x128xf32>
    %cst_290 = arith.constant 5.000000e-01 : f32
    %589 = vector.broadcast %cst_290 : f32 to vector<8x128xf32>
    %590 = arith.addf %588, %589 : vector<8x128xf32>
    %591 = vector.extract_strided_slice %574 {offsets = [0, 256], sizes = [8, 128], strides = [1, 1]} : vector<8x512xf32> to vector<8x128xf32>
    %592 = math.tanh %591 : vector<8x128xf32>
    %593 = vector.extract_strided_slice %574 {offsets = [0, 384], sizes = [8, 128], strides = [1, 1]} : vector<8x512xf32> to vector<8x128xf32>
    %cst_291 = arith.constant 5.000000e-01 : f32
    %594 = vector.broadcast %cst_291 : f32 to vector<8x128xf32>
    %595 = arith.mulf %594, %593 : vector<8x128xf32>
    %596 = math.tanh %595 : vector<8x128xf32>
    %cst_292 = arith.constant 5.000000e-01 : f32
    %597 = vector.broadcast %cst_292 : f32 to vector<8x128xf32>
    %598 = arith.mulf %597, %596 : vector<8x128xf32>
    %cst_293 = arith.constant 5.000000e-01 : f32
    %599 = vector.broadcast %cst_293 : f32 to vector<8x128xf32>
    %600 = arith.addf %598, %599 : vector<8x128xf32>
    %601 = arith.mulf %590, %566 : vector<8x128xf32>
    %602 = arith.mulf %582, %592 : vector<8x128xf32>
    %603 = arith.addf %601, %602 : vector<8x128xf32>
    %604 = math.tanh %603 : vector<8x128xf32>
    %605 = arith.mulf %600, %604 : vector<8x128xf32>
    %c2_i32_294 = arith.constant 2 : i32
    %c1_295 = arith.constant 1 : index
    %606 = arith.index_cast %c2_i32_294 : i32 to index
    %c0_296 = arith.constant 0 : index
    %c0_297 = arith.constant 0 : index
    %607 = vector.load %arg11[%c1_295, %606, %c0_296, %c0_297] : memref<2x4x8x512xf32, #tpu.memory_space<vmem>>, vector<1x1x8x512xf32>
    %608 = vector.shape_cast %607 : vector<1x1x8x512xf32> to vector<8x512xf32>
    %c0_298 = arith.constant 0 : index
    %c0_299 = arith.constant 0 : index
    %609 = vector.load %arg6[%c0_298, %c0_299] : memref<128x512xf32, #tpu.memory_space<vmem>>, vector<128x512xf32>
    %cst_300 = arith.constant dense<0.000000e+00> : vector<8x512xf32>
    %610 = tpu.matmul %605, %609, %cst_300 {dimension_numbers = #tpu.dot_dimension_numbers<[1], [0], [0], [1], [0, 0, 1, 1], [], []>} : vector<8x128xf32>, vector<128x512xf32>, vector<8x512xf32> -> vector<8x512xf32>
    %611 = arith.addf %608, %610 : vector<8x512xf32>
    %612 = vector.extract_strided_slice %611 {offsets = [0, 0], sizes = [8, 128], strides = [1, 1]} : vector<8x512xf32> to vector<8x128xf32>
    %cst_301 = arith.constant 5.000000e-01 : f32
    %613 = vector.broadcast %cst_301 : f32 to vector<8x128xf32>
    %614 = arith.mulf %613, %612 : vector<8x128xf32>
    %615 = math.tanh %614 : vector<8x128xf32>
    %cst_302 = arith.constant 5.000000e-01 : f32
    %616 = vector.broadcast %cst_302 : f32 to vector<8x128xf32>
    %617 = arith.mulf %616, %615 : vector<8x128xf32>
    %cst_303 = arith.constant 5.000000e-01 : f32
    %618 = vector.broadcast %cst_303 : f32 to vector<8x128xf32>
    %619 = arith.addf %617, %618 : vector<8x128xf32>
    %620 = vector.extract_strided_slice %611 {offsets = [0, 128], sizes = [8, 128], strides = [1, 1]} : vector<8x512xf32> to vector<8x128xf32>
    %cst_304 = arith.constant 5.000000e-01 : f32
    %621 = vector.broadcast %cst_304 : f32 to vector<8x128xf32>
    %622 = arith.mulf %621, %620 : vector<8x128xf32>
    %623 = math.tanh %622 : vector<8x128xf32>
    %cst_305 = arith.constant 5.000000e-01 : f32
    %624 = vector.broadcast %cst_305 : f32 to vector<8x128xf32>
    %625 = arith.mulf %624, %623 : vector<8x128xf32>
    %cst_306 = arith.constant 5.000000e-01 : f32
    %626 = vector.broadcast %cst_306 : f32 to vector<8x128xf32>
    %627 = arith.addf %625, %626 : vector<8x128xf32>
    %628 = vector.extract_strided_slice %611 {offsets = [0, 256], sizes = [8, 128], strides = [1, 1]} : vector<8x512xf32> to vector<8x128xf32>
    %629 = math.tanh %628 : vector<8x128xf32>
    %630 = vector.extract_strided_slice %611 {offsets = [0, 384], sizes = [8, 128], strides = [1, 1]} : vector<8x512xf32> to vector<8x128xf32>
    %cst_307 = arith.constant 5.000000e-01 : f32
    %631 = vector.broadcast %cst_307 : f32 to vector<8x128xf32>
    %632 = arith.mulf %631, %630 : vector<8x128xf32>
    %633 = math.tanh %632 : vector<8x128xf32>
    %cst_308 = arith.constant 5.000000e-01 : f32
    %634 = vector.broadcast %cst_308 : f32 to vector<8x128xf32>
    %635 = arith.mulf %634, %633 : vector<8x128xf32>
    %cst_309 = arith.constant 5.000000e-01 : f32
    %636 = vector.broadcast %cst_309 : f32 to vector<8x128xf32>
    %637 = arith.addf %635, %636 : vector<8x128xf32>
    %638 = arith.mulf %627, %603 : vector<8x128xf32>
    %639 = arith.mulf %619, %629 : vector<8x128xf32>
    %640 = arith.addf %638, %639 : vector<8x128xf32>
    %641 = math.tanh %640 : vector<8x128xf32>
    %642 = arith.mulf %637, %641 : vector<8x128xf32>
    %c3_i32_310 = arith.constant 3 : i32
    %c1_311 = arith.constant 1 : index
    %643 = arith.index_cast %c3_i32_310 : i32 to index
    %c0_312 = arith.constant 0 : index
    %c0_313 = arith.constant 0 : index
    %644 = vector.load %arg11[%c1_311, %643, %c0_312, %c0_313] : memref<2x4x8x512xf32, #tpu.memory_space<vmem>>, vector<1x1x8x512xf32>
    %645 = vector.shape_cast %644 : vector<1x1x8x512xf32> to vector<8x512xf32>
    %c0_314 = arith.constant 0 : index
    %c0_315 = arith.constant 0 : index
    %646 = vector.load %arg6[%c0_314, %c0_315] : memref<128x512xf32, #tpu.memory_space<vmem>>, vector<128x512xf32>
    %cst_316 = arith.constant dense<0.000000e+00> : vector<8x512xf32>
    %647 = tpu.matmul %642, %646, %cst_316 {dimension_numbers = #tpu.dot_dimension_numbers<[1], [0], [0], [1], [0, 0, 1, 1], [], []>} : vector<8x128xf32>, vector<128x512xf32>, vector<8x512xf32> -> vector<8x512xf32>
    %648 = arith.addf %645, %647 : vector<8x512xf32>
    %649 = vector.extract_strided_slice %648 {offsets = [0, 0], sizes = [8, 128], strides = [1, 1]} : vector<8x512xf32> to vector<8x128xf32>
    %cst_317 = arith.constant 5.000000e-01 : f32
    %650 = vector.broadcast %cst_317 : f32 to vector<8x128xf32>
    %651 = arith.mulf %650, %649 : vector<8x128xf32>
    %652 = math.tanh %651 : vector<8x128xf32>
    %cst_318 = arith.constant 5.000000e-01 : f32
    %653 = vector.broadcast %cst_318 : f32 to vector<8x128xf32>
    %654 = arith.mulf %653, %652 : vector<8x128xf32>
    %cst_319 = arith.constant 5.000000e-01 : f32
    %655 = vector.broadcast %cst_319 : f32 to vector<8x128xf32>
    %656 = arith.addf %654, %655 : vector<8x128xf32>
    %657 = vector.extract_strided_slice %648 {offsets = [0, 128], sizes = [8, 128], strides = [1, 1]} : vector<8x512xf32> to vector<8x128xf32>
    %cst_320 = arith.constant 5.000000e-01 : f32
    %658 = vector.broadcast %cst_320 : f32 to vector<8x128xf32>
    %659 = arith.mulf %658, %657 : vector<8x128xf32>
    %660 = math.tanh %659 : vector<8x128xf32>
    %cst_321 = arith.constant 5.000000e-01 : f32
    %661 = vector.broadcast %cst_321 : f32 to vector<8x128xf32>
    %662 = arith.mulf %661, %660 : vector<8x128xf32>
    %cst_322 = arith.constant 5.000000e-01 : f32
    %663 = vector.broadcast %cst_322 : f32 to vector<8x128xf32>
    %664 = arith.addf %662, %663 : vector<8x128xf32>
    %665 = vector.extract_strided_slice %648 {offsets = [0, 256], sizes = [8, 128], strides = [1, 1]} : vector<8x512xf32> to vector<8x128xf32>
    %666 = math.tanh %665 : vector<8x128xf32>
    %667 = vector.extract_strided_slice %648 {offsets = [0, 384], sizes = [8, 128], strides = [1, 1]} : vector<8x512xf32> to vector<8x128xf32>
    %cst_323 = arith.constant 5.000000e-01 : f32
    %668 = vector.broadcast %cst_323 : f32 to vector<8x128xf32>
    %669 = arith.mulf %668, %667 : vector<8x128xf32>
    %670 = math.tanh %669 : vector<8x128xf32>
    %cst_324 = arith.constant 5.000000e-01 : f32
    %671 = vector.broadcast %cst_324 : f32 to vector<8x128xf32>
    %672 = arith.mulf %671, %670 : vector<8x128xf32>
    %cst_325 = arith.constant 5.000000e-01 : f32
    %673 = vector.broadcast %cst_325 : f32 to vector<8x128xf32>
    %674 = arith.addf %672, %673 : vector<8x128xf32>
    %675 = arith.mulf %664, %640 : vector<8x128xf32>
    %676 = arith.mulf %656, %666 : vector<8x128xf32>
    %677 = arith.addf %675, %676 : vector<8x128xf32>
    %678 = math.tanh %677 : vector<8x128xf32>
    %679 = arith.mulf %674, %678 : vector<8x128xf32>
    %c4_i32_326 = arith.constant 4 : i32
    %c0_327 = arith.constant 0 : index
    %c0_328 = arith.constant 0 : index
    %680 = vector.load %arg8[%c0_327, %c0_328] : memref<128x128xf32, #tpu.memory_space<vmem>>, vector<128x128xf32>
    %cst_329 = arith.constant dense<0.000000e+00> : vector<8x128xf32>
    %681 = tpu.matmul %679, %680, %cst_329 {dimension_numbers = #tpu.dot_dimension_numbers<[1], [0], [0], [1], [0, 0, 1, 1], [], []>} : vector<8x128xf32>, vector<128x128xf32>, vector<8x128xf32> -> vector<8x128xf32>
    %c0_330 = arith.constant 0 : index
    %c0_331 = arith.constant 0 : index
    %682 = vector.load %arg9[%c0_330, %c0_331] : memref<1x128xf32, #tpu.memory_space<vmem>>, vector<1x128xf32>
    %683 = vector.broadcast %682 : vector<1x128xf32> to vector<8x128xf32>
    %684 = arith.addf %681, %683 : vector<8x128xf32>
    %c0_332 = arith.constant 0 : index
    %c0_333 = arith.constant 0 : index
    %685 = vector.load %arg10[%c0_332, %c0_333] : memref<8x128xf32, #tpu.memory_space<vmem>>, vector<8x128xf32>
    tpu.vector_store %arg10[%c0_332, %c0_333], %684 {strides = array<i32>} : memref<8x128xf32, #tpu.memory_space<vmem>>, vector<8x128xf32>,
    return
  }
  func.func @transform_0(%arg0: i32) -> (i32, i32, i32) {
    %c0_i32 = arith.constant 0 : i32
    %c0_i32_0 = arith.constant 0 : i32
    %c0_i32_1 = arith.constant 0 : i32
    return %c0_i32, %arg0, %c0_i32_0 : i32, i32, i32
  }
  func.func @transform_1(%arg0: i32) -> (i32, i32) {
    %c0_i32 = arith.constant 0 : i32
    %c0_i32_0 = arith.constant 0 : i32
    %c0_i32_1 = arith.constant 0 : i32
    return %c0_i32, %c0_i32_0 : i32, i32
  }
  func.func @transform_2(%arg0: i32) -> (i32, i32) {
    %c0_i32 = arith.constant 0 : i32
    %c0_i32_0 = arith.constant 0 : i32
    %c0_i32_1 = arith.constant 0 : i32
    return %c0_i32, %c0_i32_0 : i32, i32
  }
  func.func @transform_3(%arg0: i32) -> (i32, i32) {
    %c0_i32 = arith.constant 0 : i32
    %c0_i32_0 = arith.constant 0 : i32
    %c0_i32_1 = arith.constant 0 : i32
    return %c0_i32, %c0_i32_0 : i32, i32
  }
  func.func @transform_4(%arg0: i32) -> (i32, i32) {
    %c0_i32 = arith.constant 0 : i32
    %c0_i32_0 = arith.constant 0 : i32
    %c0_i32_1 = arith.constant 0 : i32
    return %c0_i32, %c0_i32_0 : i32, i32
  }
  func.func @transform_5(%arg0: i32) -> (i32, i32) {
    %c0_i32 = arith.constant 0 : i32
    %c0_i32_0 = arith.constant 0 : i32
    %c0_i32_1 = arith.constant 0 : i32
    return %c0_i32, %c0_i32_0 : i32, i32
  }
  func.func @transform_6(%arg0: i32) -> (i32, i32) {
    %c0_i32 = arith.constant 0 : i32
    %c0_i32_0 = arith.constant 0 : i32
    %c0_i32_1 = arith.constant 0 : i32
    return %c0_i32, %c0_i32_0 : i32, i32
  }
  func.func @transform_7(%arg0: i32) -> (i32, i32) {
    %c0_i32 = arith.constant 0 : i32
    %c0_i32_0 = arith.constant 0 : i32
    %c0_i32_1 = arith.constant 0 : i32
    return %c0_i32, %c0_i32_0 : i32, i32
  }
  func.func @transform_8(%arg0: i32) -> (i32, i32) {
    %c0_i32 = arith.constant 0 : i32
    %c0_i32_0 = arith.constant 0 : i32
    %c0_i32_1 = arith.constant 0 : i32
    return %c0_i32, %c0_i32_0 : i32, i32
  }
  func.func @transform_9(%arg0: i32) -> (i32, i32) {
    %c0_i32 = arith.constant 0 : i32
    %c0_i32_0 = arith.constant 0 : i32
    return %arg0, %c0_i32 : i32, i32
  }
}

</mosaic_0001>

<bundles_post_ra>
// kernel: rnn_forward.1
= control target key start
LH: loop header
LB: loop body
LE: loop exit
PB: predicated region body
PF: predicated region fallthrough
CT: control target
= control target key end

     0   :  { %14 = vsyncpa [#allocation6], 0  ;;  %s8316_s0 = inlined_call_operand.vmem [shape: f32[8,16,128], index: 0, kind: input, shape index: {}]   ;;  %s8317_s1 = inlined_call_operand.hbm [shape: f32[128,512], index: 1, kind: input, shape index: {}]   ;;  %s8318_s2 = inlined_call_operand.hbm [shape: f32[128,512], index: 2, kind: input, shape index: {}]   ;;  %s8319_s3 = inlined_call_operand.vmem [shape: f32[1,512], index: 3, kind: input, shape index: {}]   ;;  %s8320_s4 = inlined_call_operand.hbm [shape: f32[128,512], index: 4, kind: input, shape index: {}]   ;;  %s8321_s5 = inlined_call_operand.hbm [shape: f32[128,512], index: 5, kind: input, shape index: {}]   ;;  %s8322_s6 = inlined_call_operand.vmem [shape: f32[1,512], index: 6, kind: input, shape index: {}]   ;;  %s8323_s7 = inlined_call_operand.vmem [shape: f32[128,128], index: 7, kind: input, shape index: {}]   ;;  %s8324_s8 = inlined_call_operand.vmem [shape: f32[1,128], index: 8, kind: input, shape index: {}]   ;;  %s8325_s9 = inlined_call_operand.vmem [shape: f32[16,128], index: 9, kind: output, shape index: {}]  }
   0x1   :  { %15 = vsyncpa [#allocation8], 0 }
   0x2   :  { %16 = vsyncpa [#allocation11], 0  ;;  %s5637_s30 = smov 0   ;;  %s5639_s10 = smov 0  }
   0x3   :  { %s5641_s11 = smov 0  }
   0x4 LB: > { %s5653_s12 = sadd.s32 4294967295, %s5577_s11   ;;  %s5656_s13 = sadd.s32 1, %s5577_s11   ;;  %s5577_s11 = sphi %s5641_s11, %s9006_s11   ;;  %s5573_s10 = sphi %s5639_s10, %s9005_s10   ;;  %s5569_s30 = sphi %s5637_s30, %s9004_s30  }
   0x5   : > { %s26_s14 = ssub.s32 %s5577_s11, %s5656_s13  ;;  %s29_s15 = sadd.s32 1, %s5573_s10 }
   0x6   : > { %p27_p0 = scmp.eq.s32.totalorder %s26_s14, 0  ;;  %p36_p1 = scmp.ne.s32.totalorder %s5573_s10, %s5569_s30 }
   0x7   : > { %p37_p2 = scmp.eq.s32.totalorder %s5577_s11, 0  ;;  %p5072_p3 = scmp.ge.s32.totalorder %s5577_s11, 1 }
   0x8   : > { %s5666_s16 = scalar_select %p27_p0, %s5573_s10, %s29_s15  }
   0x9   : > { %p5668_p4 = por %p37_p2, %p36_p1  ;;  %p247_p5 = scmp.lt.s32.totalorder %s5577_s11, 3 }
   0xa   : > { %p5175_p6 = scmp.eq.s32.totalorder %s5653_s12, 0  ;;  %s5579_s19 = smov [#allocation7]  }
   0xb   : > { %p5674_p7 = pnand %p5072_p3, %p247_p5  ;;  %s272_s20 = sshll.u32 %s5579_s19, 4  ;;  %s273_s20 = int_to_ptr.vmem [resolvable:$true] %s272_s20 }
   0xc   : > { %s5580_s22 = smov [#allocation5]   ;;  %s5581_s24 = smov [#allocation9]  }
   0xd   : > { %p5162_p8 = pneg %p5674_p7  ;;  %s259_s23 = sshll.u32 %s5580_s22, 4  ;;  %s260_s23 = int_to_ptr.vmem [resolvable:$true] %s259_s23 }
   0xe   : > { %s288_s25 = sshll.u32 %s5581_s24, 4  ;;  %s5450_s26 = scalar_lea.vmem %s273_s20, 8192  ;;  %s289_s25 = int_to_ptr.vmem [resolvable:$true] %s288_s25 }
   0xf   : > { %p5682_p9 = pnand %p5175_p6, %p5162_p8  ;;  %p5451_p11 = scmp.ne.s32.totalorder %s273_s20, %s5450_s26 }
  0x10   : > { %p5458_p0 = scmp.lt.s32.totalorder %s273_s20, %s273_s20  ;;  %p5459_p1 = scmp.lt.s32.totalorder %s5450_s26, %s5450_s26 }
  0x11   : > { %p5441_p10 = pneg %p5682_p9 }
  0x12   : > { %p5460_p2 = por %p5459_p1, %p5458_p0 }
  0x13   : > { %p5453_p12 = pnand %p5451_p11, %p5441_p10 }
  0x15   : > { %p5454_p13 = pneg %p5453_p12 }
  0x17   : > { %p5461_p3 = pnand %p5460_p2, %p5454_p13 }
  0x19   : > { %5464 = shalt.err (!%p5461_p3)
}
  0x1a   : > { %s5582_s27 = smov 512   ;;  %s5583_s28 = smov 32  }
  0x1b   : > { %5168 = dma.hbm_to_vmem [thread:$0]  (!%p5682_p9), %s8318_s2, 8192, %s273_s20, [#allocation8], %s5582_s27, %s5582_s27, %s5583_s28  }
  0x1c   : > { %s5476_s15 = scalar_lea.vmem %s260_s23, 8192  ;;  %p5484_p12 = scmp.lt.s32.totalorder %s260_s23, %s260_s23 }
  0x1d   : > { %p5477_p5 = scmp.ne.s32.totalorder %s260_s23, %s5476_s15  ;;  %p5485_p13 = scmp.lt.s32.totalorder %s5476_s15, %s5476_s15 }
  0x1f   : > { %p5479_p8 = pnand %p5477_p5, %p5441_p10  ;;  %p5486_p0 = por %p5485_p13, %p5484_p12 }
  0x21   : > { %p5480_p11 = pneg %p5479_p8 }
  0x23   : > { %p5487_p1 = pnand %p5486_p0, %p5480_p11 }
  0x25   : > { %5490 = shalt.err (!%p5487_p1)
}
  0x26   : > { %5165 = dma.hbm_to_vmem [thread:$0]  (!%p5682_p9), %s8317_s1, 8192, %s260_s23, [#allocation6], %s5582_s27, %s5582_s27, %s5583_s28  }
  0x27   : > { %s5502_s20 = scalar_lea.vmem %s289_s25, 8192  ;;  %p5510_p8 = scmp.lt.s32.totalorder %s289_s25, %s289_s25 }
  0x28   : > { %p5503_p2 = scmp.ne.s32.totalorder %s289_s25, %s5502_s20  ;;  %p5511_p11 = scmp.lt.s32.totalorder %s5502_s20, %s5502_s20 }
  0x2a   : > { %p5505_p3 = pnand %p5503_p2, %p5441_p10  ;;  %p5512_p12 = por %p5511_p11, %p5510_p8 }
  0x2c   : > { %p5506_p5 = pneg %p5505_p3 }
  0x2e   : > { %p5513_p13 = pnand %p5512_p12, %p5506_p5 }
  0x30   : > { %5516 = shalt.err (!%p5513_p13)
}
  0x31   : > { %5171 = dma.hbm_to_vmem [thread:$0]  (!%p5682_p9), %s8320_s4, 8192, %s289_s25, [#allocation8], %s5582_s27, %s5582_s27, %s5583_s28  }
  0x32   : > { %s5584_s23 = smov [#allocation10]  }
  0x33   : > { %s301_s29 = sshll.u32 %s5584_s23, 4  ;;  %s302_s29 = int_to_ptr.vmem [resolvable:$true] %s301_s29 }
  0x34   : > { %s5528_s14 = scalar_lea.vmem %s302_s29, 8192  ;;  %p5536_p3 = scmp.lt.s32.totalorder %s302_s29, %s302_s29 }
  0x35   : > { %p5529_p0 = scmp.ne.s32.totalorder %s302_s29, %s5528_s14  ;;  %p5537_p5 = scmp.lt.s32.totalorder %s5528_s14, %s5528_s14 }
  0x37   : > { %p5531_p1 = pnand %p5529_p0, %p5441_p10  ;;  %p5538_p8 = por %p5537_p5, %p5536_p3 }
  0x39   : > { %p5532_p2 = pneg %p5531_p1 }
  0x3b   : > { %p5539_p11 = pnand %p5538_p8, %p5532_p2 }
  0x3d   : > { %5542 = shalt.err (!%p5539_p11)
}
  0x3e   : > { %5174 = dma.hbm_to_vmem [thread:$0]  (!%p5682_p9), %s8321_s5, 8192, %s302_s29, [#allocation11], %s5582_s27, %s5582_s27, %s5583_s28  }
  0x3f   : > { %p5077_p12 = scmp.ge.s32.totalorder %s5577_s11, 2 }
  0x41   : > { %320 = sbr.rel (%p5077_p12) target bundleno = 78 (0x4e), region = 48 }
  0x46   : > { %323 = sbr.rel (!%p5668_p4) target bundleno = 78 (0x4e), region = 52  ;;  %s325_s19 = sand.u32 (%p5668_p4), 1, %s5573_s10  }
  0x47   : > { %s5079_s22 = sshll.u32 (%p5668_p4), %s5577_s11, 3  ;;  %s5078_s20 = sshll.u32 (%p5668_p4), %s325_s19, 6 }
  0x48   : > { %s329_s26 = scalar_lea.vmem (%p5668_p4), %s8316_s0, %s5079_s22  ;;  %s327_s23 = scalar_lea.vmem (%p5668_p4), [#allocation4], %s5078_s20 }
  0x49   : > { %v372_v0 = vld [vmem:[%s329_s26] sm:$0xff] (%p5668_p4)  ;;  %v374_v1 = vld [vmem:[%s329_s26 + $0x10] sm:$0xff] (%p5668_p4) }
  0x4a   : > { %v376_v2 = vld [vmem:[%s329_s26 + $0x20] sm:$0xff] (%p5668_p4)  ;;  %373 = vst [vmem:[%s327_s23] sm:$0xff] (%p5668_p4), %v372_v0  ;;  %375 = vst [vmem:[%s327_s23 + $0x8] sm:$0xff] (%p5668_p4), %v374_v1  ;;  %v378_v3 = vld [vmem:[%s329_s26 + $0x30] sm:$0xff] (%p5668_p4) }
  0x4b   : > { %377 = vst [vmem:[%s327_s23 + $0x10] sm:$0xff] %v376_v2  ;;  %v380_v4 = vld [vmem:[%s329_s26 + $0x40] sm:$0xff]  ;;  %v382_v5 = vld [vmem:[%s329_s26 + $0x50] sm:$0xff]  ;;  %379 = vst [vmem:[%s327_s23 + $0x18] sm:$0xff] %v378_v3 }
  0x4c   : > { %381 = vst [vmem:[%s327_s23 + $0x20] sm:$0xff] %v380_v4  ;;  %383 = vst [vmem:[%s327_s23 + $0x28] sm:$0xff] %v382_v5  ;;  %v384_v6 = vld [vmem:[%s329_s26 + $0x60] sm:$0xff]  ;;  %v386_v7 = vld [vmem:[%s329_s26 + $0x70] sm:$0xff] }
  0x4d   : > { %385 = vst [vmem:[%s327_s23 + $0x30] sm:$0xff] %v384_v6  ;;  %387 = vst [vmem:[%s327_s23 + $0x38] sm:$0xff] %v386_v7 }
  0x4e PF: > { %396 = sbr.rel (%p5674_p7) target bundleno = 4197 (0x1065), region = 90 }
  0x53   : > { %s399_s11 = sand.u32 1, %s5569_s30  }
  0x54   : > { %s5081_s17 = sshll.u32 %s399_s11, 6 }
  0x55   : > { %s5743_s27 = scalar_lea.vmem [#allocation4], %s5081_s17 }
  0x56   : > { %5556 = dma.done.wait (%p5175_p6), [#allocation6], 8192  }
  0x57   : > { %5558 = vsyncadd (%p5175_p6), [#allocation6], 4294959104 }
  0x58   : > { %5560 = dma.done.wait (%p5175_p6), [#allocation8], 16384  }
  0x59   : > { %5562 = vsyncadd (%p5175_p6), [#allocation8], 4294950912 }
  0x5a   : > { %5564 = dma.done.wait (%p5175_p6), [#allocation11], 8192  }
  0x5b   : > { %5566 = vsyncadd (%p5175_p6), [#allocation11], 4294959104  ;;  %v8326_v8 = vmov 0.0   ;;  %v5759_v9 = vld [vmem:[#allocation5 + $0x1e8] sm:$0xff]  ;;  %v5761_v10 = vld [vmem:[#allocation5 + $0x1f8] sm:$0xff]  ;;  %vm5586_vm0 = vmmov 0  }
  0x5c   : > { %607 = vmatprep.mubr.f32.mxu0 %v8326_v8  ;;  %696 = vmatprep.mubr.f32.mxu1 %v8326_v8  ;;  %v5763_v11 = vld [vmem:[#allocation5 + $0x1e0] sm:$0xff]  ;;  %v5767_v12 = vld [vmem:[#allocation5 + $0x1f0] sm:$0xff]  ;;  %v5769_v13 = vld [vmem:[#allocation5 + $0x1c8] sm:$0xff]  ;;  %p449_p4 = scmp.lt.s32.totalorder %s5653_s12, 1 }
  0x5d   : > { %543 = vmatprep.subr.mxu0 %v5759_v9  ;;  %632 = vmatprep.subr.mxu1 %v5761_v10  ;;  %v5771_v14 = vld [vmem:[#allocation5 + $0x1d8] sm:$0xff]  ;;  %v5775_v15 = vld [vmem:[#allocation5 + $0x1c0] sm:$0xff]  ;;  %v5777_v16 = vld [vmem:[#allocation5 + $0x1d0] sm:$0xff] }
  0x5e   : > { %544 = vmatpush1.msra.mxu0 %v5763_v11  ;;  %633 = vmatpush1.msra.mxu1 %v5767_v12  ;;  %v5779_v17 = vld [vmem:[#allocation5 + $0x1a8] sm:$0xff]  ;;  %v5783_v18 = vld [vmem:[#allocation5 + $0x1b8] sm:$0xff]  ;;  %v5785_v19 = vld [vmem:[#allocation5 + $0x1a0] sm:$0xff]  ;;  %s9008_s12 = smov (!%p449_p4, %s5653_s12), 1 }
  0x5f   : > { %545 = vmatprep.subr.mxu0 %v5769_v13  ;;  %634 = vmatprep.subr.mxu1 %v5771_v14  ;;  %v5787_v20 = vld [vmem:[#allocation5 + $0x1b0] sm:$0xff]  ;;  %v5791_v21 = vld [vmem:[#allocation5 + $0x188] sm:$0xff]  ;;  %v5793_v22 = vld [vmem:[#allocation5 + $0x198] sm:$0xff]  ;;  %s5086_s15 = sshll.u32 %s9008_s12, 3 }
  0x60   : > { %546 = vmatpush1.msra.mxu0 %v5775_v15  ;;  %635 = vmatpush1.msra.mxu1 %v5777_v16  ;;  %v5797_v23 = vld [vmem:[#allocation5 + $0x180] sm:$0xff]  ;;  %v5799_v24 = vld [vmem:[#allocation5 + $0x190] sm:$0xff]  ;;  %v5803_v25 = vld [vmem:[#allocation5 + $0x168] sm:$0xff]  ;;  %s452_s21 = scalar_lea.vmem %s8325_s9, %s5086_s15 }
  0x61   : > { %547 = vmatprep.subr.mxu0 %v5779_v17  ;;  %636 = vmatprep.subr.mxu1 %v5783_v18  ;;  %v5805_v26 = vld [vmem:[#allocation5 + $0x178] sm:$0xff]  ;;  %v5809_v27 = vld [vmem:[#allocation5 + $0x160] sm:$0xff]  ;;  %v5811_v28 = vld [vmem:[#allocation5 + $0x170] sm:$0xff] }
  0x62   : > { %548 = vmatpush1.msra.mxu0 %v5785_v19  ;;  %637 = vmatpush1.msra.mxu1 %v5787_v20  ;;  %v5815_v29 = vld [vmem:[#allocation5 + $0x148] sm:$0xff]  ;;  %v5817_v30 = vld [vmem:[#allocation5 + $0x158] sm:$0xff]  ;;  %v5821_v31 = vld [vmem:[#allocation5 + $0x140] sm:$0xff] }
  0x63   : > { %549 = vmatprep.subr.mxu0 %v5791_v21  ;;  %638 = vmatprep.subr.mxu1 %v5793_v22  ;;  %v5823_v32 = vld [vmem:[#allocation5 + $0x150] sm:$0xff]  ;;  %v5827_v33 = vld [vmem:[#allocation5 + $0x128] sm:$0xff]  ;;  %v5829_v34 = vld [vmem:[#allocation5 + $0x138] sm:$0xff] }
  0x64   : > { %550 = vmatpush1.msra.mxu0 %v5797_v23  ;;  %639 = vmatpush1.msra.mxu1 %v5799_v24  ;;  %v5833_v35 = vld [vmem:[#allocation5 + $0x120] sm:$0xff]  ;;  %v5835_v36 = vld [vmem:[#allocation5 + $0x130] sm:$0xff]  ;;  %v5839_v37 = vld [vmem:[#allocation5 + $0x108] sm:$0xff] }
  0x65   : > { %551 = vmatprep.subr.mxu0 %v5803_v25  ;;  %640 = vmatprep.subr.mxu1 %v5805_v26  ;;  %v5841_v38 = vld [vmem:[#allocation5 + $0x118] sm:$0xff]  ;;  %v5845_v39 = vld [vmem:[#allocation5 + $0x100] sm:$0xff]  ;;  %v5847_v40 = vld [vmem:[#allocation5 + $0x110] sm:$0xff] }
  0x66   : > { %552 = vmatpush1.msra.mxu0 %v5809_v27  ;;  %641 = vmatpush1.msra.mxu1 %v5811_v28  ;;  %v5851_v41 = vld [vmem:[#allocation5 + $0xe8] sm:$0xff]  ;;  %v5853_v42 = vld [vmem:[#allocation5 + $0xf8] sm:$0xff]  ;;  %v5857_v43 = vld [vmem:[#allocation5 + $0xe0] sm:$0xff] }
  0x67   : > { %553 = vmatprep.subr.mxu0 %v5815_v29  ;;  %642 = vmatprep.subr.mxu1 %v5817_v30  ;;  %v5859_v44 = vld [vmem:[#allocation5 + $0xf0] sm:$0xff]  ;;  %v5863_v45 = vld [vmem:[#allocation5 + $0xc8] sm:$0xff]  ;;  %v5865_v46 = vld [vmem:[#allocation5 + $0xd8] sm:$0xff] }
  0x68   : > { %554 = vmatpush1.msra.mxu0 %v5821_v31  ;;  %643 = vmatpush1.msra.mxu1 %v5823_v32  ;;  %v5869_v47 = vld [vmem:[#allocation5 + $0xc0] sm:$0xff]  ;;  %v5871_v48 = vld [vmem:[#allocation5 + $0xd0] sm:$0xff]  ;;  %v5875_v49 = vld [vmem:[#allocation5 + $0xa8] sm:$0xff] }
  0x69   : > { %555 = vmatprep.subr.mxu0 %v5827_v33  ;;  %644 = vmatprep.subr.mxu1 %v5829_v34  ;;  %v5877_v50 = vld [vmem:[#allocation5 + $0xb8] sm:$0xff]  ;;  %v5881_v51 = vld [vmem:[#allocation5 + $0xa0] sm:$0xff]  ;;  %v5883_v52 = vld [vmem:[#allocation5 + $0xb0] sm:$0xff] }
  0x6a   : > { %556 = vmatpush1.msra.mxu0 %v5833_v35  ;;  %645 = vmatpush1.msra.mxu1 %v5835_v36  ;;  %v5887_v53 = vld [vmem:[#allocation5 + $0x88] sm:$0xff]  ;;  %v5889_v54 = vld [vmem:[#allocation5 + $0x98] sm:$0xff]  ;;  %v5893_v55 = vld [vmem:[#allocation5 + $0x80] sm:$0xff] }
  0x6b   : > { %557 = vmatprep.subr.mxu0 %v5839_v37  ;;  %646 = vmatprep.subr.mxu1 %v5841_v38  ;;  %v5895_v56 = vld [vmem:[#allocation5 + $0x90] sm:$0xff]  ;;  %v5899_v57 = vld [vmem:[#allocation5 + $0x68] sm:$0xff]  ;;  %v5901_v58 = vld [vmem:[#allocation5 + $0x78] sm:$0xff] }
  0x6c   : > { %558 = vmatpush1.msra.mxu0 %v5845_v39  ;;  %647 = vmatpush1.msra.mxu1 %v5847_v40  ;;  %v5905_v59 = vld [vmem:[#allocation5 + $0x60] sm:$0xff]  ;;  %v5907_v60 = vld [vmem:[#allocation5 + $0x70] sm:$0xff]  ;;  %v5911_v61 = vld [vmem:[#allocation5 + $0x48] sm:$0xff] }
  0x6d   : > { %559 = vmatprep.subr.mxu0 %v5851_v41  ;;  %648 = vmatprep.subr.mxu1 %v5853_v42  ;;  %v5913_v62 = vld [vmem:[#allocation5 + $0x58] sm:$0xff]  ;;  %v5917_v63 = vld [vmem:[#allocation5 + $0x40] sm:$0xff]  ;;  %v5919_v0 = vld [vmem:[#allocation5 + $0x50] sm:$0xff] }
  0x6e   : > { %560 = vmatpush1.msra.mxu0 %v5857_v43  ;;  %649 = vmatpush1.msra.mxu1 %v5859_v44  ;;  %8528 = vst [vmem:[#allocation15_spill] sm:$0xff] %v5913_v62  ;;  %v5923_v1 = vld [vmem:[#allocation5 + $0x28] sm:$0xff]  ;;  %v5925_v2 = vld [vmem:[#allocation5 + $0x38] sm:$0xff]  ;;  %v5929_v3 = vld [vmem:[#allocation5 + $0x20] sm:$0xff] }
  0x6f   : > { %561 = vmatprep.subr.mxu0 %v5863_v45  ;;  %650 = vmatprep.subr.mxu1 %v5865_v46  ;;  %v5931_v4 = vld [vmem:[#allocation5 + $0x30] sm:$0xff]  ;;  %v5935_v5 = vld [vmem:[#allocation5 + $0x8] sm:$0xff]  ;;  %v5937_v6 = vld [vmem:[#allocation5 + $0x18] sm:$0xff] }
  0x70   : > { %562 = vmatpush1.msra.mxu0 %v5869_v47  ;;  %651 = vmatpush1.msra.mxu1 %v5871_v48  ;;  %v5941_v7 = vld [vmem:[#allocation5] sm:$0xff]  ;;  %v5943_v8 = vld [vmem:[#allocation5 + $0x10] sm:$0xff] }
  0x71   : > { %563 = vmatprep.subr.mxu0 %v5875_v49  ;;  %652 = vmatprep.subr.mxu1 %v5877_v50 }
  0x72   : > { %564 = vmatpush1.msra.mxu0 %v5881_v51  ;;  %653 = vmatpush1.msra.mxu1 %v5883_v52 }
  0x73   : > { %565 = vmatprep.subr.mxu0 %v5887_v53  ;;  %654 = vmatprep.subr.mxu1 %v5889_v54 }
  0x74   : > { %566 = vmatpush1.msra.mxu0 %v5893_v55  ;;  %655 = vmatpush1.msra.mxu1 %v5895_v56 }
  0x75   : > { %567 = vmatprep.subr.mxu0 %v5899_v57  ;;  %656 = vmatprep.subr.mxu1 %v5901_v58 }
  0x76   : > { %568 = vmatpush1.msra.mxu0 %v5905_v59  ;;  %657 = vmatpush1.msra.mxu1 %v5907_v60 }
  0x77   : > { %569 = vmatprep.subr.mxu0 %v5911_v61  ;;  %658 = vmatprep.subr.mxu1 %v5913_v62  ;;  %v453_v62 = vld [vmem:[%s5743_s27] sm:$0xff] }
  0x78   : > { %570 = vmatpush1.msra.mxu0 %v5917_v63  ;;  %659 = vmatpush1.msra.mxu1 %v5919_v0 }
  0x79   : > { %571 = vmatprep.subr.mxu0 %v5923_v1  ;;  %660 = vmatprep.subr.mxu1 %v5925_v2 }
  0x7a   : > { %572 = vmatpush1.msra.mxu0 %v5929_v3  ;;  %661 = vmatpush1.msra.mxu1 %v5931_v4 }
  0x7b   : > { %573 = vmatprep.subr.mxu0 %v5935_v5  ;;  %662 = vmatprep.subr.mxu1 %v5937_v6 }
  0x7c   : > { %574 = vmatpush1.msra.mxu0 %v5941_v7  ;;  %663 = vmatpush1.msra.mxu1 %v5943_v8 }
  0x7d   : > { %608 = vmatmul.mubr.f32.vlgmr.msra.gmra.mxu0 %v453_v62  ;;  %828 = vmatprep.subr.mxu0 %v5759_v9  ;;  %v454_v9 = vld [vmem:[%s5743_s27 + $0x8] sm:$0xff] }
  0x7e   : > { %917 = vmatprep.subr.mxu1 %v5761_v10  ;;  %697 = vmatmul.mubr.f32.vlgmr.msra.gmra.mxu1 %v453_v62  ;;  %v8529_v10 = vmov 0.0   ;;  %v6168_v62 = vld [vmem:[#allocation7 + $0x80] sm:$0xff] }
  0x7f   : > { %829 = vmatpush1.msra.mxu0 %v5763_v11  ;;  %918 = vmatpush1.msra.mxu1 %v5767_v12  ;;  %v455_v11 = vld [vmem:[%s5743_s27 + $0x10] sm:$0xff]  ;;  %v456_v12 = vld [vmem:[%s5743_s27 + $0x18] sm:$0xff]  ;;  %8535 = vst [vmem:[#allocation19_spill] sm:$0xff] %v6168_v62 }
  0x80   : > { %830 = vmatprep.subr.mxu0 %v5769_v13  ;;  %919 = vmatprep.subr.mxu1 %v5771_v14  ;;  %v8530_v13 = vld [vmem:[#allocation15_spill] sm:$0xff] }
  0x81   : > { %831 = vmatpush1.msra.mxu0 %v5775_v15  ;;  %920 = vmatpush1.msra.mxu1 %v5777_v16  ;;  %v5087_v14 = vld [vmem:[%s5743_s27 + $0x20] sm:$0xff]  ;;  %v6024_v15 = vld [vmem:[#allocation7 + $0x1e8] sm:$0xff]  ;;  %v6028_v16 = vld [vmem:[#allocation7 + $0x1f8] sm:$0xff] }
  0x82   : > { %832 = vmatprep.subr.mxu0 %v5779_v17  ;;  %921 = vmatprep.subr.mxu1 %v5783_v18  ;;  %v6031_v17 = vld [vmem:[#allocation7 + $0x1e0] sm:$0xff]  ;;  %v6033_v18 = vld [vmem:[#allocation7 + $0x1f0] sm:$0xff] }
  0x83   : > { %833 = vmatpush1.msra.mxu0 %v5785_v19  ;;  %922 = vmatpush1.msra.mxu1 %v5787_v20  ;;  %v6037_v19 = vld [vmem:[#allocation7 + $0x1c8] sm:$0xff]  ;;  %v6039_v20 = vld [vmem:[#allocation7 + $0x1d8] sm:$0xff] }
  0x84   : > { %834 = vmatprep.subr.mxu0 %v5791_v21  ;;  %923 = vmatprep.subr.mxu1 %v5793_v22  ;;  %v6042_v21 = vld [vmem:[#allocation7 + $0x1c0] sm:$0xff]  ;;  %v6044_v22 = vld [vmem:[#allocation7 + $0x1d0] sm:$0xff] }
  0x85   : > { %835 = vmatpush1.msra.mxu0 %v5797_v23  ;;  %924 = vmatpush1.msra.mxu1 %v5799_v24  ;;  %v6050_v23 = vld [vmem:[#allocation7 + $0x1b8] sm:$0xff]  ;;  %v6054_v24 = vld [vmem:[#allocation7 + $0x1a0] sm:$0xff] }
  0x86   : > { %836 = vmatprep.subr.mxu0 %v5803_v25  ;;  %925 = vmatprep.subr.mxu1 %v5805_v26  ;;  %v6056_v25 = vld [vmem:[#allocation7 + $0x1b0] sm:$0xff]  ;;  %v6060_v26 = vld [vmem:[#allocation7 + $0x188] sm:$0xff] }
  0x87   : > { %837 = vmatpush1.msra.mxu0 %v5809_v27  ;;  %926 = vmatpush1.msra.mxu1 %v5811_v28  ;;  %v6062_v27 = vld [vmem:[#allocation7 + $0x198] sm:$0xff]  ;;  %v6066_v28 = vld [vmem:[#allocation7 + $0x180] sm:$0xff] }
  0x88   : > { %838 = vmatprep.subr.mxu0 %v5815_v29  ;;  %927 = vmatprep.subr.mxu1 %v5817_v30  ;;  %v6068_v29 = vld [vmem:[#allocation7 + $0x190] sm:$0xff]  ;;  %v6072_v30 = vld [vmem:[#allocation7 + $0x168] sm:$0xff] }
  0x89   : > { %839 = vmatpush1.msra.mxu0 %v5821_v31  ;;  %928 = vmatpush1.msra.mxu1 %v5823_v32  ;;  %v6074_v31 = vld [vmem:[#allocation7 + $0x178] sm:$0xff]  ;;  %v6078_v32 = vld [vmem:[#allocation7 + $0x160] sm:$0xff] }
  0x8a   : > { %840 = vmatprep.subr.mxu0 %v5827_v33  ;;  %929 = vmatprep.subr.mxu1 %v5829_v34  ;;  %v6080_v33 = vld [vmem:[#allocation7 + $0x170] sm:$0xff]  ;;  %v6084_v34 = vld [vmem:[#allocation7 + $0x148] sm:$0xff] }
  0x8b   : > { %841 = vmatpush1.msra.mxu0 %v5833_v35  ;;  %930 = vmatpush1.msra.mxu1 %v5835_v36  ;;  %v6086_v35 = vld [vmem:[#allocation7 + $0x158] sm:$0xff]  ;;  %v6090_v36 = vld [vmem:[#allocation7 + $0x140] sm:$0xff] }
  0x8c   : > { %842 = vmatprep.subr.mxu0 %v5839_v37  ;;  %931 = vmatprep.subr.mxu1 %v5841_v38  ;;  %v6092_v37 = vld [vmem:[#allocation7 + $0x150] sm:$0xff]  ;;  %v6096_v38 = vld [vmem:[#allocation7 + $0x128] sm:$0xff] }
  0x8d   : > { %843 = vmatpush1.msra.mxu0 %v5845_v39  ;;  %932 = vmatpush1.msra.mxu1 %v5847_v40  ;;  %v6098_v39 = vld [vmem:[#allocation7 + $0x138] sm:$0xff]  ;;  %v6102_v40 = vld [vmem:[#allocation7 + $0x120] sm:$0xff] }
  0x8e   : > { %844 = vmatprep.subr.mxu0 %v5851_v41  ;;  %933 = vmatprep.subr.mxu1 %v5853_v42  ;;  %v6104_v41 = vld [vmem:[#allocation7 + $0x130] sm:$0xff]  ;;  %v6108_v42 = vld [vmem:[#allocation7 + $0x108] sm:$0xff] }
  0x8f   : > { %845 = vmatpush1.msra.mxu0 %v5857_v43  ;;  %934 = vmatpush1.msra.mxu1 %v5859_v44  ;;  %v6110_v43 = vld [vmem:[#allocation7 + $0x118] sm:$0xff]  ;;  %v6114_v44 = vld [vmem:[#allocation7 + $0x100] sm:$0xff] }
  0x90   : > { %613 = vmatprep.mubr.f32.mxu0 %v8529_v10  ;;  %846 = vmatprep.subr.mxu0 %v5863_v45  ;;  %v6116_v45 = vld [vmem:[#allocation7 + $0x110] sm:$0xff] }
  0x91   : > { %935 = vmatprep.subr.mxu1 %v5865_v46  ;;  %614 = vmatmul.mubr.f32.gmra.mxu0 %v454_v9  ;;  %v6120_v46 = vld [vmem:[#allocation7 + $0xe8] sm:$0xff] }
  0x92   : > { %847 = vmatpush1.msra.mxu0 %v5869_v47  ;;  %936 = vmatpush1.msra.mxu1 %v5871_v48  ;;  %v6122_v47 = vld [vmem:[#allocation7 + $0xf8] sm:$0xff]  ;;  %v6126_v48 = vld [vmem:[#allocation7 + $0xe0] sm:$0xff] }
  0x93   : > { %702 = vmatprep.mubr.f32.mxu1 %v8529_v10  ;;  %848 = vmatprep.subr.mxu0 %v5875_v49  ;;  %v6130_v49 = vld [vmem:[#allocation7 + $0xf0] sm:$0xff] }
  0x94   : > { %937 = vmatprep.subr.mxu1 %v5877_v50  ;;  %703 = vmatmul.mubr.f32.gmra.mxu1 %v454_v9  ;;  %v5088_v50 = vld [vmem:[%s5743_s27 + $0x28] sm:$0xff]  ;;  %v6198_v9 = vld [vmem:[#allocation7 + $0x50] sm:$0xff] }
  0x95   : > { %849 = vmatpush1.msra.mxu0 %v5881_v51  ;;  %938 = vmatpush1.msra.mxu1 %v5883_v52  ;;  %v6135_v51 = vld [vmem:[#allocation7 + $0xc8] sm:$0xff]  ;;  %v6137_v52 = vld [vmem:[#allocation7 + $0xd8] sm:$0xff]  ;;  %8544 = vst [vmem:[#allocation28_spill] sm:$0xff] %v6198_v9 }
  0x96   : > { %619 = vmatprep.mubr.f32.mxu0 %v8529_v10  ;;  %850 = vmatprep.subr.mxu0 %v5887_v53  ;;  %v6141_v53 = vld [vmem:[#allocation7 + $0xc0] sm:$0xff] }
  0x97   : > { %939 = vmatprep.subr.mxu1 %v5889_v54  ;;  %620 = vmatmul.mubr.f32.gmra.mxu0 %v455_v11  ;;  %v6144_v54 = vld [vmem:[#allocation7 + $0xd0] sm:$0xff] }
  0x98   : > { %851 = vmatpush1.msra.mxu0 %v5893_v55  ;;  %940 = vmatpush1.msra.mxu1 %v5895_v56  ;;  %v6146_v55 = vld [vmem:[#allocation7 + $0xa8] sm:$0xff]  ;;  %v6150_v56 = vld [vmem:[#allocation7 + $0xb8] sm:$0xff] }
  0x99   : > { %708 = vmatprep.mubr.f32.mxu1 %v8529_v10  ;;  %852 = vmatprep.subr.mxu0 %v5899_v57  ;;  %v6154_v57 = vld [vmem:[#allocation7 + $0xa0] sm:$0xff] }
  0x9a   : > { %941 = vmatprep.subr.mxu1 %v5901_v58  ;;  %709 = vmatmul.mubr.f32.gmra.mxu1 %v455_v11  ;;  %8531 = vst [vmem:[#allocation15_spill] sm:$0xff] %v6154_v57  ;;  %v6158_v58 = vld [vmem:[#allocation7 + $0xb0] sm:$0xff]  ;;  %v6200_v11 = vld [vmem:[#allocation7 + $0x28] sm:$0xff] }
  0x9b   : > { %853 = vmatpush1.msra.mxu0 %v5905_v59  ;;  %942 = vmatpush1.msra.mxu1 %v5907_v60  ;;  %8532 = vst [vmem:[#allocation16_spill] sm:$0xff] %v6158_v58  ;;  %v5089_v59 = vld [vmem:[%s5743_s27 + $0x30] sm:$0xff]  ;;  %v6162_v60 = vld [vmem:[#allocation7 + $0x88] sm:$0xff]  ;;  %8545 = vst [vmem:[#allocation29_spill] sm:$0xff] %v6200_v11 }
  0x9c   : > { %625 = vmatprep.mubr.f32.mxu0 %v8529_v10  ;;  %854 = vmatprep.subr.mxu0 %v5911_v61  ;;  %8533 = vst [vmem:[#allocation17_spill] sm:$0xff] %v6162_v60  ;;  %v6164_v61 = vld [vmem:[#allocation7 + $0x98] sm:$0xff] }
  0x9d   : > { %943 = vmatprep.subr.mxu1 %v8530_v13  ;;  %626 = vmatmul.mubr.f32.gmra.mxu0 %v456_v12  ;;  %8534 = vst [vmem:[#allocation18_spill] sm:$0xff] %v6164_v61  ;;  %v6208_v13 = vld [vmem:[#allocation7 + $0x20] sm:$0xff] }
  0x9e   : > { %855 = vmatpush1.msra.mxu0 %v5917_v63  ;;  %944 = vmatpush1.msra.mxu1 %v5919_v0  ;;  %v6171_v63 = vld [vmem:[#allocation7 + $0x90] sm:$0xff]  ;;  %v6173_v0 = vld [vmem:[#allocation7 + $0x68] sm:$0xff]  ;;  %8547 = vst [vmem:[#allocation31_spill] sm:$0xff] %v6208_v13 }
  0x9f   : > { %714 = vmatprep.mubr.f32.mxu1 %v8529_v10  ;;  %856 = vmatprep.subr.mxu0 %v5923_v1  ;;  %8536 = vst [vmem:[#allocation20_spill] sm:$0xff] %v6171_v63  ;;  %8537 = vst [vmem:[#allocation21_spill] sm:$0xff] %v6173_v0  ;;  %v6177_v1 = vld [vmem:[#allocation7 + $0x78] sm:$0xff] }
  0xa0   : > { %945 = vmatprep.subr.mxu1 %v5925_v2  ;;  %715 = vmatmul.mubr.f32.gmra.mxu1 %v456_v12  ;;  %8538 = vst [vmem:[#allocation22_spill] sm:$0xff] %v6177_v1  ;;  %v6181_v2 = vld [vmem:[#allocation7 + $0x60] sm:$0xff]  ;;  %v6204_v12 = vld [vmem:[#allocation7 + $0x38] sm:$0xff] }
  0xa1   : > { %857 = vmatpush1.msra.mxu0 %v5929_v3  ;;  %946 = vmatpush1.msra.mxu1 %v5931_v4  ;;  %8539 = vst [vmem:[#allocation23_spill] sm:$0xff] %v6181_v2  ;;  %v6185_v3 = vld [vmem:[#allocation7 + $0x70] sm:$0xff]  ;;  %v5090_v4 = vld [vmem:[%s5743_s27 + $0x38] sm:$0xff]  ;;  %8546 = vst [vmem:[#allocation30_spill] sm:$0xff] %v6204_v12 }
  0xa2   : > { %858 = vmatprep.subr.mxu0 %v5935_v5  ;;  %947 = vmatprep.subr.mxu1 %v5937_v6  ;;  %8540 = vst [vmem:[#allocation24_spill] sm:$0xff] %v6185_v3  ;;  %v6189_v5 = vld [vmem:[#allocation7 + $0x48] sm:$0xff]  ;;  %v6191_v6 = vld [vmem:[#allocation7 + $0x58] sm:$0xff] }
  0xa3   : > { %859 = vmatpush1.msra.mxu0 %v5941_v7  ;;  %892 = vmatprep.mubr.f32.mxu0 %v8529_v10  ;;  %8541 = vst [vmem:[#allocation25_spill] sm:$0xff] %v6189_v5  ;;  %8542 = vst [vmem:[#allocation26_spill] sm:$0xff] %v6191_v6  ;;  %v6195_v7 = vld [vmem:[#allocation7 + $0x40] sm:$0xff] }
  0xa4   : > { %948 = vmatpush1.msra.mxu1 %v5943_v8  ;;  %893 = vmatmul.mubr.f32.vlgmr.msra.gmra.mxu0 %v5087_v14  ;;  %v6048_v8 = vld [vmem:[#allocation7 + $0x1a8] sm:$0xff]  ;;  %8543 = vst [vmem:[#allocation27_spill] sm:$0xff] %v6195_v7 }
  0xa5   : > { %981 = vmatprep.mubr.f32.mxu1 %v8529_v10  ;;  %1091 = vmatprep.subr.mxu0 %v6024_v15 }
  0xa6   : > { %1162 = vmatprep.subr.mxu1 %v6028_v16  ;;  %982 = vmatmul.mubr.f32.vlgmr.msra.gmra.mxu1 %v5087_v14  ;;  %v6210_v14 = vld [vmem:[#allocation7 + $0x30] sm:$0xff] }
  0xa7   : > { %1092 = vmatpush1.msra.mxu0 %v6031_v17  ;;  %1163 = vmatpush1.msra.mxu1 %v6033_v18  ;;  %8548 = vst [vmem:[#allocation32_spill] sm:$0xff] %v6210_v14 }
  0xa8   : > { %1093 = vmatprep.subr.mxu0 %v6037_v19  ;;  %1164 = vmatprep.subr.mxu1 %v6039_v20 }
  0xa9   : > { %1094 = vmatpush1.msra.mxu0 %v6042_v21  ;;  %1165 = vmatpush1.msra.mxu1 %v6044_v22 }
  0xaa   : > { %1095 = vmatprep.subr.mxu0 %v6048_v8  ;;  %1166 = vmatprep.subr.mxu1 %v6050_v23 }
  0xab   : > { %1096 = vmatpush1.msra.mxu0 %v6054_v24  ;;  %1167 = vmatpush1.msra.mxu1 %v6056_v25 }
  0xac   : > { %1097 = vmatprep.subr.mxu0 %v6060_v26  ;;  %1168 = vmatprep.subr.mxu1 %v6062_v27 }
  0xad   : > { %1098 = vmatpush1.msra.mxu0 %v6066_v28  ;;  %1169 = vmatpush1.msra.mxu1 %v6068_v29 }
  0xae   : > { %1099 = vmatprep.subr.mxu0 %v6072_v30  ;;  %1170 = vmatprep.subr.mxu1 %v6074_v31 }
  0xaf   : > { %1100 = vmatpush1.msra.mxu0 %v6078_v32  ;;  %1171 = vmatpush1.msra.mxu1 %v6080_v33 }
  0xb0   : > { %1101 = vmatprep.subr.mxu0 %v6084_v34  ;;  %1172 = vmatprep.subr.mxu1 %v6086_v35 }
  0xb1   : > { %1102 = vmatpush1.msra.mxu0 %v6090_v36  ;;  %1173 = vmatpush1.msra.mxu1 %v6092_v37 }
  0xb2   : > { %1103 = vmatprep.subr.mxu0 %v6096_v38  ;;  %1174 = vmatprep.subr.mxu1 %v6098_v39 }
  0xb3   : > { %1104 = vmatpush1.msra.mxu0 %v6102_v40  ;;  %1175 = vmatpush1.msra.mxu1 %v6104_v41 }
  0xb4   : > { %1105 = vmatprep.subr.mxu0 %v6108_v42  ;;  %1176 = vmatprep.subr.mxu1 %v6110_v43 }
  0xb5   : > { %1106 = vmatpush1.msra.mxu0 %v6114_v44  ;;  %1177 = vmatpush1.msra.mxu1 %v6116_v45 }
  0xb6   : > { %1107 = vmatprep.subr.mxu0 %v6120_v46  ;;  %1178 = vmatprep.subr.mxu1 %v6122_v47 }
  0xb7   : > { %898 = vmatprep.mubr.f32.mxu0 %v8529_v10  ;;  %1108 = vmatpush1.msra.mxu0 %v6126_v48 }
  0xb8   : > { %1179 = vmatpush1.msra.mxu1 %v6130_v49  ;;  %899 = vmatmul.mubr.f32.gmra.mxu0 %v5088_v50 }
  0xb9   : > { %1109 = vmatprep.subr.mxu0 %v6135_v51  ;;  %1180 = vmatprep.subr.mxu1 %v6137_v52 }
  0xba   : > { %987 = vmatprep.mubr.f32.mxu1 %v8529_v10  ;;  %1110 = vmatpush1.msra.mxu0 %v6141_v53 }
  0xbb   : > { %1181 = vmatpush1.msra.mxu1 %v6144_v54  ;;  %1111 = vmatprep.subr.mxu0 %v6146_v55 }
  0xbc   : > { %988 = vmatmul.mubr.f32.gmra.mxu1 %v5088_v50  ;;  %1182 = vmatprep.subr.mxu1 %v6150_v56  ;;  %v6214_v50 = vld [vmem:[#allocation7 + $0x8] sm:$0xff] }
  0xbd   : > { %904 = vmatprep.mubr.f32.mxu0 %v8529_v10  ;;  %1112 = vmatpush1.msra.mxu0 %v6154_v57  ;;  %8549 = vst [vmem:[#allocation33_spill] sm:$0xff] %v6214_v50 }
  0xbe   : > { %1183 = vmatpush1.msra.mxu1 %v6158_v58  ;;  %905 = vmatmul.mubr.f32.gmra.mxu0 %v5089_v59 }
  0xbf   : > { %1113 = vmatprep.subr.mxu0 %v6162_v60  ;;  %1184 = vmatprep.subr.mxu1 %v6164_v61 }
  0xc0   : > { %993 = vmatprep.mubr.f32.mxu1 %v8529_v10  ;;  %1114 = vmatpush1.msra.mxu0 %v6168_v62 }
  0xc1   : > { %1185 = vmatpush1.msra.mxu1 %v6171_v63  ;;  %1115 = vmatprep.subr.mxu0 %v6173_v0 }
  0xc2   : > { %994 = vmatmul.mubr.f32.gmra.mxu1 %v5089_v59  ;;  %1186 = vmatprep.subr.mxu1 %v6177_v1  ;;  %v6216_v59 = vld [vmem:[#allocation7 + $0x18] sm:$0xff] }
  0xc3   : > { %910 = vmatprep.mubr.f32.mxu0 %v8529_v10  ;;  %1116 = vmatpush1.msra.mxu0 %v6181_v2  ;;  %8550 = vst [vmem:[#allocation34_spill] sm:$0xff] %v6216_v59 }
  0xc4   : > { %1187 = vmatpush1.msra.mxu1 %v6185_v3  ;;  %911 = vmatmul.mubr.f32.gmra.mxu0 %v5090_v4 }
  0xc5   : > { %1117 = vmatprep.subr.mxu0 %v6189_v5  ;;  %1188 = vmatprep.subr.mxu1 %v6191_v6  ;;  %v6219_v6 = vld [vmem:[#allocation7] sm:$0xff] }
  0xc6   : > { %999 = vmatprep.mubr.f32.mxu1 %v8529_v10  ;;  %1118 = vmatpush1.msra.mxu0 %v6195_v7  ;;  %8551 = vst [vmem:[#allocation35_spill] sm:$0xff] %v6219_v6  ;;  %v6223_v7 = vld [vmem:[#allocation7 + $0x10] sm:$0xff] }
  0xc7   : > { %1189 = vmatpush1.msra.mxu1 %v6198_v9  ;;  %1119 = vmatprep.subr.mxu0 %v6200_v11  ;;  %8552 = vst [vmem:[#allocation36_spill] sm:$0xff] %v6223_v7 }
  0xc8   : > { %1000 = vmatmul.mubr.f32.gmra.mxu1 %v5090_v4  ;;  %1190 = vmatprep.subr.mxu1 %v6204_v12  ;;  %v8553_v4 = vld [vmem:[#allocation26_spill] sm:$0xff] }
  0xc9   : > { %1120 = vmatpush1.msra.mxu0 %v6208_v13  ;;  %1191 = vmatpush1.msra.mxu1 %v6210_v14 }
  0xca   : > { %1121 = vmatprep.subr.mxu0 %v6214_v50  ;;  %1192 = vmatprep.subr.mxu1 %v6216_v59 }
  0xcb   : > { %1122 = vmatpush1.msra.mxu0 %v6219_v6  ;;  %1155 = vmatprep.mubr.f32.mxu0 %v8529_v10 }
  0xcc   : > { %1193 = vmatpush1.msra.mxu1 %v6223_v7  ;;  %1226 = vmatprep.mubr.f32.mxu1 %v8529_v10 }
  0xcd   : > { %1156 = vmatmul.mubr.f32.vlgmr.msra.gmra.mxu0 %v8529_v10  ;;  %1227 = vmatmul.mubr.f32.vlgmr.msra.gmra.mxu1 %v8529_v10 }
  0xce   : > { %1325 = vmatprep.subr.mxu0 %v6024_v15  ;;  %1396 = vmatprep.subr.mxu1 %v6028_v16 }
  0xcf   : > { %1326 = vmatpush1.msra.mxu0 %v6031_v17  ;;  %1397 = vmatpush1.msra.mxu1 %v6033_v18 }
  0xd0   : > { %1327 = vmatprep.subr.mxu0 %v6037_v19  ;;  %1398 = vmatprep.subr.mxu1 %v6039_v20 }
  0xd1   : > { %1328 = vmatpush1.msra.mxu0 %v6042_v21  ;;  %1399 = vmatpush1.msra.mxu1 %v6044_v22 }
  0xd2   : > { %1329 = vmatprep.subr.mxu0 %v6048_v8  ;;  %1400 = vmatprep.subr.mxu1 %v6050_v23 }
  0xd3   : > { %1330 = vmatpush1.msra.mxu0 %v6054_v24  ;;  %1401 = vmatpush1.msra.mxu1 %v6056_v25 }
  0xd4   : > { %1331 = vmatprep.subr.mxu0 %v6060_v26  ;;  %1402 = vmatprep.subr.mxu1 %v6062_v27 }
  0xd5   : > { %1332 = vmatpush1.msra.mxu0 %v6066_v28  ;;  %1403 = vmatpush1.msra.mxu1 %v6068_v29 }
  0xd6   : > { %1333 = vmatprep.subr.mxu0 %v6072_v30  ;;  %1404 = vmatprep.subr.mxu1 %v6074_v31 }
  0xd7   : > { %1334 = vmatpush1.msra.mxu0 %v6078_v32  ;;  %1405 = vmatpush1.msra.mxu1 %v6080_v33 }
  0xd8   : > { %1335 = vmatprep.subr.mxu0 %v6084_v34  ;;  %1406 = vmatprep.subr.mxu1 %v6086_v35 }
  0xd9   : > { %1336 = vmatpush1.msra.mxu0 %v6090_v36  ;;  %1407 = vmatpush1.msra.mxu1 %v6092_v37 }
  0xda   : > { %1337 = vmatprep.subr.mxu0 %v6096_v38  ;;  %1408 = vmatprep.subr.mxu1 %v6098_v39 }
  0xdb   : > { %1338 = vmatpush1.msra.mxu0 %v6102_v40  ;;  %1409 = vmatpush1.msra.mxu1 %v6104_v41 }
  0xdc   : > { %1339 = vmatprep.subr.mxu0 %v6108_v42  ;;  %1410 = vmatprep.subr.mxu1 %v6110_v43 }
  0xdd   : > { %1340 = vmatpush1.msra.mxu0 %v6114_v44  ;;  %1411 = vmatpush1.msra.mxu1 %v6116_v45 }
  0xde   : > { %1341 = vmatprep.subr.mxu0 %v6120_v46  ;;  %1412 = vmatprep.subr.mxu1 %v6122_v47 }
  0xdf   : > { %1342 = vmatpush1.msra.mxu0 %v6126_v48  ;;  %1413 = vmatpush1.msra.mxu1 %v6130_v49 }
  0xe0   : > { %1343 = vmatprep.subr.mxu0 %v6135_v51  ;;  %1414 = vmatprep.subr.mxu1 %v6137_v52 }
  0xe1   : > { %1344 = vmatpush1.msra.mxu0 %v6141_v53  ;;  %1415 = vmatpush1.msra.mxu1 %v6144_v54 }
  0xe2   : > { %1345 = vmatprep.subr.mxu0 %v6146_v55  ;;  %1416 = vmatprep.subr.mxu1 %v6150_v56 }
  0xe3   : > { %1346 = vmatpush1.msra.mxu0 %v6154_v57  ;;  %1417 = vmatpush1.msra.mxu1 %v6158_v58  ;;  %v8554_v58 = vld [vmem:[#allocation27_spill] sm:$0xff] }
  0xe4   : > { %1347 = vmatprep.subr.mxu0 %v6162_v60  ;;  %1418 = vmatprep.subr.mxu1 %v6164_v61 }
  0xe5   : > { %1348 = vmatpush1.msra.mxu0 %v6168_v62  ;;  %1419 = vmatpush1.msra.mxu1 %v6171_v63 }
  0xe6   : > { %1349 = vmatprep.subr.mxu0 %v6173_v0  ;;  %1420 = vmatprep.subr.mxu1 %v6177_v1 }
  0xe7   : > { %1350 = vmatpush1.msra.mxu0 %v6181_v2  ;;  %1421 = vmatpush1.msra.mxu1 %v6185_v3 }
  0xe8   : > { %1351 = vmatprep.subr.mxu0 %v6189_v5  ;;  %1422 = vmatprep.subr.mxu1 %v8553_v4 }
  0xe9   : > { %1352 = vmatpush1.msra.mxu0 %v8554_v58  ;;  %1423 = vmatpush1.msra.mxu1 %v6198_v9 }
  0xea   : > { %1353 = vmatprep.subr.mxu0 %v6200_v11  ;;  %1424 = vmatprep.subr.mxu1 %v6204_v12  ;;  %v523_v12 = vlaneseq }
  0xeb   : > { %1354 = vmatpush1.msra.mxu0 %v6208_v13  ;;  %1425 = vmatpush1.msra.mxu1 %v6210_v14 }
  0xec   : > { %1355 = vmatprep.subr.mxu0 %v6214_v50  ;;  %1426 = vmatprep.subr.mxu1 %v6216_v59  ;;  %v524_v13 = vshrl.u32 %v523_v12, 7 }
  0xed   : > { %1356 = vmatpush1.msra.mxu0 %v6219_v6  ;;  %1389 = vmatprep.mubr.f32.mxu0 %v8529_v10  ;;  %v521_v6 = vld [vmem:[%s8319_s3] sm:$0xf] }
  0xee   : > { %1427 = vmatpush1.msra.mxu1 %v6223_v7  ;;  %1460 = vmatprep.mubr.f32.mxu1 %v8529_v10  ;;  %v6303_v14 = vsub.s32 0, %v524_v13  ;;  %v6308_v59 = vsub.s32 1, %v524_v13  ;;  %v6314_v10 = vsub.s32 2, %v524_v13 }
  0xef   : > { %1560 = vmatprep.subr.mxu0 %v6024_v15  ;;  %1631 = vmatprep.subr.mxu1 %v6028_v16  ;;  %v6319_v16 = vsub.s32 3, %v524_v13 }
  0xf0   : > { %8555 = vst [vmem:[#allocation37_spill] sm:$0xff] %v6303_v14  ;;  %8556 = vst [vmem:[#allocation38_spill] sm:$0xff] %v6308_v59  ;;  %v6317_v15 = vrot.slane %v521_v6, %v6303_v14  ;;  %v530_v9 = vrot.slane %v521_v6, %v6308_v59  ;;  %v6328_v5 = vrot.slane %v521_v6, %v6314_v10 }
  0xf1   : > { %8557 = vst [vmem:[#allocation39_spill] sm:$0xff] %v6314_v10  ;;  %8558 = vst [vmem:[#allocation40_spill] sm:$0xff] %v6319_v16  ;;  %v6333_v0 = vrot.slane %v521_v6, %v6319_v16 }
 0x13d   : > { %v6301_v11 = vpop.f32.mrf.mxu0 }
 0x13e   : > { %v6310_v50 = vpop.f32.mrf.mxu1 }
 0x13f   : > { %v6312_v7 = vpop.f32.mrf.mxu0 }
 0x140   : > { %v6322_v58 = vpop.f32.mrf.mxu1 }
 0x151   : > { %v615_v12 = vpop.f32.mrf.mxu0 }
 0x152   : > { %v6325_v4 = vadd.f32 %v615_v12, %v6317_v15 }
 0x153   : > { %v617_v3 = vpop.f32.mrf.mxu0 }
 0x154   : > { %8559 = vst [vmem:[#allocation41_spill] sm:$0xff] %v6325_v4  ;;  %v6330_v2 = vadd.f32 %v617_v3, %v530_v9  ;;  %v704_v1 = vpop.f32.mrf.mxu1 }
 0x155   : > { %v6336_v13 = vadd.f32 %v704_v1, %v6328_v5 }
 0x156   : > { %8560 = vst [vmem:[#allocation42_spill] sm:$0xff] %v6330_v2  ;;  %v706_v63 = vpop.f32.mrf.mxu1 }
 0x157   : > { %8561 = vst [vmem:[#allocation43_spill] sm:$0xff] %v6336_v13  ;;  %v621_v62 = vpop.f32.mrf.mxu0  ;;  %v6339_v61 = vadd.f32 %v706_v63, %v6333_v0 }
 0x158   : > { %v6342_v12 = vadd.f32 %v621_v62, %v6317_v15 }
 0x159   : > { %8562 = vst [vmem:[#allocation44_spill] sm:$0xff] %v6339_v61  ;;  %v623_v4 = vpop.f32.mrf.mxu0 }
 0x15a   : > { %8563 = vst [vmem:[#allocation45_spill] sm:$0xff] %v6342_v12  ;;  %v6344_v60 = vadd.f32 %v623_v4, %v530_v9  ;;  %v710_v3 = vpop.f32.mrf.mxu1 }
 0x15b   : > { %v6347_v2 = vadd.f32 %v710_v3, %v6328_v5 }
 0x15c   : > { %8564 = vst [vmem:[#allocation46_spill] sm:$0xff] %v6344_v60  ;;  %v712_v6 = vpop.f32.mrf.mxu1 }
 0x15d   : > { %8565 = vst [vmem:[#allocation47_spill] sm:$0xff] %v6347_v2  ;;  %v627_v57 = vpop.f32.mrf.mxu0  ;;  %v6350_v1 = vadd.f32 %v712_v6, %v6333_v0  ;;  %v806_v6 = vld [vmem:[%s8319_s3] sm:$0xf] }
 0x15e   : > { %v6353_v13 = vadd.f32 %v627_v57, %v6317_v15 }
 0x15f   : > { %8566 = vst [vmem:[#allocation48_spill] sm:$0xff] %v6350_v1  ;;  %v629_v63 = vpop.f32.mrf.mxu0 }
 0x160   : > { %8567 = vst [vmem:[#allocation49_spill] sm:$0xff] %v6353_v13  ;;  %v6355_v61 = vadd.f32 %v629_v63, %v530_v9  ;;  %v716_v62 = vpop.f32.mrf.mxu1  ;;  %v6373_v63 = vrot.slane %v806_v6, %v6303_v14  ;;  %v6390_v14 = vrot.slane %v806_v6, %v6319_v16 }
 0x161   : > { %v6358_v12 = vadd.f32 %v716_v62, %v6328_v5  ;;  %v6376_v62 = vrot.slane %v806_v6, %v6308_v59 }
 0x162   : > { %8568 = vst [vmem:[#allocation50_spill] sm:$0xff] %v6355_v61  ;;  %v718_v4 = vpop.f32.mrf.mxu1  ;;  %8574 = vst [vmem:[#allocation56_spill] sm:$0xff] %v6373_v63 }
 0x163   : > { %8569 = vst [vmem:[#allocation51_spill] sm:$0xff] %v6358_v12  ;;  %v6361_v60 = vadd.f32 %v718_v4, %v6333_v0  ;;  %8575 = vst [vmem:[#allocation57_spill] sm:$0xff] %v6376_v62  ;;  %v6384_v12 = vrot.slane %v806_v6, %v6314_v10 }
 0x164   : > { %v6363_v3 = vpop.f32.mrf.mxu0  ;;  %8580 = vst [vmem:[#allocation62_spill] sm:$0xff] %v6390_v14 }
 0x165   : > { %8570 = vst [vmem:[#allocation52_spill] sm:$0xff] %v6361_v60  ;;  %8571 = vst [vmem:[#allocation53_spill] sm:$0xff] %v6363_v3 }
 0x166   : > { %v6368_v1 = vpop.f32.mrf.mxu0  ;;  %v6370_v57 = vpop.f32.mrf.mxu1  ;;  %8578 = vst [vmem:[#allocation60_spill] sm:$0xff] %v6384_v12 }
 0x167   : > { %8572 = vst [vmem:[#allocation54_spill] sm:$0xff] %v6368_v1  ;;  %8573 = vst [vmem:[#allocation55_spill] sm:$0xff] %v6370_v57 }
 0x168   : > { %v6381_v60 = vpop.f32.mrf.mxu1 }
 0x169   : > { %8577 = vst [vmem:[#allocation59_spill] sm:$0xff] %v6381_v60 }
 0x178   : > { %v900_v61 = vpop.f32.mrf.mxu0 }
 0x179   : > { %v6379_v4 = vadd.f32 %v900_v61, %v6373_v63 }
 0x17a   : > { %v902_v3 = vpop.f32.mrf.mxu0 }
 0x17b   : > { %8576 = vst [vmem:[#allocation58_spill] sm:$0xff] %v6379_v4  ;;  %v6387_v1 = vadd.f32 %v902_v3, %v6376_v62 }
 0x17c   : > { %v989_v57 = vpop.f32.mrf.mxu1 }
 0x17d   : > { %8579 = vst [vmem:[#allocation61_spill] sm:$0xff] %v6387_v1  ;;  %v6393_v13 = vadd.f32 %v989_v57, %v6384_v12 }
 0x17e   : > { %v906_v59 = vpop.f32.mrf.mxu0  ;;  %v991_v2 = vpop.f32.mrf.mxu1 }
 0x17f   : > { %8581 = vst [vmem:[#allocation63_spill] sm:$0xff] %v6393_v13  ;;  %v6396_v61 = vadd.f32 %v906_v59, %v6373_v63  ;;  %v6399_v4 = vadd.f32 %v991_v2, %v6390_v14 }
 0x180   : > { %v908_v10 = vpop.f32.mrf.mxu0 }
 0x181   : > { %8582 = vst [vmem:[#allocation64_spill] sm:$0xff] %v6396_v61  ;;  %8583 = vst [vmem:[#allocation65_spill] sm:$0xff] %v6399_v4  ;;  %v6402_v60 = vadd.f32 %v908_v10, %v6376_v62 }
 0x182   : > { %v995_v3 = vpop.f32.mrf.mxu1 }
 0x183   : > { %8584 = vst [vmem:[#allocation66_spill] sm:$0xff] %v6402_v60  ;;  %v6405_v1 = vadd.f32 %v995_v3, %v6384_v12 }
 0x184   : > { %v912_v6 = vpop.f32.mrf.mxu0  ;;  %v997_v16 = vpop.f32.mrf.mxu1 }
 0x185   : > { %8585 = vst [vmem:[#allocation67_spill] sm:$0xff] %v6405_v1  ;;  %v6408_v57 = vadd.f32 %v912_v6, %v6373_v63  ;;  %v6411_v13 = vadd.f32 %v997_v16, %v6390_v14  ;;  %v610_v1 = vadd.f32 %v6301_v11, %v6317_v15 }
 0x186   : > { %v914_v59 = vpop.f32.mrf.mxu0 }
 0x187   : > { %8586 = vst [vmem:[#allocation68_spill] sm:$0xff] %v6408_v57  ;;  %8587 = vst [vmem:[#allocation69_spill] sm:$0xff] %v6411_v13  ;;  %v6414_v2 = vadd.f32 %v914_v59, %v6376_v62  ;;  %v612_v57 = vadd.f32 %v6312_v7, %v530_v9  ;;  %v6692_v62 = vld [vmem:[#allocation7 + $0x18] sm:$0xff] }
 0x188   : > { %v1001_v61 = vpop.f32.mrf.mxu1 }
 0x189   : > { %8588 = vst [vmem:[#allocation70_spill] sm:$0xff] %v6414_v2  ;;  %v6417_v10 = vadd.f32 %v1001_v61, %v6384_v12  ;;  %v699_v2 = vadd.f32 %v6310_v50, %v6328_v5  ;;  %v6690_v12 = vld [vmem:[#allocation7 + $0x8] sm:$0xff] }
 0x18a   : > { %v1003_v60 = vpop.f32.mrf.mxu1 }
 0x18b   : > { %8589 = vst [vmem:[#allocation71_spill] sm:$0xff] %v6417_v10  ;;  %v6420_v3 = vadd.f32 %v1003_v60, %v6390_v14  ;;  %v6686_v14 = vld [vmem:[#allocation7 + $0x30] sm:$0xff] }
 0x18d   : > { %8590 = vst [vmem:[#allocation72_spill] sm:$0xff] %v6420_v3  ;;  %v1157_v6 = vpop.f32.mrf.mxu0  ;;  %v1228_v59 = vpop.f32.mrf.mxu1  ;;  %v701_v3 = vadd.f32 %v6322_v58, %v6333_v0 }
 0x18e   : > { %v1233_v16 = vadd.f32 %v1157_v6, %v610_v1  ;;  %v1235_v10 = vadd.f32 %v1228_v59, %v699_v2 }
 0x18f   : > { %v1159_v13 = vpop.f32.mrf.mxu0  ;;  %v1230_v60 = vpop.f32.mrf.mxu1 }
 0x190   : > { %v1237_v4 = vmul.f32 0.5, %v1233_v16  ;;  %v1234_v63 = vadd.f32 %v1159_v13, %v612_v57  ;;  %v1236_v11 = vadd.f32 %v1230_v60, %v701_v3 }
 0x192   : > { %5215 = vtanh.f32 %v1237_v4  ;;  %v1241_v61 = vmul.f32 0.5, %v1234_v63  ;;  %v1246_v15 = vmul.f32 0.5, %v1236_v11 }
 0x194   : > { %5217 = vtanh.f32 %v1241_v61 }
 0x195   : > { %5219 = vtanh.f32 %v1235_v10 }
 0x196   : > { %5221 = vtanh.f32 %v1246_v15 }
 0x19f   : > { %v5216_v7 = vpop.eup %5215 }
 0x1a0   : > { %v1239_v9 = vmul.f32 0.5, %v5216_v7 }
 0x1a1   : > { %v5218_v1 = vpop.eup %5217 }
 0x1a2   : > { %v1240_v6 = vadd.f32 0.5, %v1239_v9  ;;  %v1243_v13 = vmul.f32 0.5, %v5218_v1  ;;  %v5220_v16 = vpop.eup %5219 }
 0x1a3   : > { %v5222_v4 = vpop.eup %5221 }
 0x1a4   : > { %v1244_v57 = vadd.f32 0.5, %v1243_v13  ;;  %v1251_v50 = vmul.f32 %v5220_v16, %v1240_v6  ;;  %v1248_v2 = vmul.f32 0.5, %v5222_v4  ;;  %v6522_v4 = vld [vmem:[#allocation7 + $0x1f0] sm:$0xff] }
 0x1a6   : > { %v1250_v5 = vmul.f32 0.0, %v1244_v57  ;;  %v1249_v58 = vadd.f32 0.5, %v1248_v2  ;;  %v6526_v2 = vld [vmem:[#allocation7 + $0x1c8] sm:$0xff] }
 0x1a8   : > { %v6429_v63 = vadd.f32 %v1251_v50, %v1250_v5  ;;  %v6514_v5 = vld [vmem:[#allocation7 + $0x1e8] sm:$0xff]  ;;  %v6516_v50 = vld [vmem:[#allocation7 + $0x1f8] sm:$0xff] }
 0x1aa   : > { %5223 = vtanh.f32 %v6429_v63 }
 0x1b7   : > { %v5224_v0 = vpop.eup %5223 }
 0x1b8   : > { %v6432_v10 = vmul.f32 %v5224_v0, %v1249_v58  ;;  %v6528_v58 = vld [vmem:[#allocation7 + $0x1d8] sm:$0xff]  ;;  %v6532_v0 = vld [vmem:[#allocation7 + $0x1c0] sm:$0xff] }
 0x1ba   : > { %8591 = vst [vmem:[#allocation73_spill] sm:$0xff] %v6432_v10  ;;  %1390 = vmatmul.mubr.f32.vlgmr.msra.gmra.mxu0 %v6432_v10  ;;  %1461 = vmatmul.mubr.f32.vlgmr.msra.gmra.mxu1 %v6432_v10  ;;  %v6684_v10 = vld [vmem:[#allocation7 + $0x20] sm:$0xff] }
 0x1bb   : > { %1561 = vmatpush1.msra.mxu0 %v6031_v17  ;;  %1632 = vmatpush1.msra.mxu1 %v6033_v18  ;;  %v8592_v17 = vld [vmem:[#allocation15_spill] sm:$0xff]  ;;  %v8593_v18 = vld [vmem:[#allocation16_spill] sm:$0xff] }
 0x1bc   : > { %1562 = vmatprep.subr.mxu0 %v6037_v19  ;;  %1633 = vmatprep.subr.mxu1 %v6039_v20  ;;  %v8594_v19 = vld [vmem:[#allocation17_spill] sm:$0xff]  ;;  %v8595_v20 = vld [vmem:[#allocation18_spill] sm:$0xff]  ;;  %8620 = vst [vmem:[#allocation16_spill] sm:$0xff] %v6514_v5 }
 0x1bd   : > { %1563 = vmatpush1.msra.mxu0 %v6042_v21  ;;  %1634 = vmatpush1.msra.mxu1 %v6044_v22  ;;  %v8596_v21 = vld [vmem:[#allocation19_spill] sm:$0xff]  ;;  %v8597_v22 = vld [vmem:[#allocation20_spill] sm:$0xff]  ;;  %8621 = vst [vmem:[#allocation17_spill] sm:$0xff] %v6516_v50 }
 0x1be   : > { %1564 = vmatprep.subr.mxu0 %v6048_v8  ;;  %1635 = vmatprep.subr.mxu1 %v6050_v23  ;;  %v8598_v8 = vld [vmem:[#allocation21_spill] sm:$0xff]  ;;  %v8599_v23 = vld [vmem:[#allocation22_spill] sm:$0xff] }
 0x1bf   : > { %1565 = vmatpush1.msra.mxu0 %v6054_v24  ;;  %1636 = vmatpush1.msra.mxu1 %v6056_v25  ;;  %v8600_v24 = vld [vmem:[#allocation23_spill] sm:$0xff]  ;;  %v8601_v25 = vld [vmem:[#allocation24_spill] sm:$0xff] }
 0x1c0   : > { %1566 = vmatprep.subr.mxu0 %v6060_v26  ;;  %1637 = vmatprep.subr.mxu1 %v6062_v27  ;;  %v8602_v26 = vld [vmem:[#allocation25_spill] sm:$0xff]  ;;  %v8603_v27 = vld [vmem:[#allocation26_spill] sm:$0xff] }
 0x1c1   : > { %1567 = vmatpush1.msra.mxu0 %v6066_v28  ;;  %1638 = vmatpush1.msra.mxu1 %v6068_v29  ;;  %v8604_v28 = vld [vmem:[#allocation27_spill] sm:$0xff]  ;;  %v8605_v29 = vld [vmem:[#allocation28_spill] sm:$0xff] }
 0x1c2   : > { %1568 = vmatprep.subr.mxu0 %v6072_v30  ;;  %1639 = vmatprep.subr.mxu1 %v6074_v31  ;;  %v8606_v30 = vld [vmem:[#allocation29_spill] sm:$0xff]  ;;  %v8607_v31 = vld [vmem:[#allocation30_spill] sm:$0xff] }
 0x1c3   : > { %1569 = vmatpush1.msra.mxu0 %v6078_v32  ;;  %1640 = vmatpush1.msra.mxu1 %v6080_v33  ;;  %v8608_v32 = vld [vmem:[#allocation31_spill] sm:$0xff]  ;;  %v8609_v33 = vld [vmem:[#allocation32_spill] sm:$0xff] }
 0x1c4   : > { %1570 = vmatprep.subr.mxu0 %v6084_v34  ;;  %1641 = vmatprep.subr.mxu1 %v6086_v35  ;;  %v8610_v34 = vld [vmem:[#allocation33_spill] sm:$0xff]  ;;  %v8611_v35 = vld [vmem:[#allocation34_spill] sm:$0xff] }
 0x1c5   : > { %1571 = vmatpush1.msra.mxu0 %v6090_v36  ;;  %1642 = vmatpush1.msra.mxu1 %v6092_v37  ;;  %v8612_v36 = vld [vmem:[#allocation35_spill] sm:$0xff]  ;;  %v8613_v37 = vmov 0.0   ;;  %8637 = vst [vmem:[#allocation33_spill] sm:$0xff] %v6684_v10  ;;  %8638 = vst [vmem:[#allocation34_spill] sm:$0xff] %v6686_v14 }
 0x1c6   : > { %1572 = vmatprep.subr.mxu0 %v6096_v38  ;;  %1643 = vmatprep.subr.mxu1 %v6098_v39  ;;  %v8614_v38 = vld [vmem:[#allocation36_spill] sm:$0xff]  ;;  %8639 = vst [vmem:[#allocation35_spill] sm:$0xff] %v6690_v12 }
 0x1c7   : > { %1573 = vmatpush1.msra.mxu0 %v6102_v40  ;;  %1644 = vmatpush1.msra.mxu1 %v6104_v41  ;;  %v8615_v40 = vld [vmem:[#allocation41_spill] sm:$0xff]  ;;  %8640 = vst [vmem:[#allocation36_spill] sm:$0xff] %v6692_v62 }
 0x1c8   : > { %1574 = vmatprep.subr.mxu0 %v6108_v42  ;;  %1645 = vmatprep.subr.mxu1 %v6110_v43 }
 0x1c9   : > { %1575 = vmatpush1.msra.mxu0 %v6114_v44  ;;  %1646 = vmatpush1.msra.mxu1 %v6116_v45  ;;  %v8616_v45 = vld [vmem:[#allocation42_spill] sm:$0xff] }
 0x1ca   : > { %1576 = vmatprep.subr.mxu0 %v6120_v46  ;;  %1647 = vmatprep.subr.mxu1 %v6122_v47  ;;  %v8617_v47 = vld [vmem:[#allocation43_spill] sm:$0xff] }
 0x1cb   : > { %1577 = vmatpush1.msra.mxu0 %v6126_v48  ;;  %1648 = vmatpush1.msra.mxu1 %v6130_v49 }
 0x1cc   : > { %1578 = vmatprep.subr.mxu0 %v6135_v51  ;;  %1649 = vmatprep.subr.mxu1 %v6137_v52  ;;  %v8618_v52 = vld [vmem:[#allocation44_spill] sm:$0xff] }
 0x1cd   : > { %1579 = vmatpush1.msra.mxu0 %v6141_v53  ;;  %1650 = vmatpush1.msra.mxu1 %v6144_v54 }
 0x1ce   : > { %1580 = vmatprep.subr.mxu0 %v6146_v55  ;;  %1651 = vmatprep.subr.mxu1 %v6150_v56 }
 0x1cf   : > { %1581 = vmatpush1.msra.mxu0 %v8592_v17  ;;  %1652 = vmatpush1.msra.mxu1 %v8593_v18  ;;  %v6534_v17 = vld [vmem:[#allocation7 + $0x1d0] sm:$0xff]  ;;  %v6538_v18 = vld [vmem:[#allocation7 + $0x1a8] sm:$0xff] }
 0x1d0   : > { %1582 = vmatprep.subr.mxu0 %v8594_v19  ;;  %1653 = vmatprep.subr.mxu1 %v8595_v20  ;;  %v6540_v19 = vld [vmem:[#allocation7 + $0x1b8] sm:$0xff]  ;;  %v6544_v20 = vld [vmem:[#allocation7 + $0x1a0] sm:$0xff] }
 0x1d1   : > { %1583 = vmatpush1.msra.mxu0 %v8596_v21  ;;  %1654 = vmatpush1.msra.mxu1 %v8597_v22  ;;  %v6546_v21 = vld [vmem:[#allocation7 + $0x1b0] sm:$0xff]  ;;  %v6550_v22 = vld [vmem:[#allocation7 + $0x188] sm:$0xff] }
 0x1d2   : > { %1584 = vmatprep.subr.mxu0 %v8598_v8  ;;  %1655 = vmatprep.subr.mxu1 %v8599_v23  ;;  %v6552_v8 = vld [vmem:[#allocation7 + $0x198] sm:$0xff]  ;;  %v6556_v23 = vld [vmem:[#allocation7 + $0x180] sm:$0xff] }
 0x1d3   : > { %1585 = vmatpush1.msra.mxu0 %v8600_v24  ;;  %1656 = vmatpush1.msra.mxu1 %v8601_v25  ;;  %v6558_v24 = vld [vmem:[#allocation7 + $0x190] sm:$0xff]  ;;  %v6562_v25 = vld [vmem:[#allocation7 + $0x168] sm:$0xff] }
 0x1d4   : > { %1586 = vmatprep.subr.mxu0 %v8602_v26  ;;  %1657 = vmatprep.subr.mxu1 %v8603_v27  ;;  %v6564_v26 = vld [vmem:[#allocation7 + $0x178] sm:$0xff]  ;;  %v6568_v27 = vld [vmem:[#allocation7 + $0x160] sm:$0xff] }
 0x1d5   : > { %1587 = vmatpush1.msra.mxu0 %v8604_v28  ;;  %1658 = vmatpush1.msra.mxu1 %v8605_v29  ;;  %v6570_v28 = vld [vmem:[#allocation7 + $0x170] sm:$0xff]  ;;  %v6574_v29 = vld [vmem:[#allocation7 + $0x148] sm:$0xff] }
 0x1d6   : > { %1588 = vmatprep.subr.mxu0 %v8606_v30  ;;  %1659 = vmatprep.subr.mxu1 %v8607_v31  ;;  %v6576_v30 = vld [vmem:[#allocation7 + $0x158] sm:$0xff]  ;;  %v6580_v31 = vld [vmem:[#allocation7 + $0x140] sm:$0xff] }
 0x1d7   : > { %1589 = vmatpush1.msra.mxu0 %v8608_v32  ;;  %1660 = vmatpush1.msra.mxu1 %v8609_v33  ;;  %v6582_v32 = vld [vmem:[#allocation7 + $0x150] sm:$0xff]  ;;  %v6586_v33 = vld [vmem:[#allocation7 + $0x128] sm:$0xff] }
 0x1d8   : > { %1590 = vmatprep.subr.mxu0 %v8610_v34  ;;  %1661 = vmatprep.subr.mxu1 %v8611_v35  ;;  %v6588_v34 = vld [vmem:[#allocation7 + $0x138] sm:$0xff]  ;;  %v6592_v35 = vld [vmem:[#allocation7 + $0x120] sm:$0xff] }
 0x1d9   : > { %1591 = vmatpush1.msra.mxu0 %v8612_v36  ;;  %1624 = vmatprep.mubr.f32.mxu0 %v8613_v37  ;;  %v6594_v36 = vld [vmem:[#allocation7 + $0x130] sm:$0xff] }
 0x1da   : > { %1662 = vmatpush1.msra.mxu1 %v8614_v38  ;;  %1695 = vmatprep.mubr.f32.mxu1 %v8613_v37  ;;  %v6598_v38 = vld [vmem:[#allocation7 + $0x108] sm:$0xff] }
 0x1db   : > { %1795 = vmatprep.subr.mxu0 %v6514_v5  ;;  %1866 = vmatprep.subr.mxu1 %v6516_v50 }
 0x27a   : > { %v1391_v39 = vpop.f32.mrf.mxu0  ;;  %v1462_v42 = vpop.f32.mrf.mxu1 }
 0x27b   : > { %v1467_v41 = vadd.f32 %v1391_v39, %v8615_v40  ;;  %v1469_v48 = vadd.f32 %v1462_v42, %v8617_v47  ;;  %v6600_v39 = vld [vmem:[#allocation7 + $0x118] sm:$0xff]  ;;  %v6604_v40 = vld [vmem:[#allocation7 + $0x100] sm:$0xff]  ;;  %v6610_v42 = vld [vmem:[#allocation7 + $0xe8] sm:$0xff] }
 0x27c   : > { %v1393_v43 = vpop.f32.mrf.mxu0  ;;  %v1464_v51 = vpop.f32.mrf.mxu1  ;;  %v6622_v47 = vld [vmem:[#allocation7 + $0xd8] sm:$0xff] }
 0x27d   : > { %v1471_v44 = vmul.f32 0.5, %v1467_v41  ;;  %v1468_v46 = vadd.f32 %v1393_v43, %v8616_v45  ;;  %v1470_v53 = vadd.f32 %v1464_v51, %v8618_v52  ;;  %v6606_v41 = vld [vmem:[#allocation7 + $0x110] sm:$0xff]  ;;  %v6612_v43 = vld [vmem:[#allocation7 + $0xf8] sm:$0xff]  ;;  %v6630_v51 = vld [vmem:[#allocation7 + $0xa8] sm:$0xff] }
 0x27e   : > { %v6618_v45 = vld [vmem:[#allocation7 + $0xf0] sm:$0xff]  ;;  %v6634_v52 = vld [vmem:[#allocation7 + $0xb8] sm:$0xff] }
 0x27f   : > { %5225 = vtanh.f32 %v1471_v44  ;;  %v1475_v49 = vmul.f32 0.5, %v1468_v46  ;;  %v1480_v54 = vmul.f32 0.5, %v1470_v53  ;;  %v6614_v44 = vld [vmem:[#allocation7 + $0xe0] sm:$0xff]  ;;  %v6620_v46 = vld [vmem:[#allocation7 + $0xc8] sm:$0xff] }
 0x280   : > { %v6636_v53 = vld [vmem:[#allocation7 + $0xa0] sm:$0xff] }
 0x281   : > { %5227 = vtanh.f32 %v1475_v49  ;;  %v6628_v49 = vld [vmem:[#allocation7 + $0xd0] sm:$0xff] }
 0x282   : > { %5229 = vtanh.f32 %v1469_v48  ;;  %v6626_v48 = vld [vmem:[#allocation7 + $0xc0] sm:$0xff] }
 0x283   : > { %5231 = vtanh.f32 %v1480_v54  ;;  %v6638_v54 = vld [vmem:[#allocation7 + $0xb0] sm:$0xff] }
 0x284   : > { %8622 = vst [vmem:[#allocation18_spill] sm:$0xff] %v6638_v54 }
 0x28c   : > { %v5226_v55 = vpop.eup %5225 }
 0x28d   : > { %v1473_v56 = vmul.f32 0.5, %v5226_v55  ;;  %v6642_v55 = vld [vmem:[#allocation7 + $0x88] sm:$0xff] }
 0x28e   : > { %v5228_v3 = vpop.eup %5227  ;;  %8623 = vst [vmem:[#allocation19_spill] sm:$0xff] %v6642_v55 }
 0x28f   : > { %v1474_v59 = vadd.f32 0.5, %v1473_v56  ;;  %v1477_v61 = vmul.f32 0.5, %v5228_v3  ;;  %v5230_v60 = vpop.eup %5229  ;;  %v6644_v56 = vld [vmem:[#allocation7 + $0x98] sm:$0xff]  ;;  %v6648_v3 = vld [vmem:[#allocation7 + $0x80] sm:$0xff] }
 0x290   : > { %v5232_v1 = vpop.eup %5231  ;;  %8624 = vst [vmem:[#allocation20_spill] sm:$0xff] %v6644_v56  ;;  %8625 = vst [vmem:[#allocation21_spill] sm:$0xff] %v6648_v3 }
 0x291   : > { %v1478_v11 = vadd.f32 0.5, %v1477_v61  ;;  %v1485_v15 = vmul.f32 %v5230_v60, %v1474_v59  ;;  %v1482_v6 = vmul.f32 0.5, %v5232_v1  ;;  %v6650_v59 = vld [vmem:[#allocation7 + $0x90] sm:$0xff]  ;;  %v6654_v61 = vld [vmem:[#allocation7 + $0x68] sm:$0xff]  ;;  %v6656_v60 = vld [vmem:[#allocation7 + $0x78] sm:$0xff] }
 0x292   : > { %8626 = vst [vmem:[#allocation22_spill] sm:$0xff] %v6650_v59  ;;  %8627 = vst [vmem:[#allocation23_spill] sm:$0xff] %v6654_v61  ;;  %v6668_v1 = vld [vmem:[#allocation7 + $0x58] sm:$0xff] }
 0x293   : > { %v1484_v7 = vmul.f32 %v1478_v11, %v6429_v63  ;;  %v1483_v13 = vadd.f32 0.5, %v1482_v6  ;;  %v6520_v63 = vld [vmem:[#allocation7 + $0x1e0] sm:$0xff]  ;;  %8628 = vst [vmem:[#allocation24_spill] sm:$0xff] %v6656_v60  ;;  %8632 = vst [vmem:[#allocation28_spill] sm:$0xff] %v6668_v1 }
 0x294   : > { %v6660_v11 = vld [vmem:[#allocation7 + $0x60] sm:$0xff] }
 0x295   : > { %v6505_v9 = vadd.f32 %v1485_v15, %v1484_v7  ;;  %8629 = vst [vmem:[#allocation25_spill] sm:$0xff] %v6660_v11  ;;  %v6662_v15 = vld [vmem:[#allocation7 + $0x70] sm:$0xff]  ;;  %v6666_v7 = vld [vmem:[#allocation7 + $0x48] sm:$0xff]  ;;  %v6672_v6 = vld [vmem:[#allocation7 + $0x40] sm:$0xff] }
 0x296   : > { %8630 = vst [vmem:[#allocation26_spill] sm:$0xff] %v6662_v15  ;;  %8631 = vst [vmem:[#allocation27_spill] sm:$0xff] %v6666_v7 }
 0x297   : > { %5233 = vtanh.f32 %v6505_v9  ;;  %8633 = vst [vmem:[#allocation29_spill] sm:$0xff] %v6672_v6 }
 0x2a4   : > { %v5234_v57 = vpop.eup %5233 }
 0x2a5   : > { %v6508_v16 = vmul.f32 %v5234_v57, %v1483_v13  ;;  %v6674_v13 = vld [vmem:[#allocation7 + $0x50] sm:$0xff]  ;;  %v6678_v57 = vld [vmem:[#allocation7 + $0x28] sm:$0xff] }
 0x2a6   : > { %8634 = vst [vmem:[#allocation30_spill] sm:$0xff] %v6674_v13  ;;  %8635 = vst [vmem:[#allocation31_spill] sm:$0xff] %v6678_v57 }
 0x2a7   : > { %8619 = vst [vmem:[#allocation15_spill] sm:$0xff] %v6508_v16  ;;  %1625 = vmatmul.mubr.f32.vlgmr.msra.gmra.mxu0 %v6508_v16  ;;  %1696 = vmatmul.mubr.f32.vlgmr.msra.gmra.mxu1 %v6508_v16  ;;  %v6680_v16 = vld [vmem:[#allocation7 + $0x38] sm:$0xff] }
 0x2a8   : > { %1859 = vmatprep.mubr.f32.mxu0 %v8613_v37  ;;  %1930 = vmatprep.mubr.f32.mxu1 %v8613_v37  ;;  %8636 = vst [vmem:[#allocation32_spill] sm:$0xff] %v6680_v16  ;;  %v6696_v37 = vld [vmem:[#allocation7] sm:$0xff] }
 0x2a9   : > { %1796 = vmatpush1.msra.mxu0 %v6520_v63  ;;  %1867 = vmatpush1.msra.mxu1 %v6522_v4  ;;  %8641 = vst [vmem:[#allocation41_spill] sm:$0xff] %v6696_v37 }
 0x2aa   : > { %1797 = vmatprep.subr.mxu0 %v6526_v2  ;;  %1868 = vmatprep.subr.mxu1 %v6528_v58 }
 0x2ab   : > { %1798 = vmatpush1.msra.mxu0 %v6532_v0  ;;  %1869 = vmatpush1.msra.mxu1 %v6534_v17 }
 0x2ac   : > { %1799 = vmatprep.subr.mxu0 %v6538_v18  ;;  %1870 = vmatprep.subr.mxu1 %v6540_v19 }
 0x2ad   : > { %1800 = vmatpush1.msra.mxu0 %v6544_v20  ;;  %1871 = vmatpush1.msra.mxu1 %v6546_v21 }
 0x2ae   : > { %1801 = vmatprep.subr.mxu0 %v6550_v22  ;;  %1872 = vmatprep.subr.mxu1 %v6552_v8 }
 0x2af   : > { %1802 = vmatpush1.msra.mxu0 %v6556_v23  ;;  %1873 = vmatpush1.msra.mxu1 %v6558_v24 }
 0x2b0   : > { %1803 = vmatprep.subr.mxu0 %v6562_v25  ;;  %1874 = vmatprep.subr.mxu1 %v6564_v26 }
 0x2b1   : > { %1804 = vmatpush1.msra.mxu0 %v6568_v27  ;;  %1875 = vmatpush1.msra.mxu1 %v6570_v28 }
 0x2b2   : > { %1805 = vmatprep.subr.mxu0 %v6574_v29  ;;  %1876 = vmatprep.subr.mxu1 %v6576_v30 }
 0x2b3   : > { %1806 = vmatpush1.msra.mxu0 %v6580_v31  ;;  %1877 = vmatpush1.msra.mxu1 %v6582_v32 }
 0x2b4   : > { %1807 = vmatprep.subr.mxu0 %v6586_v33  ;;  %1878 = vmatprep.subr.mxu1 %v6588_v34 }
 0x2b5   : > { %1808 = vmatpush1.msra.mxu0 %v6592_v35  ;;  %1879 = vmatpush1.msra.mxu1 %v6594_v36 }
 0x2b6   : > { %1809 = vmatprep.subr.mxu0 %v6598_v38  ;;  %1880 = vmatprep.subr.mxu1 %v6600_v39 }
 0x2b7   : > { %1810 = vmatpush1.msra.mxu0 %v6604_v40  ;;  %1881 = vmatpush1.msra.mxu1 %v6606_v41 }
 0x2b8   : > { %1811 = vmatprep.subr.mxu0 %v6610_v42  ;;  %1882 = vmatprep.subr.mxu1 %v6612_v43 }
 0x2b9   : > { %1812 = vmatpush1.msra.mxu0 %v6614_v44  ;;  %1883 = vmatpush1.msra.mxu1 %v6618_v45 }
 0x2ba   : > { %1813 = vmatprep.subr.mxu0 %v6620_v46  ;;  %1884 = vmatprep.subr.mxu1 %v6622_v47 }
 0x2bb   : > { %1814 = vmatpush1.msra.mxu0 %v6626_v48  ;;  %1885 = vmatpush1.msra.mxu1 %v6628_v49 }
 0x2bc   : > { %1815 = vmatprep.subr.mxu0 %v6630_v51  ;;  %1886 = vmatprep.subr.mxu1 %v6634_v52 }
 0x2bd   : > { %1816 = vmatpush1.msra.mxu0 %v6636_v53  ;;  %1887 = vmatpush1.msra.mxu1 %v6638_v54 }
 0x2be   : > { %1817 = vmatprep.subr.mxu0 %v6642_v55  ;;  %1888 = vmatprep.subr.mxu1 %v6644_v56 }
 0x2bf   : > { %1818 = vmatpush1.msra.mxu0 %v6648_v3  ;;  %1889 = vmatpush1.msra.mxu1 %v6650_v59 }
 0x2c0   : > { %1819 = vmatprep.subr.mxu0 %v6654_v61  ;;  %1890 = vmatprep.subr.mxu1 %v6656_v60 }
 0x2c1   : > { %1820 = vmatpush1.msra.mxu0 %v6660_v11  ;;  %1891 = vmatpush1.msra.mxu1 %v6662_v15  ;;  %v8644_v15 = vld [vmem:[#allocation46_spill] sm:$0xff] }
 0x2c2   : > { %1821 = vmatprep.subr.mxu0 %v6666_v7  ;;  %1892 = vmatprep.subr.mxu1 %v6668_v1  ;;  %v6698_v7 = vld [vmem:[#allocation7 + $0x10] sm:$0xff] }
 0x2c3   : > { %1822 = vmatpush1.msra.mxu0 %v6672_v6  ;;  %1893 = vmatpush1.msra.mxu1 %v6674_v13  ;;  %8642 = vst [vmem:[#allocation42_spill] sm:$0xff] %v6698_v7 }
 0x2c4   : > { %1823 = vmatprep.subr.mxu0 %v6678_v57  ;;  %1894 = vmatprep.subr.mxu1 %v6680_v16  ;;  %v8643_v57 = vld [vmem:[#allocation45_spill] sm:$0xff] }
 0x2c5   : > { %1824 = vmatpush1.msra.mxu0 %v6684_v10  ;;  %1895 = vmatpush1.msra.mxu1 %v6686_v14 }
 0x2c6   : > { %1825 = vmatprep.subr.mxu0 %v6690_v12  ;;  %1896 = vmatprep.subr.mxu1 %v6692_v62  ;;  %v8645_v12 = vld [vmem:[#allocation47_spill] sm:$0xff] }
 0x2c7   : > { %1826 = vmatpush1.msra.mxu0 %v6696_v37  ;;  %1897 = vmatpush1.msra.mxu1 %v6698_v7  ;;  %v8646_v7 = vld [vmem:[#allocation48_spill] sm:$0xff] }
 0x2c8   : > { %2029 = vmatprep.subr.mxu0 %v6514_v5  ;;  %2100 = vmatprep.subr.mxu1 %v6516_v50 }
 0x367   : > { %v1626_v16 = vpop.f32.mrf.mxu0  ;;  %v1697_v6 = vpop.f32.mrf.mxu1 }
 0x368   : > { %v1702_v13 = vadd.f32 %v1626_v16, %v8643_v57  ;;  %v1704_v11 = vadd.f32 %v1697_v6, %v8645_v12  ;;  %v8658_v6 = vld [vmem:[#allocation30_spill] sm:$0xff] }
 0x369   : > { %v1628_v1 = vpop.f32.mrf.mxu0  ;;  %v1699_v37 = vpop.f32.mrf.mxu1 }
 0x36a   : > { %v1706_v10 = vmul.f32 0.5, %v1702_v13  ;;  %v1703_v14 = vadd.f32 %v1628_v1, %v8644_v15  ;;  %v1705_v60 = vadd.f32 %v1699_v37, %v8646_v7  ;;  %v8656_v7 = vld [vmem:[#allocation28_spill] sm:$0xff]  ;;  %v8657_v1 = vld [vmem:[#allocation29_spill] sm:$0xff] }
 0x36c   : > { %5235 = vtanh.f32 %v1706_v10  ;;  %v1710_v62 = vmul.f32 0.5, %v1703_v14  ;;  %v1715_v5 = vmul.f32 0.5, %v1705_v60 }
 0x36e   : > { %5237 = vtanh.f32 %v1710_v62 }
 0x36f   : > { %5239 = vtanh.f32 %v1704_v11  ;;  %v8655_v11 = vld [vmem:[#allocation27_spill] sm:$0xff] }
 0x370   : > { %5241 = vtanh.f32 %v1715_v5  ;;  %v8649_v5 = vld [vmem:[#allocation21_spill] sm:$0xff] }
 0x379   : > { %v5236_v61 = vpop.eup %5235 }
 0x37a   : > { %v1708_v50 = vmul.f32 0.5, %v5236_v61  ;;  %v8654_v61 = vld [vmem:[#allocation26_spill] sm:$0xff] }
 0x37b   : > { %v5238_v59 = vpop.eup %5237 }
 0x37c   : > { %v1709_v3 = vadd.f32 0.5, %v1708_v50  ;;  %v1712_v16 = vmul.f32 0.5, %v5238_v59  ;;  %v5240_v57 = vpop.eup %5239  ;;  %v8650_v50 = vld [vmem:[#allocation22_spill] sm:$0xff]  ;;  %v8653_v59 = vld [vmem:[#allocation25_spill] sm:$0xff] }
 0x37d   : > { %v5242_v14 = vpop.eup %5241 }
 0x37e   : > { %v1713_v13 = vadd.f32 0.5, %v1712_v16  ;;  %v1720_v56 = vmul.f32 %v5240_v57, %v1709_v3  ;;  %v1717_v12 = vmul.f32 0.5, %v5242_v14  ;;  %v8652_v3 = vld [vmem:[#allocation24_spill] sm:$0xff]  ;;  %v8659_v16 = vld [vmem:[#allocation31_spill] sm:$0xff] }
 0x37f   : > { %v8660_v57 = vld [vmem:[#allocation32_spill] sm:$0xff]  ;;  %v8663_v14 = vld [vmem:[#allocation35_spill] sm:$0xff] }
 0x380   : > { %v1719_v10 = vmul.f32 %v1713_v13, %v6505_v9  ;;  %v1718_v62 = vadd.f32 0.5, %v1717_v12  ;;  %v8648_v9 = vld [vmem:[#allocation20_spill] sm:$0xff]  ;;  %v8661_v13 = vld [vmem:[#allocation33_spill] sm:$0xff] }
 0x381   : > { %v8664_v12 = vld [vmem:[#allocation36_spill] sm:$0xff] }
 0x382   : > { %v6713_v15 = vadd.f32 %v1720_v56, %v1719_v10  ;;  %v8651_v56 = vld [vmem:[#allocation23_spill] sm:$0xff]  ;;  %v8662_v10 = vld [vmem:[#allocation34_spill] sm:$0xff] }
 0x384   : > { %5243 = vtanh.f32 %v6713_v15 }
 0x391   : > { %v5244_v37 = vpop.eup %5243 }
 0x392   : > { %v6716_v60 = vmul.f32 %v5244_v37, %v1718_v62  ;;  %v8665_v62 = vld [vmem:[#allocation41_spill] sm:$0xff]  ;;  %v8666_v37 = vmov 0.0  }
 0x394   : > { %8647 = vst [vmem:[#allocation43_spill] sm:$0xff] %v6716_v60  ;;  %1860 = vmatmul.mubr.f32.vlgmr.msra.gmra.mxu0 %v6716_v60  ;;  %1931 = vmatmul.mubr.f32.vlgmr.msra.gmra.mxu1 %v6716_v60  ;;  %v8667_v60 = vld [vmem:[#allocation42_spill] sm:$0xff] }
 0x395   : > { %2030 = vmatpush1.msra.mxu0 %v6520_v63  ;;  %2101 = vmatpush1.msra.mxu1 %v6522_v4 }
 0x396   : > { %2031 = vmatprep.subr.mxu0 %v6526_v2  ;;  %2102 = vmatprep.subr.mxu1 %v6528_v58 }
 0x397   : > { %2032 = vmatpush1.msra.mxu0 %v6532_v0  ;;  %2103 = vmatpush1.msra.mxu1 %v6534_v17 }
 0x398   : > { %2033 = vmatprep.subr.mxu0 %v6538_v18  ;;  %2104 = vmatprep.subr.mxu1 %v6540_v19 }
 0x399   : > { %2034 = vmatpush1.msra.mxu0 %v6544_v20  ;;  %2105 = vmatpush1.msra.mxu1 %v6546_v21 }
 0x39a   : > { %2035 = vmatprep.subr.mxu0 %v6550_v22  ;;  %2106 = vmatprep.subr.mxu1 %v6552_v8 }
 0x39b   : > { %2036 = vmatpush1.msra.mxu0 %v6556_v23  ;;  %2107 = vmatpush1.msra.mxu1 %v6558_v24 }
 0x39c   : > { %2037 = vmatprep.subr.mxu0 %v6562_v25  ;;  %2108 = vmatprep.subr.mxu1 %v6564_v26 }
 0x39d   : > { %2038 = vmatpush1.msra.mxu0 %v6568_v27  ;;  %2109 = vmatpush1.msra.mxu1 %v6570_v28 }
 0x39e   : > { %2039 = vmatprep.subr.mxu0 %v6574_v29  ;;  %2110 = vmatprep.subr.mxu1 %v6576_v30 }
 0x39f   : > { %2040 = vmatpush1.msra.mxu0 %v6580_v31  ;;  %2111 = vmatpush1.msra.mxu1 %v6582_v32 }
 0x3a0   : > { %2041 = vmatprep.subr.mxu0 %v6586_v33  ;;  %2112 = vmatprep.subr.mxu1 %v6588_v34 }
 0x3a1   : > { %2042 = vmatpush1.msra.mxu0 %v6592_v35  ;;  %2113 = vmatpush1.msra.mxu1 %v6594_v36 }
 0x3a2   : > { %2043 = vmatprep.subr.mxu0 %v6598_v38  ;;  %2114 = vmatprep.subr.mxu1 %v6600_v39 }
 0x3a3   : > { %2044 = vmatpush1.msra.mxu0 %v6604_v40  ;;  %2115 = vmatpush1.msra.mxu1 %v6606_v41 }
 0x3a4   : > { %2045 = vmatprep.subr.mxu0 %v6610_v42  ;;  %2116 = vmatprep.subr.mxu1 %v6612_v43 }
 0x3a5   : > { %2046 = vmatpush1.msra.mxu0 %v6614_v44  ;;  %2117 = vmatpush1.msra.mxu1 %v6618_v45 }
 0x3a6   : > { %2047 = vmatprep.subr.mxu0 %v6620_v46  ;;  %2118 = vmatprep.subr.mxu1 %v6622_v47 }
 0x3a7   : > { %2048 = vmatpush1.msra.mxu0 %v6626_v48  ;;  %2119 = vmatpush1.msra.mxu1 %v6628_v49 }
 0x3a8   : > { %2049 = vmatprep.subr.mxu0 %v6630_v51  ;;  %2120 = vmatprep.subr.mxu1 %v6634_v52 }
 0x3a9   : > { %2050 = vmatpush1.msra.mxu0 %v6636_v53  ;;  %2121 = vmatpush1.msra.mxu1 %v6638_v54 }
 0x3aa   : > { %2051 = vmatprep.subr.mxu0 %v6642_v55  ;;  %2122 = vmatprep.subr.mxu1 %v8648_v9 }
 0x3ab   : > { %2052 = vmatpush1.msra.mxu0 %v8649_v5  ;;  %2123 = vmatpush1.msra.mxu1 %v8650_v50 }
 0x3ac   : > { %2053 = vmatprep.subr.mxu0 %v8651_v56  ;;  %2124 = vmatprep.subr.mxu1 %v8652_v3 }
 0x3ad   : > { %2054 = vmatpush1.msra.mxu0 %v8653_v59  ;;  %2125 = vmatpush1.msra.mxu1 %v8654_v61 }
 0x3ae   : > { %2055 = vmatprep.subr.mxu0 %v8655_v11  ;;  %2126 = vmatprep.subr.mxu1 %v8656_v7  ;;  %v8671_v11 = vld [vmem:[#allocation50_spill] sm:$0xff] }
 0x3af   : > { %2056 = vmatpush1.msra.mxu0 %v8657_v1  ;;  %2127 = vmatpush1.msra.mxu1 %v8658_v6  ;;  %v8668_v6 = vld [vmem:[#allocation16_spill] sm:$0xff] }
 0x3b0   : > { %2057 = vmatprep.subr.mxu0 %v8659_v16  ;;  %2128 = vmatprep.subr.mxu1 %v8660_v57  ;;  %v8669_v16 = vld [vmem:[#allocation17_spill] sm:$0xff] }
 0x3b1   : > { %2058 = vmatpush1.msra.mxu0 %v8661_v13  ;;  %2129 = vmatpush1.msra.mxu1 %v8662_v10  ;;  %v8670_v13 = vld [vmem:[#allocation49_spill] sm:$0xff] }
 0x3b2   : > { %2059 = vmatprep.subr.mxu0 %v8663_v14  ;;  %2130 = vmatprep.subr.mxu1 %v8664_v12 }
 0x3b3   : > { %2060 = vmatpush1.msra.mxu0 %v8665_v62  ;;  %2093 = vmatprep.mubr.f32.mxu0 %v8666_v37  ;;  %v8672_v62 = vld [vmem:[#allocation51_spill] sm:$0xff] }
 0x3b4   : > { %2131 = vmatpush1.msra.mxu1 %v8667_v60  ;;  %2164 = vmatprep.mubr.f32.mxu1 %v8666_v37  ;;  %v8673_v37 = vld [vmem:[#allocation52_spill] sm:$0xff] }
 0x3b5   : > { %2264 = vmatprep.subr.mxu0 %v8668_v6  ;;  %2335 = vmatprep.subr.mxu1 %v8669_v16 }
 0x454   : > { %v1861_v57 = vpop.f32.mrf.mxu0  ;;  %v1932_v10 = vpop.f32.mrf.mxu1 }
 0x455   : > { %v1937_v1 = vadd.f32 %v1861_v57, %v8670_v13  ;;  %v1939_v61 = vadd.f32 %v1932_v10, %v8672_v62  ;;  %v8684_v62 = vld [vmem:[#allocation29_spill] sm:$0xff] }
 0x456   : > { %v1863_v7 = vpop.f32.mrf.mxu0  ;;  %v1934_v60 = vpop.f32.mrf.mxu1 }
 0x457   : > { %v1941_v14 = vmul.f32 0.5, %v1937_v1  ;;  %v1938_v12 = vadd.f32 %v1863_v7, %v8671_v11  ;;  %v1940_v3 = vadd.f32 %v1934_v60, %v8673_v37  ;;  %v8685_v37 = vld [vmem:[#allocation30_spill] sm:$0xff] }
 0x459   : > { %5245 = vtanh.f32 %v1941_v14  ;;  %v1945_v59 = vmul.f32 0.5, %v1938_v12  ;;  %v1950_v6 = vmul.f32 0.5, %v1940_v3  ;;  %v8682_v14 = vld [vmem:[#allocation27_spill] sm:$0xff]  ;;  %v8683_v12 = vld [vmem:[#allocation28_spill] sm:$0xff] }
 0x45b   : > { %5247 = vtanh.f32 %v1945_v59 }
 0x45c   : > { %5249 = vtanh.f32 %v1939_v61 }
 0x45d   : > { %5251 = vtanh.f32 %v1950_v6  ;;  %v8680_v6 = vld [vmem:[#allocation25_spill] sm:$0xff] }
 0x466   : > { %v5246_v56 = vpop.eup %5245 }
 0x467   : > { %v1943_v16 = vmul.f32 0.5, %v5246_v56  ;;  %v8679_v56 = vld [vmem:[#allocation24_spill] sm:$0xff] }
 0x468   : > { %v5248_v50 = vpop.eup %5247 }
 0x469   : > { %v1944_v5 = vadd.f32 0.5, %v1943_v16  ;;  %v1947_v57 = vmul.f32 0.5, %v5248_v50  ;;  %v5250_v13 = vpop.eup %5249  ;;  %v8678_v50 = vld [vmem:[#allocation23_spill] sm:$0xff]  ;;  %v8681_v16 = vld [vmem:[#allocation26_spill] sm:$0xff] }
 0x46a   : > { %v5252_v59 = vpop.eup %5251 }
 0x46b   : > { %v1948_v1 = vadd.f32 0.5, %v1947_v57  ;;  %v1955_v9 = vmul.f32 %v5250_v13, %v1944_v5  ;;  %v1952_v61 = vmul.f32 0.5, %v5252_v59  ;;  %v8677_v5 = vld [vmem:[#allocation22_spill] sm:$0xff]  ;;  %v8686_v57 = vld [vmem:[#allocation31_spill] sm:$0xff]  ;;  %v8687_v13 = vld [vmem:[#allocation32_spill] sm:$0xff] }
 0x46c   : > { %v8690_v59 = vld [vmem:[#allocation35_spill] sm:$0xff] }
 0x46d   : > { %v1954_v11 = vmul.f32 %v1948_v1, %v6713_v15  ;;  %v1953_v10 = vadd.f32 0.5, %v1952_v61  ;;  %v8675_v15 = vld [vmem:[#allocation20_spill] sm:$0xff]  ;;  %v8688_v1 = vld [vmem:[#allocation33_spill] sm:$0xff] }
 0x46e   : > { %v8691_v61 = vld [vmem:[#allocation36_spill] sm:$0xff] }
 0x46f   : > { %v6791_v7 = vadd.f32 %v1955_v9, %v1954_v11  ;;  %v8676_v9 = vld [vmem:[#allocation21_spill] sm:$0xff]  ;;  %v8689_v11 = vld [vmem:[#allocation34_spill] sm:$0xff] }
 0x471   : > { %5253 = vtanh.f32 %v6791_v7 }
 0x47e   : > { %v5254_v60 = vpop.eup %5253 }
 0x47f   : > { %v6794_v3 = vmul.f32 %v5254_v60, %v1953_v10  ;;  %v8692_v10 = vld [vmem:[#allocation41_spill] sm:$0xff]  ;;  %v8693_v60 = vmov 0.0  }
 0x481   : > { %8674 = vst [vmem:[#allocation44_spill] sm:$0xff] %v6794_v3  ;;  %2094 = vmatmul.mubr.f32.vlgmr.msra.gmra.mxu0 %v6794_v3  ;;  %2165 = vmatmul.mubr.f32.vlgmr.msra.gmra.mxu1 %v6794_v3  ;;  %v8694_v3 = vld [vmem:[#allocation42_spill] sm:$0xff] }
 0x482   : > { %2265 = vmatpush1.msra.mxu0 %v6520_v63  ;;  %2336 = vmatpush1.msra.mxu1 %v6522_v4 }
 0x483   : > { %2266 = vmatprep.subr.mxu0 %v6526_v2  ;;  %2337 = vmatprep.subr.mxu1 %v6528_v58 }
 0x484   : > { %2267 = vmatpush1.msra.mxu0 %v6532_v0  ;;  %2338 = vmatpush1.msra.mxu1 %v6534_v17 }
 0x485   : > { %2268 = vmatprep.subr.mxu0 %v6538_v18  ;;  %2339 = vmatprep.subr.mxu1 %v6540_v19 }
 0x486   : > { %2269 = vmatpush1.msra.mxu0 %v6544_v20  ;;  %2340 = vmatpush1.msra.mxu1 %v6546_v21 }
 0x487   : > { %2270 = vmatprep.subr.mxu0 %v6550_v22  ;;  %2341 = vmatprep.subr.mxu1 %v6552_v8 }
 0x488   : > { %2271 = vmatpush1.msra.mxu0 %v6556_v23  ;;  %2342 = vmatpush1.msra.mxu1 %v6558_v24 }
 0x489   : > { %2272 = vmatprep.subr.mxu0 %v6562_v25  ;;  %2343 = vmatprep.subr.mxu1 %v6564_v26 }
 0x48a   : > { %2273 = vmatpush1.msra.mxu0 %v6568_v27  ;;  %2344 = vmatpush1.msra.mxu1 %v6570_v28 }
 0x48b   : > { %2274 = vmatprep.subr.mxu0 %v6574_v29  ;;  %2345 = vmatprep.subr.mxu1 %v6576_v30 }
 0x48c   : > { %2275 = vmatpush1.msra.mxu0 %v6580_v31  ;;  %2346 = vmatpush1.msra.mxu1 %v6582_v32 }
 0x48d   : > { %2276 = vmatprep.subr.mxu0 %v6586_v33  ;;  %2347 = vmatprep.subr.mxu1 %v6588_v34 }
 0x48e   : > { %2277 = vmatpush1.msra.mxu0 %v6592_v35  ;;  %2348 = vmatpush1.msra.mxu1 %v6594_v36 }
 0x48f   : > { %2278 = vmatprep.subr.mxu0 %v6598_v38  ;;  %2349 = vmatprep.subr.mxu1 %v6600_v39 }
 0x490   : > { %2279 = vmatpush1.msra.mxu0 %v6604_v40  ;;  %2350 = vmatpush1.msra.mxu1 %v6606_v41 }
 0x491   : > { %2280 = vmatprep.subr.mxu0 %v6610_v42  ;;  %2351 = vmatprep.subr.mxu1 %v6612_v43 }
 0x492   : > { %2281 = vmatpush1.msra.mxu0 %v6614_v44  ;;  %2352 = vmatpush1.msra.mxu1 %v6618_v45 }
 0x493   : > { %2282 = vmatprep.subr.mxu0 %v6620_v46  ;;  %2353 = vmatprep.subr.mxu1 %v6622_v47 }
 0x494   : > { %2283 = vmatpush1.msra.mxu0 %v6626_v48  ;;  %2354 = vmatpush1.msra.mxu1 %v6628_v49 }
 0x495   : > { %2284 = vmatprep.subr.mxu0 %v6630_v51  ;;  %2355 = vmatprep.subr.mxu1 %v6634_v52 }
 0x496   : > { %2285 = vmatpush1.msra.mxu0 %v6636_v53  ;;  %2356 = vmatpush1.msra.mxu1 %v6638_v54 }
 0x497   : > { %2286 = vmatprep.subr.mxu0 %v6642_v55  ;;  %2357 = vmatprep.subr.mxu1 %v8675_v15 }
 0x498   : > { %2287 = vmatpush1.msra.mxu0 %v8676_v9  ;;  %2358 = vmatpush1.msra.mxu1 %v8677_v5  ;;  %v8703_v9 = vld [vmem:[#allocation62_spill] sm:$0xff] }
 0x499   : > { %2288 = vmatprep.subr.mxu0 %v8678_v50  ;;  %2359 = vmatprep.subr.mxu1 %v8679_v56  ;;  %v8702_v56 = vld [vmem:[#allocation55_spill] sm:$0xff] }
 0x49a   : > { %2289 = vmatpush1.msra.mxu0 %v8680_v6  ;;  %2360 = vmatpush1.msra.mxu1 %v8681_v16  ;;  %v8701_v6 = vld [vmem:[#allocation60_spill] sm:$0xff] }
 0x49b   : > { %2290 = vmatprep.subr.mxu0 %v8682_v14  ;;  %2361 = vmatprep.subr.mxu1 %v8683_v12  ;;  %v8699_v12 = vld [vmem:[#allocation57_spill] sm:$0xff]  ;;  %v984_v50 = vadd.f32 %v8702_v56, %v8701_v6 }
 0x49c   : > { %2291 = vmatpush1.msra.mxu0 %v8684_v62  ;;  %2362 = vmatpush1.msra.mxu1 %v8685_v37  ;;  %v8695_v37 = vld [vmem:[#allocation16_spill] sm:$0xff] }
 0x49d   : > { %2292 = vmatprep.subr.mxu0 %v8686_v57  ;;  %2363 = vmatprep.subr.mxu1 %v8687_v13  ;;  %v8696_v57 = vld [vmem:[#allocation17_spill] sm:$0xff]  ;;  %v8697_v13 = vld [vmem:[#allocation56_spill] sm:$0xff] }
 0x49e   : > { %2293 = vmatpush1.msra.mxu0 %v8688_v1  ;;  %2364 = vmatpush1.msra.mxu1 %v8689_v11  ;;  %v8698_v1 = vld [vmem:[#allocation53_spill] sm:$0xff] }
 0x49f   : > { %2294 = vmatprep.subr.mxu0 %v8690_v59  ;;  %2365 = vmatprep.subr.mxu1 %v8691_v61  ;;  %v895_v62 = vadd.f32 %v8698_v1, %v8697_v13  ;;  %v8700_v59 = vld [vmem:[#allocation54_spill] sm:$0xff]  ;;  %v8704_v13 = vld [vmem:[#allocation59_spill] sm:$0xff] }
 0x4a0   : > { %2295 = vmatpush1.msra.mxu0 %v8692_v10  ;;  %2328 = vmatprep.mubr.f32.mxu0 %v8693_v60  ;;  %v897_v14 = vadd.f32 %v8700_v59, %v8699_v12  ;;  %v986_v1 = vadd.f32 %v8704_v13, %v8703_v9 }
 0x4a1   : > { %2366 = vmatpush1.msra.mxu1 %v8694_v3  ;;  %2399 = vmatprep.mubr.f32.mxu1 %v8693_v60 }
 0x4a2   : > { %2499 = vmatprep.subr.mxu0 %v8695_v37  ;;  %2570 = vmatprep.subr.mxu1 %v8696_v57 }
 0x541   : > { %v2095_v11 = vpop.f32.mrf.mxu0  ;;  %v2166_v16 = vpop.f32.mrf.mxu1 }
 0x542   : > { %v2171_v61 = vadd.f32 %v2095_v11, %v895_v62  ;;  %v2173_v60 = vadd.f32 %v2166_v16, %v984_v50 }
 0x543   : > { %v2097_v10 = vpop.f32.mrf.mxu0  ;;  %v2168_v57 = vpop.f32.mrf.mxu1 }
 0x544   : > { %v2175_v3 = vmul.f32 0.5, %v2171_v61  ;;  %v2172_v5 = vadd.f32 %v2097_v10, %v897_v14  ;;  %v2174_v15 = vadd.f32 %v2168_v57, %v986_v1 }
 0x546   : > { %5255 = vtanh.f32 %v2175_v3  ;;  %v2179_v37 = vmul.f32 0.5, %v2172_v5  ;;  %v2184_v55 = vmul.f32 0.5, %v2174_v15 }
 0x548   : > { %5257 = vtanh.f32 %v2179_v37 }
 0x549   : > { %5259 = vtanh.f32 %v2173_v60 }
 0x54a   : > { %5261 = vtanh.f32 %v2184_v55 }
 0x553   : > { %v5256_v12 = vpop.eup %5255 }
 0x554   : > { %v2177_v62 = vmul.f32 0.5, %v5256_v12 }
 0x555   : > { %v5258_v11 = vpop.eup %5257 }
 0x556   : > { %v2178_v59 = vadd.f32 0.5, %v2177_v62  ;;  %v2181_v54 = vmul.f32 0.5, %v5258_v11  ;;  %v5260_v56 = vpop.eup %5259  ;;  %v2731_v11 = vld [vmem:[#allocation7 + $0x1e8] sm:$0xff] }
 0x557   : > { %v5262_v50 = vpop.eup %5261 }
 0x558   : > { %v2182_v6 = vadd.f32 0.5, %v2181_v54  ;;  %v2189_v14 = vmul.f32 %v5260_v56, %v2178_v59  ;;  %v2186_v16 = vmul.f32 0.5, %v5262_v50  ;;  %v2733_v59 = vld [vmem:[#allocation7 + $0x1f8] sm:$0xff]  ;;  %v2730_v56 = vld [vmem:[#allocation7 + $0x1e0] sm:$0xff]  ;;  %v2728_v50 = vld [vmem:[#allocation7 + $0x1d0] sm:$0xff] }
 0x55a   : > { %v2188_v3 = vmul.f32 %v2182_v6, %v6791_v7  ;;  %v2187_v9 = vadd.f32 0.5, %v2186_v16  ;;  %v2732_v6 = vld [vmem:[#allocation7 + $0x1f0] sm:$0xff]  ;;  %v2723_v16 = vld [vmem:[#allocation7 + $0x1a8] sm:$0xff] }
 0x55c   : > { %v6873_v5 = vadd.f32 %v2189_v14, %v2188_v3  ;;  %v2727_v14 = vld [vmem:[#allocation7 + $0x1c8] sm:$0xff]  ;;  %v2729_v3 = vld [vmem:[#allocation7 + $0x1d8] sm:$0xff] }
 0x55e   : > { %5263 = vtanh.f32 %v6873_v5 }
 0x56b   : > { %v5264_v61 = vpop.eup %5263 }
 0x56c   : > { %v6876_v15 = vmul.f32 %v5264_v61, %v2187_v9  ;;  %v2725_v9 = vld [vmem:[#allocation7 + $0x1b8] sm:$0xff]  ;;  %v2722_v61 = vld [vmem:[#allocation7 + $0x1a0] sm:$0xff] }
 0x56e   : > { %8705 = vst [vmem:[#allocation45_spill] sm:$0xff] %v6876_v15  ;;  %2329 = vmatmul.mubr.f32.vlgmr.msra.gmra.mxu0 %v6876_v15  ;;  %2400 = vmatmul.mubr.f32.vlgmr.msra.gmra.mxu1 %v6876_v15  ;;  %v7152_v15 = vld [vmem:[#allocation9] sm:$0xff] }
 0x56f   : > { %2500 = vmatpush1.msra.mxu0 %v6520_v63  ;;  %2571 = vmatpush1.msra.mxu1 %v6522_v4  ;;  %v8706_v63 = vld [vmem:[#allocation18_spill] sm:$0xff]  ;;  %v8707_v4 = vld [vmem:[#allocation19_spill] sm:$0xff] }
 0x570   : > { %2501 = vmatprep.subr.mxu0 %v6526_v2  ;;  %2572 = vmatprep.subr.mxu1 %v6528_v58  ;;  %v8708_v2 = vld [vmem:[#allocation20_spill] sm:$0xff]  ;;  %v8709_v58 = vld [vmem:[#allocation21_spill] sm:$0xff] }
 0x571   : > { %2502 = vmatpush1.msra.mxu0 %v6532_v0  ;;  %2573 = vmatpush1.msra.mxu1 %v6534_v17  ;;  %v8710_v0 = vld [vmem:[#allocation22_spill] sm:$0xff]  ;;  %v8711_v17 = vld [vmem:[#allocation23_spill] sm:$0xff] }
 0x572   : > { %2503 = vmatprep.subr.mxu0 %v6538_v18  ;;  %2574 = vmatprep.subr.mxu1 %v6540_v19  ;;  %v8712_v18 = vld [vmem:[#allocation24_spill] sm:$0xff]  ;;  %v8713_v19 = vld [vmem:[#allocation25_spill] sm:$0xff] }
 0x573   : > { %2504 = vmatpush1.msra.mxu0 %v6544_v20  ;;  %2575 = vmatpush1.msra.mxu1 %v6546_v21  ;;  %v8714_v20 = vld [vmem:[#allocation26_spill] sm:$0xff]  ;;  %v8715_v21 = vld [vmem:[#allocation27_spill] sm:$0xff] }
 0x574   : > { %2505 = vmatprep.subr.mxu0 %v6550_v22  ;;  %2576 = vmatprep.subr.mxu1 %v6552_v8  ;;  %v8716_v22 = vld [vmem:[#allocation28_spill] sm:$0xff]  ;;  %v8717_v8 = vld [vmem:[#allocation29_spill] sm:$0xff] }
 0x575   : > { %2506 = vmatpush1.msra.mxu0 %v6556_v23  ;;  %2577 = vmatpush1.msra.mxu1 %v6558_v24  ;;  %v8718_v23 = vld [vmem:[#allocation30_spill] sm:$0xff]  ;;  %v8719_v24 = vld [vmem:[#allocation31_spill] sm:$0xff] }
 0x576   : > { %2507 = vmatprep.subr.mxu0 %v6562_v25  ;;  %2578 = vmatprep.subr.mxu1 %v6564_v26  ;;  %v8720_v25 = vld [vmem:[#allocation32_spill] sm:$0xff]  ;;  %v8721_v26 = vld [vmem:[#allocation33_spill] sm:$0xff] }
 0x577   : > { %2508 = vmatpush1.msra.mxu0 %v6568_v27  ;;  %2579 = vmatpush1.msra.mxu1 %v6570_v28  ;;  %v8722_v27 = vld [vmem:[#allocation34_spill] sm:$0xff]  ;;  %v8723_v28 = vld [vmem:[#allocation35_spill] sm:$0xff] }
 0x578   : > { %2509 = vmatprep.subr.mxu0 %v6574_v29  ;;  %2580 = vmatprep.subr.mxu1 %v6576_v30  ;;  %v8724_v29 = vld [vmem:[#allocation36_spill] sm:$0xff]  ;;  %v8725_v30 = vld [vmem:[#allocation41_spill] sm:$0xff] }
 0x579   : > { %2510 = vmatpush1.msra.mxu0 %v6580_v31  ;;  %2581 = vmatpush1.msra.mxu1 %v6582_v32  ;;  %v8726_v31 = vmov 0.0   ;;  %v8727_v32 = vld [vmem:[#allocation42_spill] sm:$0xff] }
 0x57a   : > { %2511 = vmatprep.subr.mxu0 %v6586_v33  ;;  %2582 = vmatprep.subr.mxu1 %v6588_v34  ;;  %v8728_v34 = vld [vmem:[#allocation58_spill] sm:$0xff] }
 0x57b   : > { %2512 = vmatpush1.msra.mxu0 %v6592_v35  ;;  %2583 = vmatpush1.msra.mxu1 %v6594_v36 }
 0x57c   : > { %2513 = vmatprep.subr.mxu0 %v6598_v38  ;;  %2584 = vmatprep.subr.mxu1 %v6600_v39 }
 0x57d   : > { %2514 = vmatpush1.msra.mxu0 %v6604_v40  ;;  %2585 = vmatpush1.msra.mxu1 %v6606_v41  ;;  %v8729_v40 = vld [vmem:[#allocation61_spill] sm:$0xff] }
 0x57e   : > { %2515 = vmatprep.subr.mxu0 %v6610_v42  ;;  %2586 = vmatprep.subr.mxu1 %v6612_v43  ;;  %v8730_v42 = vld [vmem:[#allocation63_spill] sm:$0xff] }
 0x57f   : > { %2516 = vmatpush1.msra.mxu0 %v6614_v44  ;;  %2587 = vmatpush1.msra.mxu1 %v6618_v45 }
 0x580   : > { %2517 = vmatprep.subr.mxu0 %v6620_v46  ;;  %2588 = vmatprep.subr.mxu1 %v6622_v47  ;;  %v8731_v46 = vld [vmem:[#allocation65_spill] sm:$0xff] }
 0x581   : > { %2518 = vmatpush1.msra.mxu0 %v6626_v48  ;;  %2589 = vmatpush1.msra.mxu1 %v6628_v49 }
 0x582   : > { %2519 = vmatprep.subr.mxu0 %v6630_v51  ;;  %2590 = vmatprep.subr.mxu1 %v6634_v52 }
 0x583   : > { %2520 = vmatpush1.msra.mxu0 %v6636_v53  ;;  %2591 = vmatpush1.msra.mxu1 %v8706_v63  ;;  %v2724_v63 = vld [vmem:[#allocation7 + $0x1b0] sm:$0xff] }
 0x584   : > { %2521 = vmatprep.subr.mxu0 %v8707_v4  ;;  %2592 = vmatprep.subr.mxu1 %v8708_v2  ;;  %v2719_v4 = vld [vmem:[#allocation7 + $0x188] sm:$0xff]  ;;  %v2721_v2 = vld [vmem:[#allocation7 + $0x198] sm:$0xff] }
 0x585   : > { %2522 = vmatpush1.msra.mxu0 %v8709_v58  ;;  %2593 = vmatpush1.msra.mxu1 %v8710_v0  ;;  %v2718_v58 = vld [vmem:[#allocation7 + $0x180] sm:$0xff]  ;;  %v2720_v0 = vld [vmem:[#allocation7 + $0x190] sm:$0xff] }
 0x586   : > { %2523 = vmatprep.subr.mxu0 %v8711_v17  ;;  %2594 = vmatprep.subr.mxu1 %v8712_v18  ;;  %v2715_v17 = vld [vmem:[#allocation7 + $0x168] sm:$0xff]  ;;  %v2717_v18 = vld [vmem:[#allocation7 + $0x178] sm:$0xff] }
 0x587   : > { %2524 = vmatpush1.msra.mxu0 %v8713_v19  ;;  %2595 = vmatpush1.msra.mxu1 %v8714_v20  ;;  %v2714_v19 = vld [vmem:[#allocation7 + $0x160] sm:$0xff]  ;;  %v2716_v20 = vld [vmem:[#allocation7 + $0x170] sm:$0xff] }
 0x588   : > { %2525 = vmatprep.subr.mxu0 %v8715_v21  ;;  %2596 = vmatprep.subr.mxu1 %v8716_v22  ;;  %v2711_v21 = vld [vmem:[#allocation7 + $0x148] sm:$0xff]  ;;  %v2713_v22 = vld [vmem:[#allocation7 + $0x158] sm:$0xff] }
 0x589   : > { %2526 = vmatpush1.msra.mxu0 %v8717_v8  ;;  %2597 = vmatpush1.msra.mxu1 %v8718_v23  ;;  %v2710_v8 = vld [vmem:[#allocation7 + $0x140] sm:$0xff]  ;;  %v2712_v23 = vld [vmem:[#allocation7 + $0x150] sm:$0xff] }
 0x58a   : > { %2527 = vmatprep.subr.mxu0 %v8719_v24  ;;  %2598 = vmatprep.subr.mxu1 %v8720_v25  ;;  %v2707_v24 = vld [vmem:[#allocation7 + $0x128] sm:$0xff]  ;;  %v2709_v25 = vld [vmem:[#allocation7 + $0x138] sm:$0xff] }
 0x58b   : > { %2528 = vmatpush1.msra.mxu0 %v8721_v26  ;;  %2599 = vmatpush1.msra.mxu1 %v8722_v27  ;;  %v2706_v26 = vld [vmem:[#allocation7 + $0x120] sm:$0xff]  ;;  %v2708_v27 = vld [vmem:[#allocation7 + $0x130] sm:$0xff] }
 0x58c   : > { %2529 = vmatprep.subr.mxu0 %v8723_v28  ;;  %2600 = vmatprep.subr.mxu1 %v8724_v29  ;;  %v2703_v28 = vld [vmem:[#allocation7 + $0x108] sm:$0xff]  ;;  %v2705_v29 = vld [vmem:[#allocation7 + $0x118] sm:$0xff] }
 0x58d   : > { %2530 = vmatpush1.msra.mxu0 %v8725_v30  ;;  %2563 = vmatprep.mubr.f32.mxu0 %v8726_v31  ;;  %v2702_v30 = vld [vmem:[#allocation7 + $0x100] sm:$0xff] }
 0x58e   : > { %2601 = vmatpush1.msra.mxu1 %v8727_v32  ;;  %2634 = vmatprep.mubr.f32.mxu1 %v8726_v31  ;;  %v2704_v32 = vld [vmem:[#allocation7 + $0x110] sm:$0xff] }
 0x58f   : > { %2734 = vmatprep.subr.mxu0 %v2731_v11  ;;  %2805 = vmatprep.subr.mxu1 %v2733_v59  ;;  %v2671_v11 = vld [vmem:[#allocation7 + $0x8] sm:$0xff]  ;;  %v2673_v59 = vld [vmem:[#allocation7 + $0x18] sm:$0xff] }
 0x62e   : > { %v2330_v33 = vpop.f32.mrf.mxu0  ;;  %v2401_v36 = vpop.f32.mrf.mxu1 }
 0x62f   : > { %v2406_v35 = vadd.f32 %v2330_v33, %v8728_v34  ;;  %v2408_v43 = vadd.f32 %v2401_v36, %v8730_v42  ;;  %v2699_v33 = vld [vmem:[#allocation7 + $0xe8] sm:$0xff]  ;;  %v2701_v34 = vld [vmem:[#allocation7 + $0xf8] sm:$0xff]  ;;  %v2700_v36 = vld [vmem:[#allocation7 + $0xf0] sm:$0xff] }
 0x630   : > { %v2332_v38 = vpop.f32.mrf.mxu0  ;;  %v2403_v45 = vpop.f32.mrf.mxu1  ;;  %v2691_v42 = vld [vmem:[#allocation7 + $0xa8] sm:$0xff] }
 0x631   : > { %v2410_v39 = vmul.f32 0.5, %v2406_v35  ;;  %v2407_v41 = vadd.f32 %v2332_v38, %v8729_v40  ;;  %v2409_v47 = vadd.f32 %v2403_v45, %v8731_v46  ;;  %v2698_v35 = vld [vmem:[#allocation7 + $0xe0] sm:$0xff]  ;;  %v2695_v38 = vld [vmem:[#allocation7 + $0xc8] sm:$0xff]  ;;  %v2692_v45 = vld [vmem:[#allocation7 + $0xb0] sm:$0xff] }
 0x632   : > { %v2694_v40 = vld [vmem:[#allocation7 + $0xc0] sm:$0xff]  ;;  %v2687_v46 = vld [vmem:[#allocation7 + $0x88] sm:$0xff] }
 0x633   : > { %5265 = vtanh.f32 %v2410_v39  ;;  %v2414_v44 = vmul.f32 0.5, %v2407_v41  ;;  %v2419_v48 = vmul.f32 0.5, %v2409_v47  ;;  %v2697_v39 = vld [vmem:[#allocation7 + $0xd8] sm:$0xff]  ;;  %v2696_v41 = vld [vmem:[#allocation7 + $0xd0] sm:$0xff] }
 0x634   : > { %v2689_v47 = vld [vmem:[#allocation7 + $0x98] sm:$0xff] }
 0x635   : > { %5267 = vtanh.f32 %v2414_v44  ;;  %v2690_v44 = vld [vmem:[#allocation7 + $0xa0] sm:$0xff] }
 0x636   : > { %5269 = vtanh.f32 %v2408_v43  ;;  %v2693_v43 = vld [vmem:[#allocation7 + $0xb8] sm:$0xff] }
 0x637   : > { %5271 = vtanh.f32 %v2419_v48  ;;  %v2686_v48 = vld [vmem:[#allocation7 + $0x80] sm:$0xff] }
 0x640   : > { %v5266_v49 = vpop.eup %5265 }
 0x641   : > { %v2412_v51 = vmul.f32 0.5, %v5266_v49  ;;  %v2688_v49 = vld [vmem:[#allocation7 + $0x90] sm:$0xff] }
 0x642   : > { %v5268_v52 = vpop.eup %5267 }
 0x643   : > { %v2413_v53 = vadd.f32 0.5, %v2412_v51  ;;  %v2416_v54 = vmul.f32 0.5, %v5268_v52  ;;  %v5270_v55 = vpop.eup %5269  ;;  %v2683_v51 = vld [vmem:[#allocation7 + $0x68] sm:$0xff]  ;;  %v2685_v52 = vld [vmem:[#allocation7 + $0x78] sm:$0xff] }
 0x644   : > { %v5272_v57 = vpop.eup %5271 }
 0x645   : > { %v2417_v7 = vadd.f32 0.5, %v2416_v54  ;;  %v2424_v10 = vmul.f32 %v5270_v55, %v2413_v53  ;;  %v2421_v13 = vmul.f32 0.5, %v5272_v57  ;;  %v2682_v53 = vld [vmem:[#allocation7 + $0x60] sm:$0xff]  ;;  %v2684_v54 = vld [vmem:[#allocation7 + $0x70] sm:$0xff]  ;;  %v2679_v55 = vld [vmem:[#allocation7 + $0x48] sm:$0xff] }
 0x646   : > { %v2675_v57 = vld [vmem:[#allocation7 + $0x28] sm:$0xff] }
 0x647   : > { %v2423_v60 = vmul.f32 %v2417_v7, %v6873_v5  ;;  %v2422_v1 = vadd.f32 0.5, %v2421_v13  ;;  %v2726_v5 = vld [vmem:[#allocation7 + $0x1c0] sm:$0xff]  ;;  %v2681_v7 = vld [vmem:[#allocation7 + $0x58] sm:$0xff] }
 0x648   : > { %v2677_v13 = vld [vmem:[#allocation7 + $0x38] sm:$0xff] }
 0x649   : > { %v6949_v37 = vadd.f32 %v2424_v10, %v2423_v60  ;;  %v2678_v10 = vld [vmem:[#allocation7 + $0x40] sm:$0xff]  ;;  %v2680_v60 = vld [vmem:[#allocation7 + $0x50] sm:$0xff] }
 0x64b   : > { %5273 = vtanh.f32 %v6949_v37 }
 0x658   : > { %v5274_v12 = vpop.eup %5273 }
 0x659   : > { %v6952_v62 = vmul.f32 %v5274_v12, %v2422_v1  ;;  %v2674_v1 = vld [vmem:[#allocation7 + $0x20] sm:$0xff]  ;;  %v2676_v12 = vld [vmem:[#allocation7 + $0x30] sm:$0xff] }
 0x65b   : > { %8732 = vst [vmem:[#allocation46_spill] sm:$0xff] %v6952_v62  ;;  %2564 = vmatmul.mubr.f32.vlgmr.msra.gmra.mxu0 %v6952_v62  ;;  %2635 = vmatmul.mubr.f32.vlgmr.msra.gmra.mxu1 %v6952_v62  ;;  %v7148_v62 = vld [vmem:[#allocation9 + $0x18] sm:$0xff] }
 0x65c   : > { %2798 = vmatprep.mubr.f32.mxu0 %v8726_v31  ;;  %2869 = vmatprep.mubr.f32.mxu1 %v8726_v31 }
 0x65d   : > { %2735 = vmatpush1.msra.mxu0 %v2730_v56  ;;  %2806 = vmatpush1.msra.mxu1 %v2732_v6  ;;  %v2670_v56 = vld [vmem:[#allocation7] sm:$0xff]  ;;  %v2672_v6 = vld [vmem:[#allocation7 + $0x10] sm:$0xff] }
 0x65e   : > { %2736 = vmatprep.subr.mxu0 %v2727_v14  ;;  %2807 = vmatprep.subr.mxu1 %v2729_v3  ;;  %v6958_v14 = vld [vmem:[#allocation9 + $0x1e8] sm:$0xff]  ;;  %v6960_v3 = vld [vmem:[#allocation9 + $0x1f8] sm:$0xff] }
 0x65f   : > { %2737 = vmatpush1.msra.mxu0 %v2726_v5  ;;  %2808 = vmatpush1.msra.mxu1 %v2728_v50  ;;  %v8733_v50 = vld [vmem:[#allocation64_spill] sm:$0xff] }
 0x660   : > { %2738 = vmatprep.subr.mxu0 %v2723_v16  ;;  %2809 = vmatprep.subr.mxu1 %v2725_v9 }
 0x661   : > { %2739 = vmatpush1.msra.mxu0 %v2722_v61  ;;  %2810 = vmatpush1.msra.mxu1 %v2724_v63 }
 0x662   : > { %2740 = vmatprep.subr.mxu0 %v2719_v4  ;;  %2811 = vmatprep.subr.mxu1 %v2721_v2  ;;  %v8734_v4 = vld [vmem:[#allocation66_spill] sm:$0xff] }
 0x663   : > { %2741 = vmatpush1.msra.mxu0 %v2718_v58  ;;  %2812 = vmatpush1.msra.mxu1 %v2720_v0  ;;  %v8735_v58 = vld [vmem:[#allocation67_spill] sm:$0xff] }
 0x664   : > { %2742 = vmatprep.subr.mxu0 %v2715_v17  ;;  %2813 = vmatprep.subr.mxu1 %v2717_v18 }
 0x665   : > { %2743 = vmatpush1.msra.mxu0 %v2714_v19  ;;  %2814 = vmatpush1.msra.mxu1 %v2716_v20  ;;  %v8736_v19 = vld [vmem:[#allocation69_spill] sm:$0xff] }
 0x666   : > { %2744 = vmatprep.subr.mxu0 %v2711_v21  ;;  %2815 = vmatprep.subr.mxu1 %v2713_v22 }
 0x667   : > { %2745 = vmatpush1.msra.mxu0 %v2710_v8  ;;  %2816 = vmatpush1.msra.mxu1 %v2712_v23 }
 0x668   : > { %2746 = vmatprep.subr.mxu0 %v2707_v24  ;;  %2817 = vmatprep.subr.mxu1 %v2709_v25 }
 0x669   : > { %2747 = vmatpush1.msra.mxu0 %v2706_v26  ;;  %2818 = vmatpush1.msra.mxu1 %v2708_v27 }
 0x66a   : > { %2748 = vmatprep.subr.mxu0 %v2703_v28  ;;  %2819 = vmatprep.subr.mxu1 %v2705_v29 }
 0x66b   : > { %2749 = vmatpush1.msra.mxu0 %v2702_v30  ;;  %2820 = vmatpush1.msra.mxu1 %v2704_v32 }
 0x66c   : > { %2750 = vmatprep.subr.mxu0 %v2699_v33  ;;  %2821 = vmatprep.subr.mxu1 %v2701_v34 }
 0x66d   : > { %2751 = vmatpush1.msra.mxu0 %v2698_v35  ;;  %2822 = vmatpush1.msra.mxu1 %v2700_v36 }
 0x66e   : > { %2752 = vmatprep.subr.mxu0 %v2695_v38  ;;  %2823 = vmatprep.subr.mxu1 %v2697_v39  ;;  %v6974_v38 = vld [vmem:[#allocation9 + $0x1e0] sm:$0xff]  ;;  %v6976_v39 = vld [vmem:[#allocation9 + $0x1f0] sm:$0xff] }
 0x66f   : > { %2753 = vmatpush1.msra.mxu0 %v2694_v40  ;;  %2824 = vmatpush1.msra.mxu1 %v2696_v41  ;;  %v6978_v40 = vld [vmem:[#allocation9 + $0x1c8] sm:$0xff]  ;;  %v6980_v41 = vld [vmem:[#allocation9 + $0x1d8] sm:$0xff] }
 0x670   : > { %2754 = vmatprep.subr.mxu0 %v2691_v42  ;;  %2825 = vmatprep.subr.mxu1 %v2693_v43  ;;  %v6986_v42 = vld [vmem:[#allocation9 + $0x1d0] sm:$0xff]  ;;  %v6990_v43 = vld [vmem:[#allocation9 + $0x1a8] sm:$0xff] }
 0x671   : > { %2755 = vmatpush1.msra.mxu0 %v2690_v44  ;;  %2826 = vmatpush1.msra.mxu1 %v2692_v45  ;;  %v6992_v44 = vld [vmem:[#allocation9 + $0x1b8] sm:$0xff]  ;;  %v6996_v45 = vld [vmem:[#allocation9 + $0x1a0] sm:$0xff] }
 0x672   : > { %2756 = vmatprep.subr.mxu0 %v2687_v46  ;;  %2827 = vmatprep.subr.mxu1 %v2689_v47  ;;  %v6998_v46 = vld [vmem:[#allocation9 + $0x1b0] sm:$0xff]  ;;  %v7002_v47 = vld [vmem:[#allocation9 + $0x188] sm:$0xff] }
 0x673   : > { %2757 = vmatpush1.msra.mxu0 %v2686_v48  ;;  %2828 = vmatpush1.msra.mxu1 %v2688_v49  ;;  %v7004_v48 = vld [vmem:[#allocation9 + $0x198] sm:$0xff]  ;;  %v7008_v49 = vld [vmem:[#allocation9 + $0x180] sm:$0xff] }
 0x674   : > { %2758 = vmatprep.subr.mxu0 %v2683_v51  ;;  %2829 = vmatprep.subr.mxu1 %v2685_v52  ;;  %v7010_v51 = vld [vmem:[#allocation9 + $0x190] sm:$0xff]  ;;  %v7014_v52 = vld [vmem:[#allocation9 + $0x168] sm:$0xff] }
 0x675   : > { %2759 = vmatpush1.msra.mxu0 %v2682_v53  ;;  %2830 = vmatpush1.msra.mxu1 %v2684_v54  ;;  %v7016_v53 = vld [vmem:[#allocation9 + $0x178] sm:$0xff]  ;;  %v7020_v54 = vld [vmem:[#allocation9 + $0x160] sm:$0xff] }
 0x676   : > { %2760 = vmatprep.subr.mxu0 %v2679_v55  ;;  %2831 = vmatprep.subr.mxu1 %v2681_v7  ;;  %v7022_v55 = vld [vmem:[#allocation9 + $0x170] sm:$0xff]  ;;  %v7026_v7 = vld [vmem:[#allocation9 + $0x148] sm:$0xff] }
 0x677   : > { %2761 = vmatpush1.msra.mxu0 %v2678_v10  ;;  %2832 = vmatpush1.msra.mxu1 %v2680_v60  ;;  %v7028_v10 = vld [vmem:[#allocation9 + $0x158] sm:$0xff]  ;;  %v7032_v60 = vld [vmem:[#allocation9 + $0x140] sm:$0xff] }
 0x678   : > { %2762 = vmatprep.subr.mxu0 %v2675_v57  ;;  %2833 = vmatprep.subr.mxu1 %v2677_v13  ;;  %v7034_v57 = vld [vmem:[#allocation9 + $0x150] sm:$0xff]  ;;  %v7038_v13 = vld [vmem:[#allocation9 + $0x128] sm:$0xff] }
 0x679   : > { %2763 = vmatpush1.msra.mxu0 %v2674_v1  ;;  %2834 = vmatpush1.msra.mxu1 %v2676_v12  ;;  %v7040_v1 = vld [vmem:[#allocation9 + $0x138] sm:$0xff]  ;;  %v7044_v12 = vld [vmem:[#allocation9 + $0x120] sm:$0xff] }
 0x67a   : > { %2764 = vmatprep.subr.mxu0 %v2671_v11  ;;  %2835 = vmatprep.subr.mxu1 %v2673_v59  ;;  %v7046_v11 = vld [vmem:[#allocation9 + $0x130] sm:$0xff]  ;;  %v7050_v59 = vld [vmem:[#allocation9 + $0x108] sm:$0xff] }
 0x67b   : > { %2765 = vmatpush1.msra.mxu0 %v2670_v56  ;;  %2836 = vmatpush1.msra.mxu1 %v2672_v6  ;;  %v7052_v56 = vld [vmem:[#allocation9 + $0x118] sm:$0xff]  ;;  %v7056_v6 = vld [vmem:[#allocation9 + $0x100] sm:$0xff] }
 0x67c   : > { %2990 = vmatprep.subr.mxu0 %v6958_v14  ;;  %3079 = vmatprep.subr.mxu1 %v6960_v3 }
 0x71b   : > { %v2565_v5 = vpop.f32.mrf.mxu0  ;;  %v2636_v9 = vpop.f32.mrf.mxu1 }
 0x71c   : > { %v2641_v16 = vadd.f32 %v2565_v5, %v8733_v50  ;;  %v2643_v0 = vadd.f32 %v2636_v9, %v8735_v58  ;;  %v7058_v5 = vld [vmem:[#allocation9 + $0x110] sm:$0xff]  ;;  %v7062_v50 = vld [vmem:[#allocation9 + $0xe8] sm:$0xff]  ;;  %v7068_v9 = vld [vmem:[#allocation9 + $0xe0] sm:$0xff] }
 0x71d   : > { %v2567_v61 = vpop.f32.mrf.mxu0  ;;  %v2638_v18 = vpop.f32.mrf.mxu1  ;;  %v7082_v58 = vld [vmem:[#allocation9 + $0xd0] sm:$0xff] }
 0x71e   : > { %v2645_v63 = vmul.f32 0.5, %v2641_v16  ;;  %v2642_v2 = vadd.f32 %v2567_v61, %v8734_v4  ;;  %v2644_v20 = vadd.f32 %v2638_v18, %v8736_v19  ;;  %v7064_v16 = vld [vmem:[#allocation9 + $0xf8] sm:$0xff]  ;;  %v7070_v61 = vld [vmem:[#allocation9 + $0xf0] sm:$0xff]  ;;  %v7092_v18 = vld [vmem:[#allocation9 + $0xa0] sm:$0xff] }
 0x71f   : > { %v7076_v4 = vld [vmem:[#allocation9 + $0xd8] sm:$0xff]  ;;  %v7094_v19 = vld [vmem:[#allocation9 + $0xb0] sm:$0xff] }
 0x720   : > { %5275 = vtanh.f32 %v2645_v63  ;;  %v2649_v17 = vmul.f32 0.5, %v2642_v2  ;;  %v2654_v21 = vmul.f32 0.5, %v2644_v20  ;;  %v7074_v63 = vld [vmem:[#allocation9 + $0xc8] sm:$0xff]  ;;  %v7080_v2 = vld [vmem:[#allocation9 + $0xc0] sm:$0xff] }
 0x721   : > { %v7098_v20 = vld [vmem:[#allocation9 + $0x88] sm:$0xff] }
 0x722   : > { %5277 = vtanh.f32 %v2649_v17  ;;  %v7088_v17 = vld [vmem:[#allocation9 + $0xb8] sm:$0xff] }
 0x723   : > { %5279 = vtanh.f32 %v2643_v0  ;;  %v7086_v0 = vld [vmem:[#allocation9 + $0xa8] sm:$0xff] }
 0x724   : > { %5281 = vtanh.f32 %v2654_v21  ;;  %v7100_v21 = vld [vmem:[#allocation9 + $0x98] sm:$0xff] }
 0x72d   : > { %v5276_v22 = vpop.eup %5275 }
 0x72e   : > { %v2647_v8 = vmul.f32 0.5, %v5276_v22  ;;  %v7104_v22 = vld [vmem:[#allocation9 + $0x80] sm:$0xff] }
 0x72f   : > { %v5278_v23 = vpop.eup %5277 }
 0x730   : > { %v2648_v24 = vadd.f32 0.5, %v2647_v8  ;;  %v2651_v25 = vmul.f32 0.5, %v5278_v23  ;;  %v5280_v26 = vpop.eup %5279  ;;  %v7106_v8 = vld [vmem:[#allocation9 + $0x90] sm:$0xff]  ;;  %v7110_v23 = vld [vmem:[#allocation9 + $0x68] sm:$0xff] }
 0x731   : > { %v5282_v32 = vpop.eup %5281 }
 0x732   : > { %v2652_v27 = vadd.f32 0.5, %v2651_v25  ;;  %v2659_v28 = vmul.f32 %v5280_v26, %v2648_v24  ;;  %v2656_v33 = vmul.f32 0.5, %v5282_v32  ;;  %v7112_v24 = vld [vmem:[#allocation9 + $0x78] sm:$0xff]  ;;  %v7116_v25 = vld [vmem:[#allocation9 + $0x60] sm:$0xff]  ;;  %v7118_v26 = vld [vmem:[#allocation9 + $0x70] sm:$0xff] }
 0x733   : > { %v7130_v32 = vld [vmem:[#allocation9 + $0x50] sm:$0xff] }
 0x734   : > { %v2658_v29 = vmul.f32 %v2652_v27, %v6949_v37  ;;  %v2657_v34 = vadd.f32 0.5, %v2656_v33  ;;  %v6984_v37 = vld [vmem:[#allocation9 + $0x1c0] sm:$0xff]  ;;  %v7122_v27 = vld [vmem:[#allocation9 + $0x48] sm:$0xff] }
 0x735   : > { %v7134_v33 = vld [vmem:[#allocation9 + $0x28] sm:$0xff] }
 0x736   : > { %v6969_v30 = vadd.f32 %v2659_v28, %v2658_v29  ;;  %v7124_v28 = vld [vmem:[#allocation9 + $0x58] sm:$0xff]  ;;  %v7128_v29 = vld [vmem:[#allocation9 + $0x40] sm:$0xff] }
 0x737   : > { %8739 = vst [vmem:[#allocation49_spill] sm:$0xff] %v7124_v28 }
 0x738   : > { %8737 = vst [vmem:[#allocation47_spill] sm:$0xff] %v6969_v30  ;;  %5283 = vtanh.f32 %v6969_v30  ;;  %v7142_v30 = vld [vmem:[#allocation9 + $0x30] sm:$0xff] }
 0x745   : > { %v5284_v35 = vpop.eup %5283 }
 0x746   : > { %v6972_v36 = vmul.f32 %v5284_v35, %v2657_v34  ;;  %v7136_v34 = vld [vmem:[#allocation9 + $0x38] sm:$0xff]  ;;  %v7140_v35 = vld [vmem:[#allocation9 + $0x20] sm:$0xff] }
 0x747   : > { %8740 = vst [vmem:[#allocation50_spill] sm:$0xff] %v7136_v34 }
 0x748   : > { %8738 = vst [vmem:[#allocation48_spill] sm:$0xff] %v6972_v36  ;;  %2799 = vmatmul.mubr.f32.vlgmr.msra.gmra.mxu0 %v6972_v36  ;;  %2870 = vmatmul.mubr.f32.vlgmr.msra.gmra.mxu1 %v6972_v36  ;;  %v7146_v36 = vld [vmem:[#allocation9 + $0x8] sm:$0xff] }
 0x749   : > { %2991 = vmatpush1.msra.mxu0 %v6974_v38  ;;  %3080 = vmatpush1.msra.mxu1 %v6976_v39 }
 0x74a   : > { %2992 = vmatprep.subr.mxu0 %v6978_v40  ;;  %3081 = vmatprep.subr.mxu1 %v6980_v41 }
 0x74b   : > { %2993 = vmatpush1.msra.mxu0 %v6984_v37  ;;  %3082 = vmatpush1.msra.mxu1 %v6986_v42 }
 0x74c   : > { %2994 = vmatprep.subr.mxu0 %v6990_v43  ;;  %3083 = vmatprep.subr.mxu1 %v6992_v44 }
 0x74d   : > { %2995 = vmatpush1.msra.mxu0 %v6996_v45  ;;  %3084 = vmatpush1.msra.mxu1 %v6998_v46 }
 0x74e   : > { %2996 = vmatprep.subr.mxu0 %v7002_v47  ;;  %3085 = vmatprep.subr.mxu1 %v7004_v48 }
 0x74f   : > { %2997 = vmatpush1.msra.mxu0 %v7008_v49  ;;  %3086 = vmatpush1.msra.mxu1 %v7010_v51 }
 0x750   : > { %2998 = vmatprep.subr.mxu0 %v7014_v52  ;;  %3087 = vmatprep.subr.mxu1 %v7016_v53 }
 0x751   : > { %2999 = vmatpush1.msra.mxu0 %v7020_v54  ;;  %3088 = vmatpush1.msra.mxu1 %v7022_v55 }
 0x752   : > { %3000 = vmatprep.subr.mxu0 %v7026_v7  ;;  %3089 = vmatprep.subr.mxu1 %v7028_v10 }
 0x753   : > { %3001 = vmatpush1.msra.mxu0 %v7032_v60  ;;  %3090 = vmatpush1.msra.mxu1 %v7034_v57 }
 0x754   : > { %3002 = vmatprep.subr.mxu0 %v7038_v13  ;;  %3091 = vmatprep.subr.mxu1 %v7040_v1 }
 0x755   : > { %3003 = vmatpush1.msra.mxu0 %v7044_v12  ;;  %3092 = vmatpush1.msra.mxu1 %v7046_v11 }
 0x756   : > { %3004 = vmatprep.subr.mxu0 %v7050_v59  ;;  %3093 = vmatprep.subr.mxu1 %v7052_v56 }
 0x757   : > { %3005 = vmatpush1.msra.mxu0 %v7056_v6  ;;  %3094 = vmatpush1.msra.mxu1 %v7058_v5 }
 0x758   : > { %3006 = vmatprep.subr.mxu0 %v7062_v50  ;;  %3095 = vmatprep.subr.mxu1 %v7064_v16 }
 0x759   : > { %3007 = vmatpush1.msra.mxu0 %v7068_v9  ;;  %3096 = vmatpush1.msra.mxu1 %v7070_v61 }
 0x75a   : > { %3008 = vmatprep.subr.mxu0 %v7074_v63  ;;  %3097 = vmatprep.subr.mxu1 %v7076_v4 }
 0x75b   : > { %3009 = vmatpush1.msra.mxu0 %v7080_v2  ;;  %3098 = vmatpush1.msra.mxu1 %v7082_v58 }
 0x75c   : > { %3010 = vmatprep.subr.mxu0 %v7086_v0  ;;  %3099 = vmatprep.subr.mxu1 %v7088_v17 }
 0x75d   : > { %3011 = vmatpush1.msra.mxu0 %v7092_v18  ;;  %3100 = vmatpush1.msra.mxu1 %v7094_v19 }
 0x75e   : > { %3012 = vmatprep.subr.mxu0 %v7098_v20  ;;  %3101 = vmatprep.subr.mxu1 %v7100_v21 }
 0x75f   : > { %3013 = vmatpush1.msra.mxu0 %v7104_v22  ;;  %3102 = vmatpush1.msra.mxu1 %v7106_v8 }
 0x760   : > { %3014 = vmatprep.subr.mxu0 %v7110_v23  ;;  %3103 = vmatprep.subr.mxu1 %v7112_v24 }
 0x761   : > { %3015 = vmatpush1.msra.mxu0 %v7116_v25  ;;  %3104 = vmatpush1.msra.mxu1 %v7118_v26 }
 0x762   : > { %3016 = vmatprep.subr.mxu0 %v7122_v27  ;;  %3105 = vmatprep.subr.mxu1 %v7124_v28  ;;  %v7156_v28 = vld [vmem:[#allocation9 + $0x10] sm:$0xff] }
 0x763   : > { %3017 = vmatpush1.msra.mxu0 %v7128_v29  ;;  %3106 = vmatpush1.msra.mxu1 %v7130_v32 }
 0x764   : > { %3018 = vmatprep.subr.mxu0 %v7134_v33  ;;  %3107 = vmatprep.subr.mxu1 %v7136_v34  ;;  %v8741_v34 = vld [vmem:[#allocation73_spill] sm:$0xff] }
 0x765   : > { %3019 = vmatpush1.msra.mxu0 %v7140_v35  ;;  %3108 = vmatpush1.msra.mxu1 %v7142_v30 }
 0x766   : > { %3020 = vmatprep.subr.mxu0 %v7146_v36  ;;  %3109 = vmatprep.subr.mxu1 %v7148_v62 }
 0x767   : > { %3021 = vmatpush1.msra.mxu0 %v7152_v15  ;;  %3054 = vmatprep.mubr.f32.mxu0 %v8726_v31 }
 0x768   : > { %3110 = vmatpush1.msra.mxu1 %v7156_v28  ;;  %3143 = vmatprep.mubr.f32.mxu1 %v8726_v31 }
 0x769   : > { %3055 = vmatmul.mubr.f32.vlgmr.msra.gmra.mxu0 %v8741_v34  ;;  %3144 = vmatmul.mubr.f32.vlgmr.msra.gmra.mxu1 %v8741_v34  ;;  %v8742_v34 = vld [vmem:[#allocation15_spill] sm:$0xff] }
 0x76a   : > { %3274 = vmatprep.subr.mxu0 %v6958_v14  ;;  %3363 = vmatprep.subr.mxu1 %v6960_v3  ;;  %v8743_v14 = vld [vmem:[#allocation43_spill] sm:$0xff]  ;;  %v8744_v3 = vld [vmem:[#allocation44_spill] sm:$0xff] }
 0x76b   : > { %3275 = vmatpush1.msra.mxu0 %v6974_v38  ;;  %3364 = vmatpush1.msra.mxu1 %v6976_v39  ;;  %v8745_v38 = vld [vmem:[#allocation49_spill] sm:$0xff]  ;;  %v8746_v39 = vld [vmem:[#allocation50_spill] sm:$0xff] }
 0x76c   : > { %3276 = vmatprep.subr.mxu0 %v6978_v40  ;;  %3365 = vmatprep.subr.mxu1 %v6980_v41  ;;  %v8747_v40 = vld [vmem:[#allocation45_spill] sm:$0xff]  ;;  %v7262_v41 = vld [vmem:[#allocation10 + $0x1e0] sm:$0xff] }
 0x76d   : > { %3060 = vmatprep.mubr.f32.mxu0 %v8726_v31  ;;  %3149 = vmatprep.mubr.f32.mxu1 %v8726_v31 }
 0x76e   : > { %3277 = vmatpush1.msra.mxu0 %v6984_v37  ;;  %3366 = vmatpush1.msra.mxu1 %v6986_v42  ;;  %v7264_v37 = vld [vmem:[#allocation10 + $0x1f0] sm:$0xff]  ;;  %v7268_v42 = vld [vmem:[#allocation10 + $0x1c8] sm:$0xff] }
 0x76f   : > { %3061 = vmatmul.mubr.f32.gmra.mxu0 %v8742_v34  ;;  %3150 = vmatmul.mubr.f32.gmra.mxu1 %v8742_v34  ;;  %v7420_v34 = vld [vmem:[#allocation10 + $0x50] sm:$0xff] }
 0x770   : > { %3278 = vmatprep.subr.mxu0 %v6990_v43  ;;  %3367 = vmatprep.subr.mxu1 %v6992_v44  ;;  %v7270_v43 = vld [vmem:[#allocation10 + $0x1d8] sm:$0xff]  ;;  %v7274_v44 = vld [vmem:[#allocation10 + $0x1c0] sm:$0xff]  ;;  %8762 = vst [vmem:[#allocation18_spill] sm:$0xff] %v7420_v34 }
 0x771   : > { %3279 = vmatpush1.msra.mxu0 %v6996_v45  ;;  %3368 = vmatpush1.msra.mxu1 %v6998_v46  ;;  %v7276_v45 = vld [vmem:[#allocation10 + $0x1d0] sm:$0xff]  ;;  %v7278_v46 = vld [vmem:[#allocation10 + $0x1a8] sm:$0xff] }
 0x772   : > { %3280 = vmatprep.subr.mxu0 %v7002_v47  ;;  %3369 = vmatprep.subr.mxu1 %v7004_v48  ;;  %v7282_v47 = vld [vmem:[#allocation10 + $0x1b8] sm:$0xff]  ;;  %v7284_v48 = vld [vmem:[#allocation10 + $0x1a0] sm:$0xff] }
 0x773   : > { %3066 = vmatprep.mubr.f32.mxu0 %v8726_v31  ;;  %3155 = vmatprep.mubr.f32.mxu1 %v8726_v31 }
 0x774   : > { %3281 = vmatpush1.msra.mxu0 %v7008_v49  ;;  %3370 = vmatpush1.msra.mxu1 %v7010_v51  ;;  %v7286_v49 = vld [vmem:[#allocation10 + $0x1b0] sm:$0xff]  ;;  %v7290_v51 = vld [vmem:[#allocation10 + $0x188] sm:$0xff] }
 0x775   : > { %3067 = vmatmul.mubr.f32.gmra.mxu0 %v8743_v14  ;;  %3156 = vmatmul.mubr.f32.gmra.mxu1 %v8743_v14  ;;  %v7424_v14 = vld [vmem:[#allocation10 + $0x28] sm:$0xff] }
 0x776   : > { %3282 = vmatprep.subr.mxu0 %v7014_v52  ;;  %3371 = vmatprep.subr.mxu1 %v7016_v53  ;;  %v7292_v52 = vld [vmem:[#allocation10 + $0x198] sm:$0xff]  ;;  %v7294_v53 = vld [vmem:[#allocation10 + $0x180] sm:$0xff]  ;;  %8763 = vst [vmem:[#allocation19_spill] sm:$0xff] %v7424_v14 }
 0x777   : > { %3283 = vmatpush1.msra.mxu0 %v7020_v54  ;;  %3372 = vmatpush1.msra.mxu1 %v7022_v55  ;;  %v7298_v54 = vld [vmem:[#allocation10 + $0x190] sm:$0xff]  ;;  %v7300_v55 = vld [vmem:[#allocation10 + $0x168] sm:$0xff] }
 0x778   : > { %3284 = vmatprep.subr.mxu0 %v7026_v7  ;;  %3373 = vmatprep.subr.mxu1 %v7028_v10  ;;  %v7302_v7 = vld [vmem:[#allocation10 + $0x178] sm:$0xff]  ;;  %v7306_v10 = vld [vmem:[#allocation10 + $0x160] sm:$0xff] }
 0x779   : > { %3072 = vmatprep.mubr.f32.mxu0 %v8726_v31  ;;  %3161 = vmatprep.mubr.f32.mxu1 %v8726_v31 }
 0x77a   : > { %3285 = vmatpush1.msra.mxu0 %v7032_v60  ;;  %3374 = vmatpush1.msra.mxu1 %v7034_v57  ;;  %v7308_v60 = vld [vmem:[#allocation10 + $0x170] sm:$0xff]  ;;  %v7312_v57 = vld [vmem:[#allocation10 + $0x148] sm:$0xff] }
 0x77b   : > { %3073 = vmatmul.mubr.f32.gmra.mxu0 %v8744_v3  ;;  %3162 = vmatmul.mubr.f32.gmra.mxu1 %v8744_v3  ;;  %v7426_v3 = vld [vmem:[#allocation10 + $0x38] sm:$0xff] }
 0x77c   : > { %3286 = vmatprep.subr.mxu0 %v7038_v13  ;;  %3375 = vmatprep.subr.mxu1 %v7040_v1  ;;  %v7314_v13 = vld [vmem:[#allocation10 + $0x158] sm:$0xff]  ;;  %v7318_v1 = vld [vmem:[#allocation10 + $0x140] sm:$0xff]  ;;  %8764 = vst [vmem:[#allocation20_spill] sm:$0xff] %v7426_v3 }
 0x77d   : > { %3287 = vmatpush1.msra.mxu0 %v7044_v12  ;;  %3376 = vmatpush1.msra.mxu1 %v7046_v11  ;;  %v7320_v12 = vld [vmem:[#allocation10 + $0x150] sm:$0xff]  ;;  %v7324_v11 = vld [vmem:[#allocation10 + $0x128] sm:$0xff] }
 0x77e   : > { %3288 = vmatprep.subr.mxu0 %v7050_v59  ;;  %3377 = vmatprep.subr.mxu1 %v7052_v56  ;;  %v7326_v59 = vld [vmem:[#allocation10 + $0x138] sm:$0xff]  ;;  %v7330_v56 = vld [vmem:[#allocation10 + $0x120] sm:$0xff] }
 0x77f   : > { %3289 = vmatpush1.msra.mxu0 %v7056_v6  ;;  %3378 = vmatpush1.msra.mxu1 %v7058_v5  ;;  %v7332_v6 = vld [vmem:[#allocation10 + $0x130] sm:$0xff]  ;;  %v7336_v5 = vld [vmem:[#allocation10 + $0x108] sm:$0xff] }
 0x780   : > { %3290 = vmatprep.subr.mxu0 %v7062_v50  ;;  %3379 = vmatprep.subr.mxu1 %v7064_v16  ;;  %v7338_v50 = vld [vmem:[#allocation10 + $0x118] sm:$0xff]  ;;  %v7342_v16 = vld [vmem:[#allocation10 + $0x100] sm:$0xff] }
 0x781   : > { %3291 = vmatpush1.msra.mxu0 %v7068_v9  ;;  %3380 = vmatpush1.msra.mxu1 %v7070_v61  ;;  %v7344_v9 = vld [vmem:[#allocation10 + $0x110] sm:$0xff]  ;;  %v7348_v61 = vld [vmem:[#allocation10 + $0xe8] sm:$0xff] }
 0x782   : > { %3292 = vmatprep.subr.mxu0 %v7074_v63  ;;  %3381 = vmatprep.subr.mxu1 %v7076_v4  ;;  %v7350_v63 = vld [vmem:[#allocation10 + $0xf8] sm:$0xff]  ;;  %v7354_v4 = vld [vmem:[#allocation10 + $0xe0] sm:$0xff] }
 0x783   : > { %3293 = vmatpush1.msra.mxu0 %v7080_v2  ;;  %3382 = vmatpush1.msra.mxu1 %v7082_v58  ;;  %v7356_v2 = vld [vmem:[#allocation10 + $0xf0] sm:$0xff]  ;;  %v7360_v58 = vld [vmem:[#allocation10 + $0xc8] sm:$0xff] }
 0x784   : > { %3294 = vmatprep.subr.mxu0 %v7086_v0  ;;  %3383 = vmatprep.subr.mxu1 %v7088_v17  ;;  %v7362_v0 = vld [vmem:[#allocation10 + $0xd8] sm:$0xff]  ;;  %v7366_v17 = vld [vmem:[#allocation10 + $0xc0] sm:$0xff] }
 0x785   : > { %3295 = vmatpush1.msra.mxu0 %v7092_v18  ;;  %3384 = vmatpush1.msra.mxu1 %v7094_v19  ;;  %v7368_v18 = vld [vmem:[#allocation10 + $0xd0] sm:$0xff]  ;;  %v7372_v19 = vld [vmem:[#allocation10 + $0xa8] sm:$0xff] }
 0x786   : > { %3296 = vmatprep.subr.mxu0 %v7098_v20  ;;  %3385 = vmatprep.subr.mxu1 %v7100_v21  ;;  %v7374_v20 = vld [vmem:[#allocation10 + $0xb8] sm:$0xff]  ;;  %v7378_v21 = vld [vmem:[#allocation10 + $0xa0] sm:$0xff] }
 0x787   : > { %3297 = vmatpush1.msra.mxu0 %v7104_v22  ;;  %3386 = vmatpush1.msra.mxu1 %v7106_v8  ;;  %v7380_v22 = vld [vmem:[#allocation10 + $0xb0] sm:$0xff]  ;;  %v7384_v8 = vld [vmem:[#allocation10 + $0x88] sm:$0xff] }
 0x788   : > { %3298 = vmatprep.subr.mxu0 %v7110_v23  ;;  %3387 = vmatprep.subr.mxu1 %v7112_v24  ;;  %v7386_v23 = vld [vmem:[#allocation10 + $0x98] sm:$0xff]  ;;  %v7390_v24 = vld [vmem:[#allocation10 + $0x80] sm:$0xff] }
 0x789   : > { %3299 = vmatpush1.msra.mxu0 %v7116_v25  ;;  %3388 = vmatpush1.msra.mxu1 %v7118_v26  ;;  %8752 = vst [vmem:[#allocation16_spill] sm:$0xff] %v7386_v23  ;;  %8753 = vst [vmem:[#allocation17_spill] sm:$0xff] %v7390_v24  ;;  %v7392_v25 = vld [vmem:[#allocation10 + $0x90] sm:$0xff]  ;;  %v7396_v26 = vld [vmem:[#allocation10 + $0x68] sm:$0xff] }
 0x78a   : > { %3300 = vmatprep.subr.mxu0 %v7122_v27  ;;  %3389 = vmatprep.subr.mxu1 %v8745_v38  ;;  %8754 = vst [vmem:[#allocation56_spill] sm:$0xff] %v7392_v25  ;;  %8755 = vst [vmem:[#allocation53_spill] sm:$0xff] %v7396_v26  ;;  %v7398_v27 = vld [vmem:[#allocation10 + $0x78] sm:$0xff]  ;;  %v7428_v38 = vld [vmem:[#allocation10 + $0x20] sm:$0xff] }
 0x78b   : > { %3301 = vmatpush1.msra.mxu0 %v7128_v29  ;;  %3390 = vmatpush1.msra.mxu1 %v7130_v32  ;;  %8756 = vst [vmem:[#allocation57_spill] sm:$0xff] %v7398_v27  ;;  %v7404_v29 = vld [vmem:[#allocation10 + $0x70] sm:$0xff]  ;;  %v7412_v32 = vld [vmem:[#allocation10 + $0x48] sm:$0xff]  ;;  %8765 = vst [vmem:[#allocation21_spill] sm:$0xff] %v7428_v38 }
 0x78c   : > { %3302 = vmatprep.subr.mxu0 %v7134_v33  ;;  %3391 = vmatprep.subr.mxu1 %v8746_v39  ;;  %8758 = vst [vmem:[#allocation60_spill] sm:$0xff] %v7404_v29  ;;  %8759 = vst [vmem:[#allocation55_spill] sm:$0xff] %v7412_v32  ;;  %v7414_v33 = vld [vmem:[#allocation10 + $0x58] sm:$0xff]  ;;  %v7432_v39 = vld [vmem:[#allocation10 + $0x30] sm:$0xff] }
 0x78d   : > { %3303 = vmatpush1.msra.mxu0 %v7140_v35  ;;  %3392 = vmatpush1.msra.mxu1 %v7142_v30  ;;  %v8748_v30 = vld [vmem:[#allocation46_spill] sm:$0xff]  ;;  %8760 = vst [vmem:[#allocation62_spill] sm:$0xff] %v7414_v33  ;;  %v7416_v35 = vld [vmem:[#allocation10 + $0x40] sm:$0xff]  ;;  %8766 = vst [vmem:[#allocation22_spill] sm:$0xff] %v7432_v39 }
 0x78e   : > { %3304 = vmatprep.subr.mxu0 %v7146_v36  ;;  %3393 = vmatprep.subr.mxu1 %v7148_v62  ;;  %v7256_v62 = vld [vmem:[#allocation10 + $0x1e8] sm:$0xff]  ;;  %v7258_v36 = vld [vmem:[#allocation10 + $0x1f8] sm:$0xff]  ;;  %8761 = vst [vmem:[#allocation59_spill] sm:$0xff] %v7416_v35 }
 0x78f   : > { %3305 = vmatpush1.msra.mxu0 %v7152_v15  ;;  %3338 = vmatprep.mubr.f32.mxu0 %v8726_v31  ;;  %v8749_v15 = vld [vmem:[#allocation48_spill] sm:$0xff]  ;;  %8750 = vst [vmem:[#allocation51_spill] sm:$0xff] %v7256_v62  ;;  %8751 = vst [vmem:[#allocation52_spill] sm:$0xff] %v7258_v36 }
 0x790   : > { %3394 = vmatpush1.msra.mxu1 %v7156_v28  ;;  %3427 = vmatprep.mubr.f32.mxu1 %v8726_v31  ;;  %v7402_v28 = vld [vmem:[#allocation10 + $0x60] sm:$0xff] }
 0x791   : > { %3339 = vmatmul.mubr.f32.vlgmr.msra.gmra.mxu0 %v8747_v40  ;;  %3428 = vmatmul.mubr.f32.vlgmr.msra.gmra.mxu1 %v8747_v40  ;;  %8757 = vst [vmem:[#allocation54_spill] sm:$0xff] %v7402_v28  ;;  %v7434_v40 = vld [vmem:[#allocation10 + $0x8] sm:$0xff] }
 0x792   : > { %3344 = vmatprep.mubr.f32.mxu0 %v8726_v31  ;;  %3433 = vmatprep.mubr.f32.mxu1 %v8726_v31  ;;  %8767 = vst [vmem:[#allocation23_spill] sm:$0xff] %v7434_v40 }
 0x793   : > { %3536 = vmatprep.subr.mxu0 %v7256_v62  ;;  %3607 = vmatprep.subr.mxu1 %v7258_v36 }
 0x794   : > { %3537 = vmatpush1.msra.mxu0 %v7262_v41  ;;  %3608 = vmatpush1.msra.mxu1 %v7264_v37 }
 0x795   : > { %3345 = vmatmul.mubr.f32.gmra.mxu0 %v8748_v30  ;;  %3434 = vmatmul.mubr.f32.gmra.mxu1 %v8748_v30  ;;  %v7436_v30 = vld [vmem:[#allocation10 + $0x18] sm:$0xff] }
 0x796   : > { %3350 = vmatprep.mubr.f32.mxu0 %v8726_v31  ;;  %3439 = vmatprep.mubr.f32.mxu1 %v8726_v31  ;;  %8768 = vst [vmem:[#allocation24_spill] sm:$0xff] %v7436_v30 }
 0x797   : > { %3538 = vmatprep.subr.mxu0 %v7268_v42  ;;  %3609 = vmatprep.subr.mxu1 %v7270_v43 }
 0x798   : > { %3539 = vmatpush1.msra.mxu0 %v7274_v44  ;;  %3610 = vmatpush1.msra.mxu1 %v7276_v45 }
 0x799   : > { %3351 = vmatmul.mubr.f32.gmra.mxu0 %v8749_v15  ;;  %3440 = vmatmul.mubr.f32.gmra.mxu1 %v8749_v15  ;;  %v7440_v15 = vld [vmem:[#allocation10] sm:$0xff] }
 0x79a   : > { %3356 = vmatprep.mubr.f32.mxu0 %v8726_v31  ;;  %3445 = vmatprep.mubr.f32.mxu1 %v8726_v31  ;;  %8769 = vst [vmem:[#allocation25_spill] sm:$0xff] %v7440_v15 }
 0x79b   : > { %3540 = vmatprep.subr.mxu0 %v7278_v46  ;;  %3611 = vmatprep.subr.mxu1 %v7282_v47 }
 0x79c   : > { %3541 = vmatpush1.msra.mxu0 %v7284_v48  ;;  %3612 = vmatpush1.msra.mxu1 %v7286_v49 }
 0x79d   : > { %3542 = vmatprep.subr.mxu0 %v7290_v51  ;;  %3613 = vmatprep.subr.mxu1 %v7292_v52 }
 0x79e   : > { %3543 = vmatpush1.msra.mxu0 %v7294_v53  ;;  %3614 = vmatpush1.msra.mxu1 %v7298_v54 }
 0x79f   : > { %3544 = vmatprep.subr.mxu0 %v7300_v55  ;;  %3615 = vmatprep.subr.mxu1 %v7302_v7 }
 0x7a0   : > { %3545 = vmatpush1.msra.mxu0 %v7306_v10  ;;  %3616 = vmatpush1.msra.mxu1 %v7308_v60 }
 0x7a1   : > { %3546 = vmatprep.subr.mxu0 %v7312_v57  ;;  %3617 = vmatprep.subr.mxu1 %v7314_v13 }
 0x7a2   : > { %3547 = vmatpush1.msra.mxu0 %v7318_v1  ;;  %3618 = vmatpush1.msra.mxu1 %v7320_v12 }
 0x7a3   : > { %3548 = vmatprep.subr.mxu0 %v7324_v11  ;;  %3619 = vmatprep.subr.mxu1 %v7326_v59 }
 0x7a4   : > { %3549 = vmatpush1.msra.mxu0 %v7330_v56  ;;  %3620 = vmatpush1.msra.mxu1 %v7332_v6 }
 0x7a5   : > { %3550 = vmatprep.subr.mxu0 %v7336_v5  ;;  %3621 = vmatprep.subr.mxu1 %v7338_v50 }
 0x7a6   : > { %3551 = vmatpush1.msra.mxu0 %v7342_v16  ;;  %3622 = vmatpush1.msra.mxu1 %v7344_v9 }
 0x7a7   : > { %3552 = vmatprep.subr.mxu0 %v7348_v61  ;;  %3623 = vmatprep.subr.mxu1 %v7350_v63 }
 0x7a8   : > { %3553 = vmatpush1.msra.mxu0 %v7354_v4  ;;  %3624 = vmatpush1.msra.mxu1 %v7356_v2 }
 0x7a9   : > { %3554 = vmatprep.subr.mxu0 %v7360_v58  ;;  %3625 = vmatprep.subr.mxu1 %v7362_v0 }
 0x7aa   : > { %3555 = vmatpush1.msra.mxu0 %v7366_v17  ;;  %3626 = vmatpush1.msra.mxu1 %v7368_v18 }
 0x7ab   : > { %3556 = vmatprep.subr.mxu0 %v7372_v19  ;;  %3627 = vmatprep.subr.mxu1 %v7374_v20 }
 0x7ac   : > { %3557 = vmatpush1.msra.mxu0 %v7378_v21  ;;  %3628 = vmatpush1.msra.mxu1 %v7380_v22 }
 0x7ad   : > { %3558 = vmatprep.subr.mxu0 %v7384_v8  ;;  %3629 = vmatprep.subr.mxu1 %v7386_v23 }
 0x7ae   : > { %3559 = vmatpush1.msra.mxu0 %v7390_v24  ;;  %3630 = vmatpush1.msra.mxu1 %v7392_v25 }
 0x7af   : > { %3560 = vmatprep.subr.mxu0 %v7396_v26  ;;  %3631 = vmatprep.subr.mxu1 %v7398_v27 }
 0x7b0   : > { %3561 = vmatpush1.msra.mxu0 %v7402_v28  ;;  %3632 = vmatpush1.msra.mxu1 %v7404_v29 }
 0x7b1   : > { %3562 = vmatprep.subr.mxu0 %v7412_v32  ;;  %3633 = vmatprep.subr.mxu1 %v7414_v33  ;;  %v8772_v32 = vld [vmem:[#allocation70_spill] sm:$0xff] }
 0x7b2   : > { %3563 = vmatpush1.msra.mxu0 %v7416_v35  ;;  %3634 = vmatpush1.msra.mxu1 %v7420_v34  ;;  %v7442_v34 = vld [vmem:[#allocation10 + $0x10] sm:$0xff] }
 0x7b3   : > { %3564 = vmatprep.subr.mxu0 %v7424_v14  ;;  %3635 = vmatprep.subr.mxu1 %v7426_v3  ;;  %8770 = vst [vmem:[#allocation26_spill] sm:$0xff] %v7442_v34 }
 0x7b4   : > { %3565 = vmatpush1.msra.mxu0 %v7428_v38  ;;  %3636 = vmatpush1.msra.mxu1 %v7432_v39  ;;  %v8771_v38 = vld [vmem:[#allocation68_spill] sm:$0xff] }
 0x7b5   : > { %3566 = vmatprep.subr.mxu0 %v7434_v40  ;;  %3637 = vmatprep.subr.mxu1 %v7436_v30  ;;  %v8773_v40 = vld [vmem:[#allocation71_spill] sm:$0xff] }
 0x7b6   : > { %3567 = vmatpush1.msra.mxu0 %v7440_v15  ;;  %3638 = vmatpush1.msra.mxu1 %v7442_v34  ;;  %v8774_v34 = vld [vmem:[#allocation72_spill] sm:$0xff] }
 0x7b7   : > { %3704 = vmatprep.subr.mxu0 %v7256_v62  ;;  %3775 = vmatprep.subr.mxu1 %v7258_v36 }
 0x808   : > { %v2800_v3 = vpop.f32.mrf.mxu0  ;;  %v2871_v39 = vpop.f32.mrf.mxu1 }
 0x809   : > { %v2876_v14 = vadd.f32 %v2800_v3, %v8771_v38  ;;  %v2878_v28 = vadd.f32 %v2871_v39, %v8773_v40 }
 0x80a   : > { %v2802_v35 = vpop.f32.mrf.mxu0  ;;  %v2873_v15 = vpop.f32.mrf.mxu1 }
 0x80b   : > { %v2880_v33 = vmul.f32 0.5, %v2876_v14  ;;  %v2877_v29 = vadd.f32 %v2802_v35, %v8772_v32  ;;  %v2879_v27 = vadd.f32 %v2873_v15, %v8774_v34  ;;  %v8775_v32 = vld [vmem:[#allocation47_spill] sm:$0xff]  ;;  %v8781_v15 = vld [vmem:[#allocation38_spill] sm:$0xff] }
 0x80c   : > { %v8780_v34 = vld [vmem:[#allocation39_spill] sm:$0xff] }
 0x80d   : > { %5285 = vtanh.f32 %v2880_v33  ;;  %v2884_v30 = vmul.f32 0.5, %v2877_v29  ;;  %v2889_v62 = vmul.f32 0.5, %v2879_v27 }
 0x80f   : > { %5287 = vtanh.f32 %v2884_v30 }
 0x810   : > { %5289 = vtanh.f32 %v2878_v28 }
 0x811   : > { %5291 = vtanh.f32 %v2889_v62 }
 0x81a   : > { %v5286_v26 = vpop.eup %5285 }
 0x81b   : > { %v2882_v36 = vmul.f32 0.5, %v5286_v26  ;;  %v2968_v26 = vld [vmem:[%s8322_s6] sm:$0xf] }
 0x81c   : > { %v5288_v25 = vpop.eup %5287 }
 0x81d   : > { %v2883_v24 = vadd.f32 0.5, %v2882_v36  ;;  %v2886_v3 = vmul.f32 0.5, %v5288_v25  ;;  %v5290_v38 = vpop.eup %5289  ;;  %v8779_v25 = vld [vmem:[#allocation37_spill] sm:$0xff] }
 0x81e   : > { %v5292_v39 = vpop.eup %5291 }
 0x81f   : > { %v2887_v14 = vadd.f32 0.5, %v2886_v3  ;;  %v2894_v23 = vmul.f32 %v5290_v38, %v2883_v24  ;;  %v2891_v62 = vmul.f32 0.5, %v5292_v39  ;;  %v7467_v24 = vrot.slane %v2968_v26, %v8779_v25  ;;  %v8782_v38 = vld [vmem:[#allocation40_spill] sm:$0xff] }
 0x820   : > { %v7473_v3 = vrot.slane %v2968_v26, %v8781_v15 }
 0x821   : > { %v2893_v33 = vmul.f32 %v2887_v14, %v8775_v32  ;;  %v7476_v14 = vrot.slane %v2968_v26, %v8782_v38 }
 0x823   : > { %v2895_v35 = vadd.f32 %v2894_v23, %v2893_v33  ;;  %v7470_v23 = vrot.slane %v2968_v26, %v8780_v34 }
 0x825   : > { %5293 = vtanh.f32 %v2895_v35  ;;  %v2892_v35 = vadd.f32 0.5, %v2891_v62 }
 0x829   : > { %v7455_v29 = vpop.f32.mrf.mxu0  ;;  %v7457_v28 = vpop.f32.mrf.mxu1 }
 0x82a   : > { %8776 = vst [vmem:[#allocation27_spill] sm:$0xff] %v7457_v28 }
 0x82b   : > { %v7462_v27 = vpop.f32.mrf.mxu0  ;;  %v7464_v36 = vpop.f32.mrf.mxu1 }
 0x82c   : > { %8777 = vst [vmem:[#allocation28_spill] sm:$0xff] %v7462_v27  ;;  %8778 = vst [vmem:[#allocation29_spill] sm:$0xff] %v7464_v36 }
 0x82f   : > { %v3062_v40 = vpop.f32.mrf.mxu0  ;;  %v3151_v30 = vpop.f32.mrf.mxu1 }
 0x830   : > { %v7479_v32 = vadd.f32 %v3062_v40, %v7467_v24  ;;  %v7482_v33 = vadd.f32 %v3151_v30, %v7470_v23 }
 0x831   : > { %v3064_v39 = vpop.f32.mrf.mxu0  ;;  %v3153_v25 = vpop.f32.mrf.mxu1 }
 0x832   : > { %8783 = vst [vmem:[#allocation30_spill] sm:$0xff] %v7479_v32  ;;  %8784 = vst [vmem:[#allocation31_spill] sm:$0xff] %v7482_v33  ;;  %v5294_v36 = vpop.eup %5293  ;;  %v7485_v34 = vadd.f32 %v3064_v39, %v7473_v3  ;;  %v7488_v28 = vadd.f32 %v3153_v25, %v7476_v14  ;;  %v8807_v33 = vld [vmem:[#allocation20_spill] sm:$0xff]  ;;  %v8809_v32 = vld [vmem:[#allocation22_spill] sm:$0xff] }
 0x833   : > { %v2897_v15 = vmul.f32 %v5294_v36, %v2892_v35 }
 0x834   : > { %8785 = vst [vmem:[#allocation32_spill] sm:$0xff] %v7485_v34  ;;  %8786 = vst [vmem:[#allocation33_spill] sm:$0xff] %v7488_v28  ;;  %v8806_v28 = vld [vmem:[#allocation19_spill] sm:$0xff]  ;;  %v8808_v34 = vld [vmem:[#allocation21_spill] sm:$0xff] }
 0x835   : > { %v3068_v27 = vpop.f32.mrf.mxu0  ;;  %v3157_v26 = vpop.f32.mrf.mxu1  ;;  %3357 = vmatmul.mubr.f32.gmra.mxu0 %v2897_v15  ;;  %3446 = vmatmul.mubr.f32.gmra.mxu1 %v2897_v15 }
 0x836   : > { %v7491_v40 = vadd.f32 %v3068_v27, %v7467_v24  ;;  %v7494_v30 = vadd.f32 %v3157_v26, %v7470_v23  ;;  %3600 = vmatprep.mubr.f32.mxu0 %v8726_v31  ;;  %3671 = vmatprep.mubr.f32.mxu1 %v8726_v31 }
 0x837   : > { %v3070_v62 = vpop.f32.mrf.mxu0  ;;  %v3159_v39 = vpop.f32.mrf.mxu1 }
 0x838   : > { %8787 = vst [vmem:[#allocation34_spill] sm:$0xff] %v7491_v40  ;;  %8788 = vst [vmem:[#allocation35_spill] sm:$0xff] %v7494_v30  ;;  %v7499_v25 = vadd.f32 %v3070_v62, %v7473_v3  ;;  %v7502_v36 = vadd.f32 %v3159_v39, %v7476_v14  ;;  %v8803_v30 = vld [vmem:[#allocation62_spill] sm:$0xff] }
 0x839   : > { %3601 = vmatmul.mubr.f32.vlgmr.msra.gmra.mxu0 %v8726_v31  ;;  %3672 = vmatmul.mubr.f32.vlgmr.msra.gmra.mxu1 %v8726_v31  ;;  %v8805_v40 = vld [vmem:[#allocation18_spill] sm:$0xff] }
 0x83a   : > { %8789 = vst [vmem:[#allocation36_spill] sm:$0xff] %v7499_v25  ;;  %8790 = vst [vmem:[#allocation41_spill] sm:$0xff] %v7502_v36  ;;  %3705 = vmatpush1.msra.mxu0 %v7262_v41  ;;  %3776 = vmatpush1.msra.mxu1 %v7264_v37  ;;  %v8804_v25 = vld [vmem:[#allocation59_spill] sm:$0xff] }
 0x83b   : > { %v3074_v27 = vpop.f32.mrf.mxu0  ;;  %v3163_v15 = vpop.f32.mrf.mxu1  ;;  %3706 = vmatprep.subr.mxu0 %v7268_v42  ;;  %3777 = vmatprep.subr.mxu1 %v7270_v43 }
 0x83c   : > { %v7511_v35 = vadd.f32 %v3074_v27, %v7467_v24  ;;  %v7514_v26 = vadd.f32 %v3163_v15, %v7470_v23  ;;  %3707 = vmatpush1.msra.mxu0 %v7274_v44  ;;  %3778 = vmatpush1.msra.mxu1 %v7276_v45  ;;  %v8795_v27 = vld [vmem:[#allocation16_spill] sm:$0xff]  ;;  %v8796_v15 = vld [vmem:[#allocation17_spill] sm:$0xff] }
 0x83d   : > { %v3076_v62 = vpop.f32.mrf.mxu0  ;;  %v3165_v39 = vpop.f32.mrf.mxu1  ;;  %3708 = vmatprep.subr.mxu0 %v7278_v46  ;;  %3779 = vmatprep.subr.mxu1 %v7282_v47 }
 0x83e   : > { %8791 = vst [vmem:[#allocation42_spill] sm:$0xff] %v7511_v35  ;;  %8792 = vst [vmem:[#allocation58_spill] sm:$0xff] %v7514_v26  ;;  %v7521_v38 = vadd.f32 %v3076_v62, %v7473_v3  ;;  %v7524_v36 = vadd.f32 %v3165_v39, %v7476_v14  ;;  %3709 = vmatpush1.msra.mxu0 %v7284_v48  ;;  %3780 = vmatpush1.msra.mxu1 %v7286_v49  ;;  %v8797_v62 = vld [vmem:[#allocation56_spill] sm:$0xff]  ;;  %v8798_v39 = vld [vmem:[#allocation53_spill] sm:$0xff] }
 0x83f   : > { %3710 = vmatprep.subr.mxu0 %v7290_v51  ;;  %3781 = vmatprep.subr.mxu1 %v7292_v52  ;;  %v8800_v26 = vld [vmem:[#allocation54_spill] sm:$0xff]  ;;  %v8802_v35 = vld [vmem:[#allocation55_spill] sm:$0xff] }
 0x840   : > { %8793 = vst [vmem:[#allocation61_spill] sm:$0xff] %v7521_v38  ;;  %8794 = vst [vmem:[#allocation63_spill] sm:$0xff] %v7524_v36  ;;  %3711 = vmatpush1.msra.mxu0 %v7294_v53  ;;  %3782 = vmatpush1.msra.mxu1 %v7298_v54  ;;  %v8799_v36 = vld [vmem:[#allocation57_spill] sm:$0xff]  ;;  %v8801_v38 = vld [vmem:[#allocation60_spill] sm:$0xff] }
 0x841   : > { %3712 = vmatprep.subr.mxu0 %v7300_v55  ;;  %3783 = vmatprep.subr.mxu1 %v7302_v7 }
 0x842   : > { %3713 = vmatpush1.msra.mxu0 %v7306_v10  ;;  %3784 = vmatpush1.msra.mxu1 %v7308_v60 }
 0x843   : > { %3714 = vmatprep.subr.mxu0 %v7312_v57  ;;  %3785 = vmatprep.subr.mxu1 %v7314_v13 }
 0x844   : > { %3715 = vmatpush1.msra.mxu0 %v7318_v1  ;;  %3786 = vmatpush1.msra.mxu1 %v7320_v12 }
 0x845   : > { %3716 = vmatprep.subr.mxu0 %v7324_v11  ;;  %3787 = vmatprep.subr.mxu1 %v7326_v59 }
 0x846   : > { %3717 = vmatpush1.msra.mxu0 %v7330_v56  ;;  %3788 = vmatpush1.msra.mxu1 %v7332_v6 }
 0x847   : > { %3718 = vmatprep.subr.mxu0 %v7336_v5  ;;  %3789 = vmatprep.subr.mxu1 %v7338_v50 }
 0x848   : > { %3719 = vmatpush1.msra.mxu0 %v7342_v16  ;;  %3790 = vmatpush1.msra.mxu1 %v7344_v9 }
 0x849   : > { %3720 = vmatprep.subr.mxu0 %v7348_v61  ;;  %3791 = vmatprep.subr.mxu1 %v7350_v63 }
 0x84a   : > { %3721 = vmatpush1.msra.mxu0 %v7354_v4  ;;  %3792 = vmatpush1.msra.mxu1 %v7356_v2 }
 0x84b   : > { %3722 = vmatprep.subr.mxu0 %v7360_v58  ;;  %3793 = vmatprep.subr.mxu1 %v7362_v0 }
 0x84c   : > { %3723 = vmatpush1.msra.mxu0 %v7366_v17  ;;  %3794 = vmatpush1.msra.mxu1 %v7368_v18 }
 0x84d   : > { %3724 = vmatprep.subr.mxu0 %v7372_v19  ;;  %3795 = vmatprep.subr.mxu1 %v7374_v20 }
 0x84e   : > { %3725 = vmatpush1.msra.mxu0 %v7378_v21  ;;  %3796 = vmatpush1.msra.mxu1 %v7380_v22 }
 0x84f   : > { %3726 = vmatprep.subr.mxu0 %v7384_v8  ;;  %3797 = vmatprep.subr.mxu1 %v8795_v27 }
 0x850   : > { %3727 = vmatpush1.msra.mxu0 %v8796_v15  ;;  %3798 = vmatpush1.msra.mxu1 %v8797_v62 }
 0x851   : > { %3728 = vmatprep.subr.mxu0 %v8798_v39  ;;  %3799 = vmatprep.subr.mxu1 %v8799_v36  ;;  %v8810_v36 = vld [vmem:[#allocation23_spill] sm:$0xff] }
 0x852   : > { %3729 = vmatpush1.msra.mxu0 %v8800_v26  ;;  %3800 = vmatpush1.msra.mxu1 %v8801_v38  ;;  %v8811_v26 = vld [vmem:[#allocation24_spill] sm:$0xff]  ;;  %v8812_v38 = vld [vmem:[#allocation25_spill] sm:$0xff] }
 0x853   : > { %3730 = vmatprep.subr.mxu0 %v8802_v35  ;;  %3801 = vmatprep.subr.mxu1 %v8803_v30  ;;  %v8813_v30 = vld [vmem:[#allocation26_spill] sm:$0xff] }
 0x854   : > { %3731 = vmatpush1.msra.mxu0 %v8804_v25  ;;  %3802 = vmatpush1.msra.mxu1 %v8805_v40  ;;  %v8814_v40 = vld [vmem:[#allocation51_spill] sm:$0xff] }
 0x855   : > { %3732 = vmatprep.subr.mxu0 %v8806_v28  ;;  %3803 = vmatprep.subr.mxu1 %v8807_v33  ;;  %v8815_v28 = vld [vmem:[#allocation52_spill] sm:$0xff]  ;;  %v7584_v33 = vpop.f32.mrf.mxu0 }
 0x856   : > { %3733 = vmatpush1.msra.mxu0 %v8808_v34  ;;  %3804 = vmatpush1.msra.mxu1 %v8809_v32  ;;  %8816 = vst [vmem:[#allocation65_spill] sm:$0xff] %v7584_v33  ;;  %v7586_v34 = vpop.f32.mrf.mxu1 }
 0x857   : > { %3734 = vmatprep.subr.mxu0 %v8810_v36  ;;  %3805 = vmatprep.subr.mxu1 %v8811_v26  ;;  %8817 = vst [vmem:[#allocation64_spill] sm:$0xff] %v7586_v34  ;;  %v7588_v32 = vpop.f32.mrf.mxu0 }
 0x858   : > { %3735 = vmatpush1.msra.mxu0 %v8812_v38  ;;  %3768 = vmatprep.mubr.f32.mxu0 %v8726_v31  ;;  %8818 = vst [vmem:[#allocation66_spill] sm:$0xff] %v7588_v32  ;;  %v7590_v36 = vpop.f32.mrf.mxu1 }
 0x859   : > { %3806 = vmatpush1.msra.mxu1 %v8813_v30  ;;  %3839 = vmatprep.mubr.f32.mxu1 %v8726_v31  ;;  %8819 = vst [vmem:[#allocation67_spill] sm:$0xff] %v7590_v36  ;;  %v7592_v26 = vpop.f32.mrf.mxu0 }
 0x85a   : > { %3872 = vmatprep.subr.mxu0 %v8814_v40  ;;  %3943 = vmatprep.subr.mxu1 %v8815_v28  ;;  %8820 = vst [vmem:[#allocation69_spill] sm:$0xff] %v7592_v26  ;;  %v7594_v38 = vpop.f32.mrf.mxu1 }
 0x85b   : > { %8821 = vst [vmem:[#allocation73_spill] sm:$0xff] %v7594_v38  ;;  %v7596_v25 = vpop.f32.mrf.mxu0  ;;  %v3057_v38 = vadd.f32 %v7455_v29, %v7467_v24  ;;  %v8834_v29 = vld [vmem:[#allocation29_spill] sm:$0xff] }
 0x85c   : > { %8822 = vst [vmem:[#allocation15_spill] sm:$0xff] %v7596_v25  ;;  %v7598_v30 = vpop.f32.mrf.mxu1  ;;  %v3148_v24 = vadd.f32 %v8834_v29, %v7476_v14  ;;  %v8839_v29 = vld [vmem:[#allocation57_spill] sm:$0xff] }
 0x85d   : > { %8823 = vst [vmem:[#allocation43_spill] sm:$0xff] %v7598_v30  ;;  %v7600_v31 = vpop.f32.mrf.mxu0 }
 0x85e   : > { %8824 = vst [vmem:[#allocation44_spill] sm:$0xff] %v7600_v31  ;;  %v7602_v40 = vpop.f32.mrf.mxu1  ;;  %v8832_v31 = vld [vmem:[#allocation28_spill] sm:$0xff] }
 0x85f   : > { %8825 = vst [vmem:[#allocation49_spill] sm:$0xff] %v7602_v40  ;;  %v7604_v28 = vpop.f32.mrf.mxu0  ;;  %v3059_v26 = vadd.f32 %v8832_v31, %v7473_v3 }
 0x860   : > { %8826 = vst [vmem:[#allocation50_spill] sm:$0xff] %v7604_v28  ;;  %v7606_v33 = vpop.f32.mrf.mxu1 }
 0x861   : > { %8827 = vst [vmem:[#allocation45_spill] sm:$0xff] %v7606_v33 }
 0x8f5   : > { %v7608_v34 = vpop.f32.mrf.mxu0  ;;  %v7610_v32 = vpop.f32.mrf.mxu1 }
 0x8f6   : > { %8828 = vst [vmem:[#allocation46_spill] sm:$0xff] %v7608_v34  ;;  %8829 = vst [vmem:[#allocation48_spill] sm:$0xff] %v7610_v32  ;;  %v8833_v34 = vld [vmem:[#allocation27_spill] sm:$0xff] }
 0x8f7   : > { %v7612_v36 = vpop.f32.mrf.mxu0  ;;  %v7616_v25 = vpop.f32.mrf.mxu1  ;;  %v3146_v62 = vadd.f32 %v8833_v34, %v7470_v23 }
 0x8f8   : > { %8830 = vst [vmem:[#allocation68_spill] sm:$0xff] %v7612_v36  ;;  %8831 = vst [vmem:[#allocation70_spill] sm:$0xff] %v7616_v25 }
 0x8f9   : > { %v3602_v30 = vpop.f32.mrf.mxu0  ;;  %v3673_v33 = vpop.f32.mrf.mxu1 }
 0x8fa   : > { %v3678_v40 = vadd.f32 %v3602_v30, %v3057_v38  ;;  %v3680_v36 = vadd.f32 %v3673_v33, %v3146_v62  ;;  %v8837_v62 = vld [vmem:[#allocation56_spill] sm:$0xff] }
 0x8fb   : > { %v3604_v35 = vpop.f32.mrf.mxu0  ;;  %v3675_v15 = vpop.f32.mrf.mxu1 }
 0x8fc   : > { %v3682_v28 = vmul.f32 0.5, %v3678_v40  ;;  %v3679_v39 = vadd.f32 %v3604_v35, %v3059_v26  ;;  %v3681_v25 = vadd.f32 %v3675_v15, %v3148_v24  ;;  %v8840_v24 = vld [vmem:[#allocation54_spill] sm:$0xff] }
 0x8fe   : > { %5295 = vtanh.f32 %v3682_v28  ;;  %v3686_v32 = vmul.f32 0.5, %v3679_v39  ;;  %v3691_v27 = vmul.f32 0.5, %v3681_v25  ;;  %v8835_v25 = vld [vmem:[#allocation16_spill] sm:$0xff]  ;;  %v8838_v39 = vld [vmem:[#allocation53_spill] sm:$0xff] }
 0x900   : > { %5297 = vtanh.f32 %v3686_v32 }
 0x901   : > { %5299 = vtanh.f32 %v3680_v36 }
 0x902   : > { %5301 = vtanh.f32 %v3691_v27  ;;  %v8836_v27 = vld [vmem:[#allocation17_spill] sm:$0xff] }
 0x90b   : > { %v5296_v31 = vpop.eup %5295 }
 0x90c   : > { %v3684_v3 = vmul.f32 0.5, %v5296_v31  ;;  %v8841_v31 = vld [vmem:[#allocation60_spill] sm:$0xff] }
 0x90d   : > { %v5298_v38 = vpop.eup %5297 }
 0x90e   : > { %v3685_v40 = vadd.f32 0.5, %v3684_v3  ;;  %v3688_v30 = vmul.f32 0.5, %v5298_v38  ;;  %v5300_v26 = vpop.eup %5299  ;;  %v8842_v3 = vld [vmem:[#allocation55_spill] sm:$0xff]  ;;  %v8843_v38 = vld [vmem:[#allocation62_spill] sm:$0xff] }
 0x90f   : > { %v5302_v32 = vpop.eup %5301 }
 0x910   : > { %v3689_v35 = vadd.f32 0.5, %v3688_v30  ;;  %v3696_v28 = vmul.f32 %v5300_v26, %v3685_v40  ;;  %v3693_v33 = vmul.f32 0.5, %v5302_v32  ;;  %v8844_v40 = vld [vmem:[#allocation59_spill] sm:$0xff]  ;;  %v8845_v30 = vld [vmem:[#allocation18_spill] sm:$0xff]  ;;  %v8847_v26 = vld [vmem:[#allocation20_spill] sm:$0xff] }
 0x911   : > { %v8850_v32 = vld [vmem:[#allocation23_spill] sm:$0xff] }
 0x912   : > { %v3695_v34 = vmul.f32 0.0, %v3689_v35  ;;  %v3694_v14 = vadd.f32 0.5, %v3693_v33  ;;  %v8846_v35 = vld [vmem:[#allocation19_spill] sm:$0xff]  ;;  %v8851_v33 = vld [vmem:[#allocation24_spill] sm:$0xff] }
 0x914   : > { %v7624_v23 = vadd.f32 %v3696_v28, %v3695_v34  ;;  %v8848_v34 = vld [vmem:[#allocation21_spill] sm:$0xff]  ;;  %v8849_v28 = vld [vmem:[#allocation22_spill] sm:$0xff] }
 0x916   : > { %5303 = vtanh.f32 %v7624_v23 }
 0x923   : > { %v5304_v36 = vpop.eup %5303 }
 0x924   : > { %v3699_v15 = vmul.f32 %v5304_v36, %v3694_v14  ;;  %v8852_v14 = vld [vmem:[#allocation25_spill] sm:$0xff]  ;;  %v8853_v36 = vmov 0.0  }
 0x926   : > { %3769 = vmatmul.mubr.f32.vlgmr.msra.gmra.mxu0 %v3699_v15  ;;  %3840 = vmatmul.mubr.f32.vlgmr.msra.gmra.mxu1 %v3699_v15  ;;  %v8854_v15 = vld [vmem:[#allocation26_spill] sm:$0xff] }
 0x927   : > { %3873 = vmatpush1.msra.mxu0 %v7262_v41  ;;  %3944 = vmatpush1.msra.mxu1 %v7264_v37 }
 0x928   : > { %3874 = vmatprep.subr.mxu0 %v7268_v42  ;;  %3945 = vmatprep.subr.mxu1 %v7270_v43 }
 0x929   : > { %3875 = vmatpush1.msra.mxu0 %v7274_v44  ;;  %3946 = vmatpush1.msra.mxu1 %v7276_v45 }
 0x92a   : > { %3876 = vmatprep.subr.mxu0 %v7278_v46  ;;  %3947 = vmatprep.subr.mxu1 %v7282_v47 }
 0x92b   : > { %3877 = vmatpush1.msra.mxu0 %v7284_v48  ;;  %3948 = vmatpush1.msra.mxu1 %v7286_v49 }
 0x92c   : > { %3878 = vmatprep.subr.mxu0 %v7290_v51  ;;  %3949 = vmatprep.subr.mxu1 %v7292_v52 }
 0x92d   : > { %3879 = vmatpush1.msra.mxu0 %v7294_v53  ;;  %3950 = vmatpush1.msra.mxu1 %v7298_v54 }
 0x92e   : > { %3880 = vmatprep.subr.mxu0 %v7300_v55  ;;  %3951 = vmatprep.subr.mxu1 %v7302_v7 }
 0x92f   : > { %3881 = vmatpush1.msra.mxu0 %v7306_v10  ;;  %3952 = vmatpush1.msra.mxu1 %v7308_v60 }
 0x930   : > { %3882 = vmatprep.subr.mxu0 %v7312_v57  ;;  %3953 = vmatprep.subr.mxu1 %v7314_v13 }
 0x931   : > { %3883 = vmatpush1.msra.mxu0 %v7318_v1  ;;  %3954 = vmatpush1.msra.mxu1 %v7320_v12 }
 0x932   : > { %3884 = vmatprep.subr.mxu0 %v7324_v11  ;;  %3955 = vmatprep.subr.mxu1 %v7326_v59 }
 0x933   : > { %3885 = vmatpush1.msra.mxu0 %v7330_v56  ;;  %3956 = vmatpush1.msra.mxu1 %v7332_v6 }
 0x934   : > { %3886 = vmatprep.subr.mxu0 %v7336_v5  ;;  %3957 = vmatprep.subr.mxu1 %v7338_v50 }
 0x935   : > { %3887 = vmatpush1.msra.mxu0 %v7342_v16  ;;  %3958 = vmatpush1.msra.mxu1 %v7344_v9 }
 0x936   : > { %3888 = vmatprep.subr.mxu0 %v7348_v61  ;;  %3959 = vmatprep.subr.mxu1 %v7350_v63 }
 0x937   : > { %3889 = vmatpush1.msra.mxu0 %v7354_v4  ;;  %3960 = vmatpush1.msra.mxu1 %v7356_v2 }
 0x938   : > { %3890 = vmatprep.subr.mxu0 %v7360_v58  ;;  %3961 = vmatprep.subr.mxu1 %v7362_v0 }
 0x939   : > { %3891 = vmatpush1.msra.mxu0 %v7366_v17  ;;  %3962 = vmatpush1.msra.mxu1 %v7368_v18 }
 0x93a   : > { %3892 = vmatprep.subr.mxu0 %v7372_v19  ;;  %3963 = vmatprep.subr.mxu1 %v7374_v20 }
 0x93b   : > { %3893 = vmatpush1.msra.mxu0 %v7378_v21  ;;  %3964 = vmatpush1.msra.mxu1 %v7380_v22 }
 0x93c   : > { %3894 = vmatprep.subr.mxu0 %v7384_v8  ;;  %3965 = vmatprep.subr.mxu1 %v8835_v25 }
 0x93d   : > { %3895 = vmatpush1.msra.mxu0 %v8836_v27  ;;  %3966 = vmatpush1.msra.mxu1 %v8837_v62 }
 0x93e   : > { %3896 = vmatprep.subr.mxu0 %v8838_v39  ;;  %3967 = vmatprep.subr.mxu1 %v8839_v29 }
 0x93f   : > { %3897 = vmatpush1.msra.mxu0 %v8840_v24  ;;  %3968 = vmatpush1.msra.mxu1 %v8841_v31 }
 0x940   : > { %3898 = vmatprep.subr.mxu0 %v8842_v3  ;;  %3969 = vmatprep.subr.mxu1 %v8843_v38  ;;  %v8858_v3 = vld [vmem:[#allocation32_spill] sm:$0xff] }
 0x941   : > { %3899 = vmatpush1.msra.mxu0 %v8844_v40  ;;  %3970 = vmatpush1.msra.mxu1 %v8845_v30  ;;  %v8855_v30 = vld [vmem:[#allocation51_spill] sm:$0xff] }
 0x942   : > { %3900 = vmatprep.subr.mxu0 %v8846_v35  ;;  %3971 = vmatprep.subr.mxu1 %v8847_v26  ;;  %v8856_v35 = vld [vmem:[#allocation52_spill] sm:$0xff] }
 0x943   : > { %3901 = vmatpush1.msra.mxu0 %v8848_v34  ;;  %3972 = vmatpush1.msra.mxu1 %v8849_v28  ;;  %v8857_v34 = vld [vmem:[#allocation30_spill] sm:$0xff] }
 0x944   : > { %3902 = vmatprep.subr.mxu0 %v8850_v32  ;;  %3973 = vmatprep.subr.mxu1 %v8851_v33 }
 0x945   : > { %3903 = vmatpush1.msra.mxu0 %v8852_v14  ;;  %3936 = vmatprep.mubr.f32.mxu0 %v8853_v36  ;;  %v8859_v14 = vld [vmem:[#allocation31_spill] sm:$0xff] }
 0x946   : > { %3974 = vmatpush1.msra.mxu1 %v8854_v15  ;;  %4007 = vmatprep.mubr.f32.mxu1 %v8853_v36  ;;  %v8860_v36 = vld [vmem:[#allocation33_spill] sm:$0xff] }
 0x947   : > { %4040 = vmatprep.subr.mxu0 %v8855_v30  ;;  %4111 = vmatprep.subr.mxu1 %v8856_v35 }
 0x9e6   : > { %v3770_v26 = vpop.f32.mrf.mxu0  ;;  %v3841_v28 = vpop.f32.mrf.mxu1 }
 0x9e7   : > { %v3846_v40 = vadd.f32 %v3770_v26, %v8857_v34  ;;  %v3848_v31 = vadd.f32 %v3841_v28, %v8859_v14  ;;  %v8871_v14 = vld [vmem:[#allocation18_spill] sm:$0xff] }
 0x9e8   : > { %v3772_v38 = vpop.f32.mrf.mxu0  ;;  %v3843_v15 = vpop.f32.mrf.mxu1 }
 0x9e9   : > { %v3850_v32 = vmul.f32 0.5, %v3846_v40  ;;  %v3847_v33 = vadd.f32 %v3772_v38, %v8858_v3  ;;  %v3849_v29 = vadd.f32 %v3843_v15, %v8860_v36  ;;  %v8872_v36 = vld [vmem:[#allocation19_spill] sm:$0xff]  ;;  %v8873_v15 = vld [vmem:[#allocation20_spill] sm:$0xff] }
 0x9eb   : > { %5305 = vtanh.f32 %v3850_v32  ;;  %v3854_v24 = vmul.f32 0.5, %v3847_v33  ;;  %v3859_v30 = vmul.f32 0.5, %v3849_v29  ;;  %v8870_v33 = vld [vmem:[#allocation59_spill] sm:$0xff] }
 0x9ed   : > { %5307 = vtanh.f32 %v3854_v24 }
 0x9ee   : > { %5309 = vtanh.f32 %v3848_v31 }
 0x9ef   : > { %5311 = vtanh.f32 %v3859_v30  ;;  %v8868_v30 = vld [vmem:[#allocation55_spill] sm:$0xff] }
 0x9f8   : > { %v5306_v39 = vpop.eup %5305 }
 0x9f9   : > { %v3852_v35 = vmul.f32 0.5, %v5306_v39  ;;  %v8867_v39 = vld [vmem:[#allocation60_spill] sm:$0xff] }
 0x9fa   : > { %v5308_v62 = vpop.eup %5307 }
 0x9fb   : > { %v3853_v27 = vadd.f32 0.5, %v3852_v35  ;;  %v3856_v26 = vmul.f32 0.5, %v5308_v62  ;;  %v5310_v34 = vpop.eup %5309  ;;  %v8866_v62 = vld [vmem:[#allocation54_spill] sm:$0xff] }
 0x9fc   : > { %v5312_v24 = vpop.eup %5311  ;;  %v8869_v35 = vld [vmem:[#allocation62_spill] sm:$0xff] }
 0x9fd   : > { %v3857_v40 = vadd.f32 0.5, %v3856_v26  ;;  %v3864_v25 = vmul.f32 %v5310_v34, %v3853_v27  ;;  %v3861_v31 = vmul.f32 0.5, %v5312_v24  ;;  %v8865_v27 = vld [vmem:[#allocation57_spill] sm:$0xff]  ;;  %v8875_v34 = vld [vmem:[#allocation22_spill] sm:$0xff] }
 0x9fe   : > { %v8874_v26 = vld [vmem:[#allocation21_spill] sm:$0xff] }
 0x9ff   : > { %v3863_v3 = vmul.f32 %v3857_v40, %v7624_v23  ;;  %v3862_v28 = vadd.f32 0.5, %v3861_v31  ;;  %v8863_v23 = vld [vmem:[#allocation56_spill] sm:$0xff]  ;;  %v8876_v40 = vld [vmem:[#allocation23_spill] sm:$0xff]  ;;  %v8878_v24 = vld [vmem:[#allocation25_spill] sm:$0xff]  ;;  %v8879_v31 = vmov 0.0  }
 0xa01   : > { %v7698_v38 = vadd.f32 %v3864_v25, %v3863_v3  ;;  %v8864_v25 = vld [vmem:[#allocation53_spill] sm:$0xff]  ;;  %v8877_v3 = vld [vmem:[#allocation24_spill] sm:$0xff] }
 0xa03   : > { %5313 = vtanh.f32 %v7698_v38 }
 0xa10   : > { %v5314_v32 = vpop.eup %5313 }
 0xa11   : > { %v3867_v29 = vmul.f32 %v5314_v32, %v3862_v28  ;;  %v8880_v28 = vld [vmem:[#allocation26_spill] sm:$0xff]  ;;  %v8881_v32 = vld [vmem:[#allocation51_spill] sm:$0xff] }
 0xa13   : > { %3937 = vmatmul.mubr.f32.vlgmr.msra.gmra.mxu0 %v3867_v29  ;;  %4008 = vmatmul.mubr.f32.vlgmr.msra.gmra.mxu1 %v3867_v29  ;;  %v8882_v29 = vld [vmem:[#allocation52_spill] sm:$0xff] }
 0xa14   : > { %4041 = vmatpush1.msra.mxu0 %v7262_v41  ;;  %4112 = vmatpush1.msra.mxu1 %v7264_v37  ;;  %v8861_v41 = vld [vmem:[#allocation16_spill] sm:$0xff]  ;;  %v8862_v37 = vld [vmem:[#allocation17_spill] sm:$0xff] }
 0xa15   : > { %4042 = vmatprep.subr.mxu0 %v7268_v42  ;;  %4113 = vmatprep.subr.mxu1 %v7270_v43 }
 0xa16   : > { %4043 = vmatpush1.msra.mxu0 %v7274_v44  ;;  %4114 = vmatpush1.msra.mxu1 %v7276_v45 }
 0xa17   : > { %4044 = vmatprep.subr.mxu0 %v7278_v46  ;;  %4115 = vmatprep.subr.mxu1 %v7282_v47 }
 0xa18   : > { %4045 = vmatpush1.msra.mxu0 %v7284_v48  ;;  %4116 = vmatpush1.msra.mxu1 %v7286_v49 }
 0xa19   : > { %4046 = vmatprep.subr.mxu0 %v7290_v51  ;;  %4117 = vmatprep.subr.mxu1 %v7292_v52 }
 0xa1a   : > { %4047 = vmatpush1.msra.mxu0 %v7294_v53  ;;  %4118 = vmatpush1.msra.mxu1 %v7298_v54 }
 0xa1b   : > { %4048 = vmatprep.subr.mxu0 %v7300_v55  ;;  %4119 = vmatprep.subr.mxu1 %v7302_v7 }
 0xa1c   : > { %4049 = vmatpush1.msra.mxu0 %v7306_v10  ;;  %4120 = vmatpush1.msra.mxu1 %v7308_v60 }
 0xa1d   : > { %4050 = vmatprep.subr.mxu0 %v7312_v57  ;;  %4121 = vmatprep.subr.mxu1 %v7314_v13 }
 0xa1e   : > { %4051 = vmatpush1.msra.mxu0 %v7318_v1  ;;  %4122 = vmatpush1.msra.mxu1 %v7320_v12 }
 0xa1f   : > { %4052 = vmatprep.subr.mxu0 %v7324_v11  ;;  %4123 = vmatprep.subr.mxu1 %v7326_v59 }
 0xa20   : > { %4053 = vmatpush1.msra.mxu0 %v7330_v56  ;;  %4124 = vmatpush1.msra.mxu1 %v7332_v6 }
 0xa21   : > { %4054 = vmatprep.subr.mxu0 %v7336_v5  ;;  %4125 = vmatprep.subr.mxu1 %v7338_v50 }
 0xa22   : > { %4055 = vmatpush1.msra.mxu0 %v7342_v16  ;;  %4126 = vmatpush1.msra.mxu1 %v7344_v9 }
 0xa23   : > { %4056 = vmatprep.subr.mxu0 %v7348_v61  ;;  %4127 = vmatprep.subr.mxu1 %v7350_v63 }
 0xa24   : > { %4057 = vmatpush1.msra.mxu0 %v7354_v4  ;;  %4128 = vmatpush1.msra.mxu1 %v7356_v2 }
 0xa25   : > { %4058 = vmatprep.subr.mxu0 %v7360_v58  ;;  %4129 = vmatprep.subr.mxu1 %v7362_v0 }
 0xa26   : > { %4059 = vmatpush1.msra.mxu0 %v7366_v17  ;;  %4130 = vmatpush1.msra.mxu1 %v7368_v18 }
 0xa27   : > { %4060 = vmatprep.subr.mxu0 %v7372_v19  ;;  %4131 = vmatprep.subr.mxu1 %v7374_v20 }
 0xa28   : > { %4061 = vmatpush1.msra.mxu0 %v7378_v21  ;;  %4132 = vmatpush1.msra.mxu1 %v7380_v22 }
 0xa29   : > { %4062 = vmatprep.subr.mxu0 %v7384_v8  ;;  %4133 = vmatprep.subr.mxu1 %v8861_v41 }
 0xa2a   : > { %4063 = vmatpush1.msra.mxu0 %v8862_v37  ;;  %4134 = vmatpush1.msra.mxu1 %v8863_v23 }
 0xa2b   : > { %4064 = vmatprep.subr.mxu0 %v8864_v25  ;;  %4135 = vmatprep.subr.mxu1 %v8865_v27 }
 0xa2c   : > { %4065 = vmatpush1.msra.mxu0 %v8866_v62  ;;  %4136 = vmatpush1.msra.mxu1 %v8867_v39 }
 0xa2d   : > { %4066 = vmatprep.subr.mxu0 %v8868_v30  ;;  %4137 = vmatprep.subr.mxu1 %v8869_v35 }
 0xa2e   : > { %4067 = vmatpush1.msra.mxu0 %v8870_v33  ;;  %4138 = vmatpush1.msra.mxu1 %v8871_v14  ;;  %v8884_v33 = vld [vmem:[#allocation36_spill] sm:$0xff] }
 0xa2f   : > { %4068 = vmatprep.subr.mxu0 %v8872_v36  ;;  %4139 = vmatprep.subr.mxu1 %v8873_v15 }
 0xa30   : > { %4069 = vmatpush1.msra.mxu0 %v8874_v26  ;;  %4140 = vmatpush1.msra.mxu1 %v8875_v34  ;;  %v8883_v26 = vld [vmem:[#allocation34_spill] sm:$0xff] }
 0xa31   : > { %4070 = vmatprep.subr.mxu0 %v8876_v40  ;;  %4141 = vmatprep.subr.mxu1 %v8877_v3 }
 0xa32   : > { %4071 = vmatpush1.msra.mxu0 %v8878_v24  ;;  %4104 = vmatprep.mubr.f32.mxu0 %v8879_v31  ;;  %v8885_v24 = vld [vmem:[#allocation35_spill] sm:$0xff] }
 0xa33   : > { %4142 = vmatpush1.msra.mxu1 %v8880_v28  ;;  %4175 = vmatprep.mubr.f32.mxu1 %v8879_v31  ;;  %v8886_v31 = vld [vmem:[#allocation41_spill] sm:$0xff] }
 0xa34   : > { %4208 = vmatprep.subr.mxu0 %v8881_v32  ;;  %4279 = vmatprep.subr.mxu1 %v8882_v29 }
 0xad3   : > { %v3938_v15 = vpop.f32.mrf.mxu0  ;;  %v4009_v34 = vpop.f32.mrf.mxu1 }
 0xad4   : > { %v4014_v36 = vadd.f32 %v3938_v15, %v8883_v26  ;;  %v4016_v35 = vadd.f32 %v4009_v34, %v8885_v24 }
 0xad5   : > { %v3940_v14 = vpop.f32.mrf.mxu0  ;;  %v4011_v28 = vpop.f32.mrf.mxu1 }
 0xad6   : > { %v4018_v40 = vmul.f32 0.5, %v4014_v36  ;;  %v4015_v3 = vadd.f32 %v3940_v14, %v8884_v33  ;;  %v4017_v39 = vadd.f32 %v4011_v28, %v8886_v31 }
 0xad8   : > { %5315 = vtanh.f32 %v4018_v40  ;;  %v4022_v30 = vmul.f32 0.5, %v4015_v3  ;;  %v4027_v32 = vmul.f32 0.5, %v4017_v39 }
 0xada   : > { %5317 = vtanh.f32 %v4022_v30 }
 0xadb   : > { %5319 = vtanh.f32 %v4016_v35 }
 0xadc   : > { %5321 = vtanh.f32 %v4027_v32  ;;  %v7859_v32 = vld [vmem:[#allocation10 + $0x1c8] sm:$0xff] }
 0xae5   : > { %v5316_v62 = vpop.eup %5315 }
 0xae6   : > { %v4020_v29 = vmul.f32 0.5, %v5316_v62  ;;  %v7775_v62 = vld [vmem:[#allocation10 + $0x1e0] sm:$0xff] }
 0xae7   : > { %v5318_v27 = vpop.eup %5317 }
 0xae8   : > { %v4021_v25 = vadd.f32 0.5, %v4020_v29  ;;  %v4024_v15 = vmul.f32 0.5, %v5318_v27  ;;  %v5320_v26 = vpop.eup %5319  ;;  %v7778_v27 = vld [vmem:[#allocation10 + $0x1f0] sm:$0xff]  ;;  %v7862_v29 = vld [vmem:[#allocation10 + $0x1d8] sm:$0xff] }
 0xae9   : > { %v5322_v30 = vpop.eup %5321 }
 0xaea   : > { %v4025_v36 = vadd.f32 0.5, %v4024_v15  ;;  %v4032_v23 = vmul.f32 %v5320_v26, %v4021_v25  ;;  %v4029_v35 = vmul.f32 0.5, %v5322_v30  ;;  %v7865_v15 = vld [vmem:[#allocation10 + $0x1c0] sm:$0xff]  ;;  %v7868_v26 = vld [vmem:[#allocation10 + $0x1d0] sm:$0xff] }
 0xaeb   : > { %v7880_v30 = vld [vmem:[#allocation10 + $0x1b0] sm:$0xff] }
 0xaec   : > { %v4031_v33 = vmul.f32 %v4025_v36, %v7698_v38  ;;  %v4030_v34 = vadd.f32 0.5, %v4029_v35  ;;  %v7871_v36 = vld [vmem:[#allocation10 + $0x1a8] sm:$0xff] }
 0xaed   : > { %v7883_v35 = vld [vmem:[#allocation10 + $0x188] sm:$0xff] }
 0xaee   : > { %v7772_v14 = vadd.f32 %v4032_v23, %v4031_v33  ;;  %v7874_v33 = vld [vmem:[#allocation10 + $0x1b8] sm:$0xff] }
 0xaf0   : > { %5323 = vtanh.f32 %v7772_v14 }
 0xafd   : > { %v5324_v40 = vpop.eup %5323 }
 0xafe   : > { %v4035_v39 = vmul.f32 %v5324_v40, %v4030_v34  ;;  %v7886_v34 = vld [vmem:[#allocation10 + $0x198] sm:$0xff]  ;;  %v7889_v40 = vld [vmem:[#allocation10 + $0x180] sm:$0xff] }
 0xb00   : > { %4105 = vmatmul.mubr.f32.vlgmr.msra.gmra.mxu0 %v4035_v39  ;;  %4176 = vmatmul.mubr.f32.vlgmr.msra.gmra.mxu1 %v4035_v39  ;;  %v7892_v39 = vld [vmem:[#allocation10 + $0x190] sm:$0xff] }
 0xb01   : > { %4209 = vmatpush1.msra.mxu0 %v7775_v62  ;;  %4280 = vmatpush1.msra.mxu1 %v7778_v27 }
 0xb02   : > { %4210 = vmatprep.subr.mxu0 %v7268_v42  ;;  %4281 = vmatprep.subr.mxu1 %v7270_v43  ;;  %v8887_v42 = vld [vmem:[#allocation56_spill] sm:$0xff]  ;;  %v8888_v43 = vld [vmem:[#allocation53_spill] sm:$0xff] }
 0xb03   : > { %4211 = vmatpush1.msra.mxu0 %v7274_v44  ;;  %4282 = vmatpush1.msra.mxu1 %v7276_v45  ;;  %v8889_v44 = vld [vmem:[#allocation57_spill] sm:$0xff]  ;;  %v8890_v45 = vld [vmem:[#allocation54_spill] sm:$0xff] }
 0xb04   : > { %4212 = vmatprep.subr.mxu0 %v7278_v46  ;;  %4283 = vmatprep.subr.mxu1 %v7282_v47  ;;  %v8891_v46 = vld [vmem:[#allocation60_spill] sm:$0xff]  ;;  %v8892_v47 = vld [vmem:[#allocation55_spill] sm:$0xff] }
 0xb05   : > { %4213 = vmatpush1.msra.mxu0 %v7284_v48  ;;  %4284 = vmatpush1.msra.mxu1 %v7286_v49  ;;  %v8893_v48 = vld [vmem:[#allocation62_spill] sm:$0xff]  ;;  %v8894_v49 = vld [vmem:[#allocation59_spill] sm:$0xff] }
 0xb06   : > { %4214 = vmatprep.subr.mxu0 %v7290_v51  ;;  %4285 = vmatprep.subr.mxu1 %v7292_v52  ;;  %v8895_v51 = vld [vmem:[#allocation18_spill] sm:$0xff]  ;;  %v8896_v52 = vld [vmem:[#allocation19_spill] sm:$0xff] }
 0xb07   : > { %4215 = vmatpush1.msra.mxu0 %v7294_v53  ;;  %4286 = vmatpush1.msra.mxu1 %v7298_v54  ;;  %v8897_v53 = vld [vmem:[#allocation20_spill] sm:$0xff]  ;;  %v8898_v54 = vld [vmem:[#allocation21_spill] sm:$0xff] }
 0xb08   : > { %4216 = vmatprep.subr.mxu0 %v7300_v55  ;;  %4287 = vmatprep.subr.mxu1 %v7302_v7  ;;  %v8899_v55 = vld [vmem:[#allocation22_spill] sm:$0xff]  ;;  %v8900_v7 = vld [vmem:[#allocation23_spill] sm:$0xff] }
 0xb09   : > { %4217 = vmatpush1.msra.mxu0 %v7306_v10  ;;  %4288 = vmatpush1.msra.mxu1 %v7308_v60  ;;  %v8901_v10 = vld [vmem:[#allocation24_spill] sm:$0xff]  ;;  %v8902_v60 = vld [vmem:[#allocation25_spill] sm:$0xff] }
 0xb0a   : > { %4218 = vmatprep.subr.mxu0 %v7312_v57  ;;  %4289 = vmatprep.subr.mxu1 %v7314_v13  ;;  %v8903_v57 = vmov 0.0   ;;  %v8904_v13 = vld [vmem:[#allocation26_spill] sm:$0xff] }
 0xb0b   : > { %4219 = vmatpush1.msra.mxu0 %v7318_v1  ;;  %4290 = vmatpush1.msra.mxu1 %v7320_v12  ;;  %v7843_v1 = vld [vmem:[#allocation10 + $0x1e8] sm:$0xff]  ;;  %v7846_v12 = vld [vmem:[#allocation10 + $0x1f8] sm:$0xff] }
 0xb0c   : > { %4220 = vmatprep.subr.mxu0 %v7324_v11  ;;  %4291 = vmatprep.subr.mxu1 %v7326_v59  ;;  %8905 = vst [vmem:[#allocation71_spill] sm:$0xff] %v7843_v1  ;;  %8906 = vst [vmem:[#allocation72_spill] sm:$0xff] %v7846_v12  ;;  %v8907_v59 = vld [vmem:[#allocation42_spill] sm:$0xff] }
 0xb0d   : > { %4221 = vmatpush1.msra.mxu0 %v7330_v56  ;;  %4292 = vmatpush1.msra.mxu1 %v7332_v6 }
 0xb0e   : > { %4222 = vmatprep.subr.mxu0 %v7336_v5  ;;  %4293 = vmatprep.subr.mxu1 %v7338_v50 }
 0xb0f   : > { %4223 = vmatpush1.msra.mxu0 %v7342_v16  ;;  %4294 = vmatpush1.msra.mxu1 %v7344_v9  ;;  %v8908_v16 = vld [vmem:[#allocation61_spill] sm:$0xff] }
 0xb10   : > { %4224 = vmatprep.subr.mxu0 %v7348_v61  ;;  %4295 = vmatprep.subr.mxu1 %v7350_v63  ;;  %v8909_v61 = vld [vmem:[#allocation58_spill] sm:$0xff] }
 0xb11   : > { %4225 = vmatpush1.msra.mxu0 %v7354_v4  ;;  %4296 = vmatpush1.msra.mxu1 %v7356_v2 }
 0xb12   : > { %4226 = vmatprep.subr.mxu0 %v7360_v58  ;;  %4297 = vmatprep.subr.mxu1 %v7362_v0  ;;  %v8910_v58 = vld [vmem:[#allocation63_spill] sm:$0xff] }
 0xb13   : > { %4227 = vmatpush1.msra.mxu0 %v7366_v17  ;;  %4298 = vmatpush1.msra.mxu1 %v7368_v18 }
 0xb14   : > { %4228 = vmatprep.subr.mxu0 %v7372_v19  ;;  %4299 = vmatprep.subr.mxu1 %v7374_v20 }
 0xb15   : > { %4229 = vmatpush1.msra.mxu0 %v7378_v21  ;;  %4300 = vmatpush1.msra.mxu1 %v7380_v22 }
 0xb16   : > { %4230 = vmatprep.subr.mxu0 %v7384_v8  ;;  %4301 = vmatprep.subr.mxu1 %v8861_v41 }
 0xb17   : > { %4231 = vmatpush1.msra.mxu0 %v8862_v37  ;;  %4302 = vmatpush1.msra.mxu1 %v8887_v42  ;;  %v7895_v42 = vld [vmem:[#allocation10 + $0x168] sm:$0xff] }
 0xb18   : > { %4232 = vmatprep.subr.mxu0 %v8888_v43  ;;  %4303 = vmatprep.subr.mxu1 %v8889_v44  ;;  %v7898_v43 = vld [vmem:[#allocation10 + $0x178] sm:$0xff]  ;;  %v7901_v44 = vld [vmem:[#allocation10 + $0x160] sm:$0xff] }
 0xb19   : > { %4233 = vmatpush1.msra.mxu0 %v8890_v45  ;;  %4304 = vmatpush1.msra.mxu1 %v8891_v46  ;;  %v7904_v45 = vld [vmem:[#allocation10 + $0x170] sm:$0xff]  ;;  %v7907_v46 = vld [vmem:[#allocation10 + $0x148] sm:$0xff] }
 0xb1a   : > { %4234 = vmatprep.subr.mxu0 %v8892_v47  ;;  %4305 = vmatprep.subr.mxu1 %v8893_v48  ;;  %v7910_v47 = vld [vmem:[#allocation10 + $0x158] sm:$0xff]  ;;  %v7913_v48 = vld [vmem:[#allocation10 + $0x140] sm:$0xff] }
 0xb1b   : > { %4235 = vmatpush1.msra.mxu0 %v8894_v49  ;;  %4306 = vmatpush1.msra.mxu1 %v8895_v51  ;;  %v7916_v49 = vld [vmem:[#allocation10 + $0x150] sm:$0xff]  ;;  %v7919_v51 = vld [vmem:[#allocation10 + $0x128] sm:$0xff] }
 0xb1c   : > { %4236 = vmatprep.subr.mxu0 %v8896_v52  ;;  %4307 = vmatprep.subr.mxu1 %v8897_v53  ;;  %v7922_v52 = vld [vmem:[#allocation10 + $0x138] sm:$0xff]  ;;  %v7925_v53 = vld [vmem:[#allocation10 + $0x120] sm:$0xff] }
 0xb1d   : > { %4237 = vmatpush1.msra.mxu0 %v8898_v54  ;;  %4308 = vmatpush1.msra.mxu1 %v8899_v55  ;;  %v7928_v54 = vld [vmem:[#allocation10 + $0x130] sm:$0xff]  ;;  %v7931_v55 = vld [vmem:[#allocation10 + $0x108] sm:$0xff] }
 0xb1e   : > { %4238 = vmatprep.subr.mxu0 %v8900_v7  ;;  %4309 = vmatprep.subr.mxu1 %v8901_v10  ;;  %v7934_v7 = vld [vmem:[#allocation10 + $0x118] sm:$0xff]  ;;  %v7937_v10 = vld [vmem:[#allocation10 + $0x100] sm:$0xff] }
 0xb1f   : > { %4239 = vmatpush1.msra.mxu0 %v8902_v60  ;;  %4272 = vmatprep.mubr.f32.mxu0 %v8903_v57  ;;  %v7940_v60 = vld [vmem:[#allocation10 + $0x110] sm:$0xff] }
 0xb20   : > { %4310 = vmatpush1.msra.mxu1 %v8904_v13  ;;  %4343 = vmatprep.mubr.f32.mxu1 %v8903_v57  ;;  %v7943_v13 = vld [vmem:[#allocation10 + $0xe8] sm:$0xff] }
 0xb21   : > { %4376 = vmatprep.subr.mxu0 %v7843_v1  ;;  %4447 = vmatprep.subr.mxu1 %v7846_v12 }
 0xbc0   : > { %v4106_v11 = vpop.f32.mrf.mxu0  ;;  %v4177_v6 = vpop.f32.mrf.mxu1 }
 0xbc1   : > { %v4182_v56 = vadd.f32 %v4106_v11, %v8907_v59  ;;  %v4184_v63 = vadd.f32 %v4177_v6, %v8909_v61  ;;  %v7946_v11 = vld [vmem:[#allocation10 + $0xf8] sm:$0xff]  ;;  %v7949_v59 = vld [vmem:[#allocation10 + $0xe0] sm:$0xff]  ;;  %v7955_v6 = vld [vmem:[#allocation10 + $0xc8] sm:$0xff] }
 0xbc2   : > { %v4108_v5 = vpop.f32.mrf.mxu0  ;;  %v4179_v2 = vpop.f32.mrf.mxu1  ;;  %v7970_v61 = vld [vmem:[#allocation10 + $0xb8] sm:$0xff] }
 0xbc3   : > { %v4186_v50 = vmul.f32 0.5, %v4182_v56  ;;  %v4183_v9 = vadd.f32 %v4108_v5, %v8908_v16  ;;  %v4185_v0 = vadd.f32 %v4179_v2, %v8910_v58  ;;  %v7952_v56 = vld [vmem:[#allocation10 + $0xf0] sm:$0xff]  ;;  %v7958_v5 = vld [vmem:[#allocation10 + $0xd8] sm:$0xff]  ;;  %v7979_v2 = vld [vmem:[#allocation10 + $0x88] sm:$0xff] }
 0xbc4   : > { %v7964_v16 = vld [vmem:[#allocation10 + $0xd0] sm:$0xff]  ;;  %8912 = vst [vmem:[#allocation28_spill] sm:$0xff] %v7979_v2  ;;  %v7982_v58 = vld [vmem:[#allocation10 + $0x98] sm:$0xff] }
 0xbc5   : > { %5325 = vtanh.f32 %v4186_v50  ;;  %v4190_v4 = vmul.f32 0.5, %v4183_v9  ;;  %v4195_v17 = vmul.f32 0.5, %v4185_v0  ;;  %v7961_v50 = vld [vmem:[#allocation10 + $0xc0] sm:$0xff]  ;;  %v7967_v9 = vld [vmem:[#allocation10 + $0xa8] sm:$0xff]  ;;  %8913 = vst [vmem:[#allocation27_spill] sm:$0xff] %v7982_v58 }
 0xbc6   : > { %v7985_v0 = vld [vmem:[#allocation10 + $0x80] sm:$0xff] }
 0xbc7   : > { %5327 = vtanh.f32 %v4190_v4  ;;  %v7976_v4 = vld [vmem:[#allocation10 + $0xb0] sm:$0xff]  ;;  %8914 = vst [vmem:[#allocation29_spill] sm:$0xff] %v7985_v0 }
 0xbc8   : > { %5329 = vtanh.f32 %v4184_v63  ;;  %v7973_v63 = vld [vmem:[#allocation10 + $0xa0] sm:$0xff]  ;;  %8911 = vst [vmem:[#allocation47_spill] sm:$0xff] %v7976_v4 }
 0xbc9   : > { %5331 = vtanh.f32 %v4195_v17  ;;  %v7988_v17 = vld [vmem:[#allocation10 + $0x90] sm:$0xff] }
 0xbca   : > { %8915 = vst [vmem:[#allocation30_spill] sm:$0xff] %v7988_v17 }
 0xbd2   : > { %v5326_v18 = vpop.eup %5325 }
 0xbd3   : > { %v4188_v19 = vmul.f32 0.5, %v5326_v18  ;;  %v7991_v18 = vld [vmem:[#allocation10 + $0x68] sm:$0xff] }
 0xbd4   : > { %v5328_v20 = vpop.eup %5327  ;;  %8916 = vst [vmem:[#allocation32_spill] sm:$0xff] %v7991_v18 }
 0xbd5   : > { %v4189_v21 = vadd.f32 0.5, %v4188_v19  ;;  %v4192_v22 = vmul.f32 0.5, %v5328_v20  ;;  %v5330_v8 = vpop.eup %5329  ;;  %v7994_v19 = vld [vmem:[#allocation10 + $0x78] sm:$0xff]  ;;  %v7997_v20 = vld [vmem:[#allocation10 + $0x60] sm:$0xff] }
 0xbd6   : > { %v5332_v25 = vpop.eup %5331  ;;  %8917 = vst [vmem:[#allocation31_spill] sm:$0xff] %v7994_v19  ;;  %8918 = vst [vmem:[#allocation33_spill] sm:$0xff] %v7997_v20 }
 0xbd7   : > { %v4193_v38 = vadd.f32 0.5, %v4192_v22  ;;  %v4200_v41 = vmul.f32 %v5330_v8, %v4189_v21  ;;  %v4197_v3 = vmul.f32 0.5, %v5332_v25  ;;  %v8000_v21 = vld [vmem:[#allocation10 + $0x70] sm:$0xff]  ;;  %v8003_v22 = vld [vmem:[#allocation10 + $0x48] sm:$0xff]  ;;  %v8006_v8 = vld [vmem:[#allocation10 + $0x58] sm:$0xff] }
 0xbd8   : > { %8919 = vst [vmem:[#allocation16_spill] sm:$0xff] %v8000_v21  ;;  %8920 = vst [vmem:[#allocation17_spill] sm:$0xff] %v8003_v22  ;;  %v8018_v25 = vld [vmem:[#allocation10 + $0x38] sm:$0xff] }
 0xbd9   : > { %v4199_v37 = vmul.f32 %v4193_v38, %v7772_v14  ;;  %v4198_v24 = vadd.f32 0.5, %v4197_v3  ;;  %v7877_v14 = vld [vmem:[#allocation10 + $0x1a0] sm:$0xff]  ;;  %8921 = vst [vmem:[#allocation51_spill] sm:$0xff] %v8006_v8  ;;  %8925 = vst [vmem:[#allocation35_spill] sm:$0xff] %v8018_v25 }
 0xbda   : > { %v8009_v38 = vld [vmem:[#allocation10 + $0x40] sm:$0xff] }
 0xbdb   : > { %v7854_v23 = vadd.f32 %v4200_v41, %v4199_v37  ;;  %8922 = vst [vmem:[#allocation52_spill] sm:$0xff] %v8009_v38  ;;  %v8012_v41 = vld [vmem:[#allocation10 + $0x50] sm:$0xff]  ;;  %v8015_v37 = vld [vmem:[#allocation10 + $0x28] sm:$0xff]  ;;  %v8021_v3 = vld [vmem:[#allocation10 + $0x20] sm:$0xff] }
 0xbdc   : > { %8923 = vst [vmem:[#allocation34_spill] sm:$0xff] %v8012_v41  ;;  %8924 = vst [vmem:[#allocation36_spill] sm:$0xff] %v8015_v37 }
 0xbdd   : > { %5333 = vtanh.f32 %v7854_v23  ;;  %8926 = vst [vmem:[#allocation41_spill] sm:$0xff] %v8021_v3 }
 0xbea   : > { %v5334_v31 = vpop.eup %5333 }
 0xbeb   : > { %v4203_v28 = vmul.f32 %v5334_v31, %v4198_v24  ;;  %v8024_v24 = vld [vmem:[#allocation10 + $0x30] sm:$0xff]  ;;  %v8027_v31 = vld [vmem:[#allocation10 + $0x8] sm:$0xff] }
 0xbec   : > { %8927 = vst [vmem:[#allocation56_spill] sm:$0xff] %v8024_v24  ;;  %8928 = vst [vmem:[#allocation53_spill] sm:$0xff] %v8027_v31 }
 0xbed   : > { %4273 = vmatmul.mubr.f32.vlgmr.msra.gmra.mxu0 %v4203_v28  ;;  %4344 = vmatmul.mubr.f32.vlgmr.msra.gmra.mxu1 %v4203_v28  ;;  %v8030_v28 = vld [vmem:[#allocation10 + $0x18] sm:$0xff] }
 0xbee   : > { %4377 = vmatpush1.msra.mxu0 %v7775_v62  ;;  %4448 = vmatpush1.msra.mxu1 %v7778_v27  ;;  %8929 = vst [vmem:[#allocation57_spill] sm:$0xff] %v8030_v28 }
 0xbef   : > { %4378 = vmatprep.subr.mxu0 %v7859_v32  ;;  %4449 = vmatprep.subr.mxu1 %v7862_v29 }
 0xbf0   : > { %4379 = vmatpush1.msra.mxu0 %v7865_v15  ;;  %4450 = vmatpush1.msra.mxu1 %v7868_v26 }
 0xbf1   : > { %4380 = vmatprep.subr.mxu0 %v7871_v36  ;;  %4451 = vmatprep.subr.mxu1 %v7874_v33 }
 0xbf2   : > { %4381 = vmatpush1.msra.mxu0 %v7877_v14  ;;  %4452 = vmatpush1.msra.mxu1 %v7880_v30 }
 0xbf3   : > { %4382 = vmatprep.subr.mxu0 %v7883_v35  ;;  %4453 = vmatprep.subr.mxu1 %v7886_v34 }
 0xbf4   : > { %4383 = vmatpush1.msra.mxu0 %v7889_v40  ;;  %4454 = vmatpush1.msra.mxu1 %v7892_v39 }
 0xbf5   : > { %4384 = vmatprep.subr.mxu0 %v7895_v42  ;;  %4455 = vmatprep.subr.mxu1 %v7898_v43 }
 0xbf6   : > { %4385 = vmatpush1.msra.mxu0 %v7901_v44  ;;  %4456 = vmatpush1.msra.mxu1 %v7904_v45 }
 0xbf7   : > { %4386 = vmatprep.subr.mxu0 %v7907_v46  ;;  %4457 = vmatprep.subr.mxu1 %v7910_v47 }
 0xbf8   : > { %4387 = vmatpush1.msra.mxu0 %v7913_v48  ;;  %4458 = vmatpush1.msra.mxu1 %v7916_v49 }
 0xbf9   : > { %4388 = vmatprep.subr.mxu0 %v7919_v51  ;;  %4459 = vmatprep.subr.mxu1 %v7922_v52 }
 0xbfa   : > { %4389 = vmatpush1.msra.mxu0 %v7925_v53  ;;  %4460 = vmatpush1.msra.mxu1 %v7928_v54 }
 0xbfb   : > { %4390 = vmatprep.subr.mxu0 %v7931_v55  ;;  %4461 = vmatprep.subr.mxu1 %v7934_v7 }
 0xbfc   : > { %4391 = vmatpush1.msra.mxu0 %v7937_v10  ;;  %4462 = vmatpush1.msra.mxu1 %v7940_v60 }
 0xbfd   : > { %4392 = vmatprep.subr.mxu0 %v7943_v13  ;;  %4463 = vmatprep.subr.mxu1 %v7946_v11 }
 0xbfe   : > { %4393 = vmatpush1.msra.mxu0 %v7949_v59  ;;  %4464 = vmatpush1.msra.mxu1 %v7952_v56 }
 0xbff   : > { %4394 = vmatprep.subr.mxu0 %v7955_v6  ;;  %4465 = vmatprep.subr.mxu1 %v7958_v5 }
 0xc00   : > { %4395 = vmatpush1.msra.mxu0 %v7961_v50  ;;  %4466 = vmatpush1.msra.mxu1 %v7964_v16 }
 0xc01   : > { %4396 = vmatprep.subr.mxu0 %v7967_v9  ;;  %4467 = vmatprep.subr.mxu1 %v7970_v61 }
 0xc02   : > { %4397 = vmatpush1.msra.mxu0 %v7973_v63  ;;  %4468 = vmatpush1.msra.mxu1 %v7976_v4 }
 0xc03   : > { %4398 = vmatprep.subr.mxu0 %v7979_v2  ;;  %4469 = vmatprep.subr.mxu1 %v7982_v58  ;;  %v8940_v58 = vld [vmem:[#allocation40_spill] sm:$0xff] }
 0xc04   : > { %4399 = vmatpush1.msra.mxu0 %v7985_v0  ;;  %4470 = vmatpush1.msra.mxu1 %v7988_v17 }
 0xc05   : > { %4400 = vmatprep.subr.mxu0 %v7991_v18  ;;  %4471 = vmatprep.subr.mxu1 %v7994_v19  ;;  %v8939_v19 = vld [vmem:[#allocation64_spill] sm:$0xff] }
 0xc06   : > { %4401 = vmatpush1.msra.mxu0 %v7997_v20  ;;  %4472 = vmatpush1.msra.mxu1 %v8000_v21 }
 0xc07   : > { %4402 = vmatprep.subr.mxu0 %v8003_v22  ;;  %4473 = vmatprep.subr.mxu1 %v8006_v8 }
 0xc08   : > { %4403 = vmatpush1.msra.mxu0 %v8009_v38  ;;  %4474 = vmatpush1.msra.mxu1 %v8012_v41  ;;  %v8936_v41 = vld [vmem:[#allocation65_spill] sm:$0xff] }
 0xc09   : > { %4404 = vmatprep.subr.mxu0 %v8015_v37  ;;  %4475 = vmatprep.subr.mxu1 %v8018_v25  ;;  %v8033_v37 = vld [vmem:[#allocation10] sm:$0xff]  ;;  %v8037_v25 = vld [vmem:[#allocation10 + $0x10] sm:$0xff] }
 0xc0a   : > { %4405 = vmatpush1.msra.mxu0 %v8021_v3  ;;  %4476 = vmatpush1.msra.mxu1 %v8024_v24  ;;  %8930 = vst [vmem:[#allocation54_spill] sm:$0xff] %v8033_v37  ;;  %8931 = vst [vmem:[#allocation60_spill] sm:$0xff] %v8037_v25 }
 0xc0b   : > { %4406 = vmatprep.subr.mxu0 %v8027_v31  ;;  %4477 = vmatprep.subr.mxu1 %v8030_v28  ;;  %v3252_v28 = vld [vmem:[%s8322_s6] sm:$0xf]  ;;  %v8932_v31 = vld [vmem:[#allocation37_spill] sm:$0xff] }
 0xc0c   : > { %4407 = vmatpush1.msra.mxu0 %v8033_v37  ;;  %4440 = vmatprep.mubr.f32.mxu0 %v8903_v57  ;;  %v8047_v24 = vrot.slane %v3252_v28, %v8932_v31  ;;  %v8934_v37 = vld [vmem:[#allocation38_spill] sm:$0xff] }
 0xc0d   : > { %4478 = vmatpush1.msra.mxu1 %v8037_v25  ;;  %4511 = vmatprep.mubr.f32.mxu1 %v8903_v57  ;;  %v8050_v3 = vrot.slane %v3252_v28, %v8934_v37  ;;  %v8937_v25 = vld [vmem:[#allocation39_spill] sm:$0xff] }
 0xc0e   : > { %4544 = vmatprep.subr.mxu0 %v7843_v1  ;;  %4615 = vmatprep.subr.mxu1 %v7846_v12  ;;  %8933 = vst [vmem:[#allocation55_spill] sm:$0xff] %v8047_v24  ;;  %v3341_v38 = vadd.f32 %v8936_v41, %v8047_v24  ;;  %v8055_v8 = vrot.slane %v3252_v28, %v8937_v25  ;;  %v8938_v1 = vld [vmem:[#allocation66_spill] sm:$0xff]  ;;  %v8941_v24 = vld [vmem:[#allocation67_spill] sm:$0xff] }
 0xc0f   : > { %8935 = vst [vmem:[#allocation62_spill] sm:$0xff] %v8050_v3  ;;  %v3343_v12 = vadd.f32 %v8938_v1, %v8050_v3  ;;  %v8062_v41 = vrot.slane %v3252_v28, %v8940_v58 }
 0xc10   : > { %v3430_v31 = vadd.f32 %v8939_v19, %v8055_v8 }
 0xc11   : > { %v3432_v1 = vadd.f32 %v8941_v24, %v8062_v41 }
 0xcad   : > { %v4274_v57 = vpop.f32.mrf.mxu0  ;;  %v4345_v21 = vpop.f32.mrf.mxu1 }
 0xcae   : > { %v4350_v22 = vadd.f32 %v4274_v57, %v3341_v38  ;;  %v4352_v37 = vadd.f32 %v4345_v21, %v3430_v31 }
 0xcaf   : > { %v4276_v20 = vpop.f32.mrf.mxu0  ;;  %v4347_v25 = vpop.f32.mrf.mxu1 }
 0xcb0   : > { %v4354_v18 = vmul.f32 0.5, %v4350_v22  ;;  %v4351_v17 = vadd.f32 %v4276_v20, %v3343_v12  ;;  %v4353_v57 = vadd.f32 %v4347_v25, %v3432_v1  ;;  %v8947_v25 = vld [vmem:[#allocation32_spill] sm:$0xff]  ;;  %v8948_v1 = vld [vmem:[#allocation31_spill] sm:$0xff] }
 0xcb2   : > { %5335 = vtanh.f32 %v4354_v18  ;;  %v4358_v0 = vmul.f32 0.5, %v4351_v17  ;;  %v4363_v38 = vmul.f32 0.5, %v4353_v57  ;;  %v8949_v57 = vld [vmem:[#allocation33_spill] sm:$0xff] }
 0xcb4   : > { %5337 = vtanh.f32 %v4358_v0 }
 0xcb5   : > { %5339 = vtanh.f32 %v4352_v37  ;;  %v8946_v37 = vld [vmem:[#allocation30_spill] sm:$0xff] }
 0xcb6   : > { %5341 = vtanh.f32 %v4363_v38  ;;  %v8950_v38 = vld [vmem:[#allocation16_spill] sm:$0xff] }
 0xcbf   : > { %v5336_v3 = vpop.eup %5335 }
 0xcc0   : > { %v4356_v2 = vmul.f32 0.5, %v5336_v3  ;;  %v8945_v3 = vld [vmem:[#allocation29_spill] sm:$0xff] }
 0xcc1   : > { %v5338_v4 = vpop.eup %5337 }
 0xcc2   : > { %v4357_v19 = vadd.f32 0.5, %v4356_v2  ;;  %v4360_v22 = vmul.f32 0.5, %v5338_v4  ;;  %v5340_v12 = vpop.eup %5339  ;;  %v8943_v4 = vld [vmem:[#allocation28_spill] sm:$0xff]  ;;  %v8944_v2 = vld [vmem:[#allocation27_spill] sm:$0xff] }
 0xcc3   : > { %v5342_v0 = vpop.eup %5341 }
 0xcc4   : > { %v4361_v18 = vadd.f32 0.5, %v4360_v22  ;;  %v4368_v17 = vmul.f32 %v5340_v12, %v4357_v19  ;;  %v4365_v21 = vmul.f32 0.5, %v5342_v0  ;;  %v8951_v19 = vld [vmem:[#allocation17_spill] sm:$0xff]  ;;  %v8952_v22 = vld [vmem:[#allocation51_spill] sm:$0xff]  ;;  %v8953_v12 = vld [vmem:[#allocation52_spill] sm:$0xff] }
 0xcc5   : > { %v8957_v0 = vld [vmem:[#allocation41_spill] sm:$0xff] }
 0xcc6   : > { %v4367_v58 = vmul.f32 %v4361_v18, %v7854_v23  ;;  %v4366_v24 = vadd.f32 0.5, %v4365_v21  ;;  %v8942_v23 = vld [vmem:[#allocation47_spill] sm:$0xff]  ;;  %v8954_v18 = vld [vmem:[#allocation34_spill] sm:$0xff]  ;;  %v8958_v21 = vld [vmem:[#allocation56_spill] sm:$0xff] }
 0xcc8   : > { %v8067_v20 = vadd.f32 %v4368_v17, %v4367_v58  ;;  %v8955_v17 = vld [vmem:[#allocation36_spill] sm:$0xff]  ;;  %v8956_v58 = vld [vmem:[#allocation35_spill] sm:$0xff] }
 0xcca   : > { %5343 = vtanh.f32 %v8067_v20 }
 0xcd7   : > { %v5344_v28 = vpop.eup %5343 }
 0xcd8   : > { %v4371_v31 = vmul.f32 %v5344_v28, %v4366_v24  ;;  %v8959_v24 = vld [vmem:[#allocation53_spill] sm:$0xff] }
 0xcd9   : > { %v8960_v28 = vld [vmem:[#allocation57_spill] sm:$0xff] }
 0xcda   : > { %4441 = vmatmul.mubr.f32.vlgmr.msra.gmra.mxu0 %v4371_v31  ;;  %4512 = vmatmul.mubr.f32.vlgmr.msra.gmra.mxu1 %v4371_v31  ;;  %v8961_v31 = vld [vmem:[#allocation54_spill] sm:$0xff] }
 0xcdb   : > { %4545 = vmatpush1.msra.mxu0 %v7775_v62  ;;  %4616 = vmatpush1.msra.mxu1 %v7778_v27 }
 0xcdc   : > { %4546 = vmatprep.subr.mxu0 %v7859_v32  ;;  %4617 = vmatprep.subr.mxu1 %v7862_v29 }
 0xcdd   : > { %4547 = vmatpush1.msra.mxu0 %v7865_v15  ;;  %4618 = vmatpush1.msra.mxu1 %v7868_v26 }
 0xcde   : > { %4548 = vmatprep.subr.mxu0 %v7871_v36  ;;  %4619 = vmatprep.subr.mxu1 %v7874_v33 }
 0xcdf   : > { %4549 = vmatpush1.msra.mxu0 %v7877_v14  ;;  %4620 = vmatpush1.msra.mxu1 %v7880_v30 }
 0xce0   : > { %4550 = vmatprep.subr.mxu0 %v7883_v35  ;;  %4621 = vmatprep.subr.mxu1 %v7886_v34 }
 0xce1   : > { %4551 = vmatpush1.msra.mxu0 %v7889_v40  ;;  %4622 = vmatpush1.msra.mxu1 %v7892_v39 }
 0xce2   : > { %4552 = vmatprep.subr.mxu0 %v7895_v42  ;;  %4623 = vmatprep.subr.mxu1 %v7898_v43 }
 0xce3   : > { %4553 = vmatpush1.msra.mxu0 %v7901_v44  ;;  %4624 = vmatpush1.msra.mxu1 %v7904_v45 }
 0xce4   : > { %4554 = vmatprep.subr.mxu0 %v7907_v46  ;;  %4625 = vmatprep.subr.mxu1 %v7910_v47 }
 0xce5   : > { %4555 = vmatpush1.msra.mxu0 %v7913_v48  ;;  %4626 = vmatpush1.msra.mxu1 %v7916_v49 }
 0xce6   : > { %4556 = vmatprep.subr.mxu0 %v7919_v51  ;;  %4627 = vmatprep.subr.mxu1 %v7922_v52 }
 0xce7   : > { %4557 = vmatpush1.msra.mxu0 %v7925_v53  ;;  %4628 = vmatpush1.msra.mxu1 %v7928_v54 }
 0xce8   : > { %4558 = vmatprep.subr.mxu0 %v7931_v55  ;;  %4629 = vmatprep.subr.mxu1 %v7934_v7 }
 0xce9   : > { %4559 = vmatpush1.msra.mxu0 %v7937_v10  ;;  %4630 = vmatpush1.msra.mxu1 %v7940_v60 }
 0xcea   : > { %4560 = vmatprep.subr.mxu0 %v7943_v13  ;;  %4631 = vmatprep.subr.mxu1 %v7946_v11 }
 0xceb   : > { %4561 = vmatpush1.msra.mxu0 %v7949_v59  ;;  %4632 = vmatpush1.msra.mxu1 %v7952_v56 }
 0xcec   : > { %4562 = vmatprep.subr.mxu0 %v7955_v6  ;;  %4633 = vmatprep.subr.mxu1 %v7958_v5 }
 0xced   : > { %4563 = vmatpush1.msra.mxu0 %v7961_v50  ;;  %4634 = vmatpush1.msra.mxu1 %v7964_v16 }
 0xcee   : > { %4564 = vmatprep.subr.mxu0 %v7967_v9  ;;  %4635 = vmatprep.subr.mxu1 %v7970_v61 }
 0xcef   : > { %4565 = vmatpush1.msra.mxu0 %v7973_v63  ;;  %4636 = vmatpush1.msra.mxu1 %v8942_v23 }
 0xcf0   : > { %4566 = vmatprep.subr.mxu0 %v8943_v4  ;;  %4637 = vmatprep.subr.mxu1 %v8944_v2 }
 0xcf1   : > { %4567 = vmatpush1.msra.mxu0 %v8945_v3  ;;  %4638 = vmatpush1.msra.mxu1 %v8946_v37 }
 0xcf2   : > { %4568 = vmatprep.subr.mxu0 %v8947_v25  ;;  %4639 = vmatprep.subr.mxu1 %v8948_v1  ;;  %v8970_v25 = vld [vmem:[#allocation73_spill] sm:$0xff] }
 0xcf3   : > { %4569 = vmatpush1.msra.mxu0 %v8949_v57  ;;  %4640 = vmatpush1.msra.mxu1 %v8950_v38  ;;  %v8968_v38 = vld [vmem:[#allocation62_spill] sm:$0xff]  ;;  %v3436_v37 = vadd.f32 %v8970_v25, %v8055_v8 }
 0xcf4   : > { %4570 = vmatprep.subr.mxu0 %v8951_v19  ;;  %4641 = vmatprep.subr.mxu1 %v8952_v22  ;;  %v8962_v19 = vmov 0.0   ;;  %v8963_v22 = vld [vmem:[#allocation60_spill] sm:$0xff] }
 0xcf5   : > { %4571 = vmatpush1.msra.mxu0 %v8953_v12  ;;  %4642 = vmatpush1.msra.mxu1 %v8954_v18  ;;  %v8964_v18 = vld [vmem:[#allocation71_spill] sm:$0xff] }
 0xcf6   : > { %4572 = vmatprep.subr.mxu0 %v8955_v17  ;;  %4643 = vmatprep.subr.mxu1 %v8956_v58  ;;  %v8965_v17 = vld [vmem:[#allocation72_spill] sm:$0xff]  ;;  %v8966_v58 = vld [vmem:[#allocation55_spill] sm:$0xff] }
 0xcf7   : > { %4573 = vmatpush1.msra.mxu0 %v8957_v0  ;;  %4644 = vmatpush1.msra.mxu1 %v8958_v21  ;;  %v8967_v0 = vld [vmem:[#allocation69_spill] sm:$0xff] }
 0xcf8   : > { %4574 = vmatprep.subr.mxu0 %v8959_v24  ;;  %4645 = vmatprep.subr.mxu1 %v8960_v28  ;;  %v3347_v12 = vadd.f32 %v8967_v0, %v8966_v58  ;;  %v8969_v24 = vld [vmem:[#allocation15_spill] sm:$0xff] }
 0xcf9   : > { %4575 = vmatpush1.msra.mxu0 %v8961_v31  ;;  %4608 = vmatprep.mubr.f32.mxu0 %v8962_v19  ;;  %v3349_v57 = vadd.f32 %v8969_v24, %v8968_v38  ;;  %v8971_v0 = vld [vmem:[#allocation43_spill] sm:$0xff] }
 0xcfa   : > { %4646 = vmatpush1.msra.mxu1 %v8963_v22  ;;  %4679 = vmatprep.mubr.f32.mxu1 %v8962_v19  ;;  %v3438_v58 = vadd.f32 %v8971_v0, %v8062_v41 }
 0xcfb   : > { %4712 = vmatprep.subr.mxu0 %v8964_v18  ;;  %4783 = vmatprep.subr.mxu1 %v8965_v17 }
 0xd9a   : > { %v4442_v21 = vpop.f32.mrf.mxu0  ;;  %v4513_v1 = vpop.f32.mrf.mxu1 }
 0xd9b   : > { %v4518_v28 = vadd.f32 %v4442_v21, %v3347_v12  ;;  %v4520_v19 = vadd.f32 %v4513_v1, %v3436_v37 }
 0xd9c   : > { %v4444_v31 = vpop.f32.mrf.mxu0  ;;  %v4515_v17 = vpop.f32.mrf.mxu1 }
 0xd9d   : > { %v4522_v22 = vmul.f32 0.5, %v4518_v28  ;;  %v4519_v3 = vadd.f32 %v4444_v31, %v3349_v57  ;;  %v4521_v2 = vadd.f32 %v4515_v17, %v3438_v58 }
 0xd9f   : > { %5345 = vtanh.f32 %v4522_v22  ;;  %v4526_v18 = vmul.f32 0.5, %v4519_v3  ;;  %v4531_v4 = vmul.f32 0.5, %v4521_v2 }
 0xda1   : > { %5347 = vtanh.f32 %v4526_v18 }
 0xda2   : > { %5349 = vtanh.f32 %v4520_v19 }
 0xda3   : > { %5351 = vtanh.f32 %v4531_v4 }
 0xdac   : > { %v5346_v24 = vpop.eup %5345 }
 0xdad   : > { %v4524_v12 = vmul.f32 0.5, %v5346_v24 }
 0xdae   : > { %v5348_v21 = vpop.eup %5347 }
 0xdaf   : > { %v4525_v38 = vadd.f32 0.5, %v4524_v12  ;;  %v4528_v23 = vmul.f32 0.5, %v5348_v21  ;;  %v5350_v25 = vpop.eup %5349 }
 0xdb0   : > { %v5352_v1 = vpop.eup %5351 }
 0xdb1   : > { %v4529_v28 = vadd.f32 0.5, %v4528_v23  ;;  %v4536_v57 = vmul.f32 %v5350_v25, %v4525_v38  ;;  %v4533_v19 = vmul.f32 0.5, %v5352_v1 }
 0xdb3   : > { %v4535_v37 = vmul.f32 %v4529_v28, %v8067_v20  ;;  %v4534_v22 = vadd.f32 0.5, %v4533_v19 }
 0xdb5   : > { %v8145_v3 = vadd.f32 %v4536_v57, %v4535_v37 }
 0xdb7   : > { %5353 = vtanh.f32 %v8145_v3 }
 0xdc4   : > { %v5354_v58 = vpop.eup %5353 }
 0xdc5   : > { %v4539_v2 = vmul.f32 %v5354_v58, %v4534_v22  ;;  %v4891_v22 = vld [vmem:[%s8323_s7 + $0x78] sm:$0xff]  ;;  %v4889_v58 = vld [vmem:[%s8323_s7 + $0x68] sm:$0xff] }
 0xdc7   : > { %4609 = vmatmul.mubr.f32.vlgmr.msra.gmra.mxu0 %v4539_v2  ;;  %4680 = vmatmul.mubr.f32.vlgmr.msra.gmra.mxu1 %v4539_v2  ;;  %v4888_v2 = vld [vmem:[%s8323_s7 + $0x60] sm:$0xff] }
 0xdc8   : > { %4713 = vmatpush1.msra.mxu0 %v7775_v62  ;;  %4784 = vmatpush1.msra.mxu1 %v7778_v27  ;;  %v8972_v62 = vld [vmem:[#allocation47_spill] sm:$0xff]  ;;  %v8973_v27 = vld [vmem:[#allocation28_spill] sm:$0xff] }
 0xdc9   : > { %4714 = vmatprep.subr.mxu0 %v7859_v32  ;;  %4785 = vmatprep.subr.mxu1 %v7862_v29  ;;  %v8974_v32 = vld [vmem:[#allocation27_spill] sm:$0xff]  ;;  %v8975_v29 = vld [vmem:[#allocation29_spill] sm:$0xff] }
 0xdca   : > { %4715 = vmatpush1.msra.mxu0 %v7865_v15  ;;  %4786 = vmatpush1.msra.mxu1 %v7868_v26  ;;  %v8976_v15 = vld [vmem:[#allocation30_spill] sm:$0xff]  ;;  %v8977_v26 = vld [vmem:[#allocation32_spill] sm:$0xff] }
 0xdcb   : > { %4716 = vmatprep.subr.mxu0 %v7871_v36  ;;  %4787 = vmatprep.subr.mxu1 %v7874_v33  ;;  %v8978_v36 = vld [vmem:[#allocation31_spill] sm:$0xff]  ;;  %v8979_v33 = vld [vmem:[#allocation33_spill] sm:$0xff] }
 0xdcc   : > { %4717 = vmatpush1.msra.mxu0 %v7877_v14  ;;  %4788 = vmatpush1.msra.mxu1 %v7880_v30  ;;  %v8980_v14 = vld [vmem:[#allocation16_spill] sm:$0xff]  ;;  %v8981_v30 = vld [vmem:[#allocation17_spill] sm:$0xff] }
 0xdcd   : > { %4718 = vmatprep.subr.mxu0 %v7883_v35  ;;  %4789 = vmatprep.subr.mxu1 %v7886_v34  ;;  %v8982_v35 = vld [vmem:[#allocation51_spill] sm:$0xff]  ;;  %v8983_v34 = vld [vmem:[#allocation52_spill] sm:$0xff] }
 0xdce   : > { %4719 = vmatpush1.msra.mxu0 %v7889_v40  ;;  %4790 = vmatpush1.msra.mxu1 %v7892_v39  ;;  %v8984_v40 = vld [vmem:[#allocation34_spill] sm:$0xff]  ;;  %v8985_v39 = vld [vmem:[#allocation36_spill] sm:$0xff] }
 0xdcf   : > { %4720 = vmatprep.subr.mxu0 %v7895_v42  ;;  %4791 = vmatprep.subr.mxu1 %v7898_v43  ;;  %v8986_v42 = vld [vmem:[#allocation35_spill] sm:$0xff]  ;;  %v8987_v43 = vld [vmem:[#allocation41_spill] sm:$0xff] }
 0xdd0   : > { %4721 = vmatpush1.msra.mxu0 %v7901_v44  ;;  %4792 = vmatpush1.msra.mxu1 %v7904_v45  ;;  %v8988_v44 = vld [vmem:[#allocation56_spill] sm:$0xff]  ;;  %v8989_v45 = vld [vmem:[#allocation53_spill] sm:$0xff] }
 0xdd1   : > { %4722 = vmatprep.subr.mxu0 %v7907_v46  ;;  %4793 = vmatprep.subr.mxu1 %v7910_v47  ;;  %v8990_v46 = vld [vmem:[#allocation57_spill] sm:$0xff]  ;;  %v8991_v47 = vld [vmem:[#allocation54_spill] sm:$0xff] }
 0xdd2   : > { %4723 = vmatpush1.msra.mxu0 %v7913_v48  ;;  %4794 = vmatpush1.msra.mxu1 %v7916_v49  ;;  %v8992_v48 = vmov 0.0   ;;  %v8993_v49 = vld [vmem:[#allocation60_spill] sm:$0xff] }
 0xdd3   : > { %4724 = vmatprep.subr.mxu0 %v7919_v51  ;;  %4795 = vmatprep.subr.mxu1 %v7922_v52  ;;  %v8994_v51 = vld [vmem:[#allocation55_spill] sm:$0xff]  ;;  %v8995_v52 = vld [vmem:[#allocation44_spill] sm:$0xff] }
 0xdd4   : > { %4725 = vmatpush1.msra.mxu0 %v7925_v53  ;;  %4796 = vmatpush1.msra.mxu1 %v7928_v54  ;;  %v3353_v53 = vadd.f32 %v8995_v52, %v8994_v51 }
 0xdd5   : > { %4726 = vmatprep.subr.mxu0 %v7931_v55  ;;  %4797 = vmatprep.subr.mxu1 %v7934_v7  ;;  %v8996_v55 = vld [vmem:[#allocation62_spill] sm:$0xff] }
 0xdd6   : > { %4727 = vmatpush1.msra.mxu0 %v7937_v10  ;;  %4798 = vmatpush1.msra.mxu1 %v7940_v60  ;;  %v8997_v7 = vld [vmem:[#allocation50_spill] sm:$0xff] }
 0xdd7   : > { %4728 = vmatprep.subr.mxu0 %v7943_v13  ;;  %4799 = vmatprep.subr.mxu1 %v7946_v11  ;;  %v3355_v10 = vadd.f32 %v8997_v7, %v8996_v55 }
 0xdd8   : > { %4729 = vmatpush1.msra.mxu0 %v7949_v59  ;;  %4800 = vmatpush1.msra.mxu1 %v7952_v56  ;;  %v8998_v59 = vld [vmem:[#allocation49_spill] sm:$0xff] }
 0xdd9   : > { %4730 = vmatprep.subr.mxu0 %v7955_v6  ;;  %4801 = vmatprep.subr.mxu1 %v7958_v5  ;;  %v3442_v56 = vadd.f32 %v8998_v59, %v8055_v8 }
 0xdda   : > { %4731 = vmatpush1.msra.mxu0 %v7961_v50  ;;  %4802 = vmatpush1.msra.mxu1 %v7964_v16 }
 0xddb   : > { %4732 = vmatprep.subr.mxu0 %v7967_v9  ;;  %4803 = vmatprep.subr.mxu1 %v7970_v61  ;;  %v8999_v61 = vld [vmem:[#allocation45_spill] sm:$0xff] }
 0xddc   : > { %4733 = vmatpush1.msra.mxu0 %v7973_v63  ;;  %4804 = vmatpush1.msra.mxu1 %v8972_v62  ;;  %v3444_v63 = vadd.f32 %v8999_v61, %v8062_v41  ;;  %v4887_v62 = vld [vmem:[%s8323_s7 + $0x58] sm:$0xff] }
 0xddd   : > { %4734 = vmatprep.subr.mxu0 %v8973_v27  ;;  %4805 = vmatprep.subr.mxu1 %v8974_v32  ;;  %v4886_v27 = vld [vmem:[%s8323_s7 + $0x50] sm:$0xff]  ;;  %v4885_v32 = vld [vmem:[%s8323_s7 + $0x48] sm:$0xff] }
 0xdde   : > { %4735 = vmatpush1.msra.mxu0 %v8975_v29  ;;  %4806 = vmatpush1.msra.mxu1 %v8976_v15  ;;  %v4884_v29 = vld [vmem:[%s8323_s7 + $0x40] sm:$0xff]  ;;  %v4883_v15 = vld [vmem:[%s8323_s7 + $0x38] sm:$0xff] }
 0xddf   : > { %4736 = vmatprep.subr.mxu0 %v8977_v26  ;;  %4807 = vmatprep.subr.mxu1 %v8978_v36  ;;  %v4882_v26 = vld [vmem:[%s8323_s7 + $0x30] sm:$0xff]  ;;  %v4881_v36 = vld [vmem:[%s8323_s7 + $0x28] sm:$0xff] }
 0xde0   : > { %4737 = vmatpush1.msra.mxu0 %v8979_v33  ;;  %4808 = vmatpush1.msra.mxu1 %v8980_v14  ;;  %v4880_v33 = vld [vmem:[%s8323_s7 + $0x20] sm:$0xff]  ;;  %v4879_v14 = vld [vmem:[%s8323_s7 + $0x18] sm:$0xff] }
 0xde1   : > { %4738 = vmatprep.subr.mxu0 %v8981_v30  ;;  %4809 = vmatprep.subr.mxu1 %v8982_v35  ;;  %v4878_v30 = vld [vmem:[%s8323_s7 + $0x10] sm:$0xff]  ;;  %v4877_v35 = vld [vmem:[%s8323_s7 + $0x8] sm:$0xff] }
 0xde2   : > { %4739 = vmatpush1.msra.mxu0 %v8983_v34  ;;  %4810 = vmatpush1.msra.mxu1 %v8984_v40  ;;  %v4876_v34 = vld [vmem:[%s8323_s7] sm:$0xff]  ;;  %v9000_v40 = vld [vmem:[#allocation46_spill] sm:$0xff] }
 0xde3   : > { %4740 = vmatprep.subr.mxu0 %v8985_v39  ;;  %4811 = vmatprep.subr.mxu1 %v8986_v42  ;;  %v3359_v39 = vadd.f32 %v9000_v40, %v8994_v51  ;;  %v9003_v51 = vld [vmem:[#allocation70_spill] sm:$0xff] }
 0xde4   : > { %4741 = vmatpush1.msra.mxu0 %v8987_v43  ;;  %4812 = vmatpush1.msra.mxu1 %v8988_v44  ;;  %v9001_v43 = vld [vmem:[#allocation68_spill] sm:$0xff] }
 0xde5   : > { %4742 = vmatprep.subr.mxu0 %v8989_v45  ;;  %4813 = vmatprep.subr.mxu1 %v8990_v46  ;;  %v3361_v44 = vadd.f32 %v9001_v43, %v8996_v55 }
 0xde6   : > { %4743 = vmatpush1.msra.mxu0 %v8991_v47  ;;  %4776 = vmatprep.mubr.f32.mxu0 %v8992_v48 }
 0xde7   : > { %4814 = vmatpush1.msra.mxu1 %v8993_v49  ;;  %4847 = vmatprep.mubr.f32.mxu1 %v8992_v48  ;;  %v9002_v49 = vld [vmem:[#allocation48_spill] sm:$0xff] }
 0xde8   : > { %5111 = vmatprep.subr.mxu0 %v8992_v48  ;;  %v3448_v52 = vadd.f32 %v9002_v49, %v8055_v8 }
 0xe87   : > { %v4610_v54 = vpop.f32.mrf.mxu0  ;;  %v4681_v13 = vpop.f32.mrf.mxu1 }
 0xe88   : > { %v4686_v60 = vadd.f32 %v4610_v54, %v3353_v53  ;;  %v4688_v50 = vadd.f32 %v4681_v13, %v3442_v56 }
 0xe89   : > { %v4612_v11 = vpop.f32.mrf.mxu0  ;;  %v4683_v9 = vpop.f32.mrf.mxu1 }
 0xe8a   : > { %v4690_v6 = vmul.f32 0.5, %v4686_v60  ;;  %v4687_v5 = vadd.f32 %v4612_v11, %v3355_v10  ;;  %v4689_v20 = vadd.f32 %v4683_v9, %v3444_v63  ;;  %v3450_v60 = vadd.f32 %v9003_v51, %v8062_v41 }
 0xe8c   : > { %5355 = vtanh.f32 %v4690_v6  ;;  %v4694_v16 = vmul.f32 0.5, %v4687_v5  ;;  %v4699_v23 = vmul.f32 0.5, %v4689_v20 }
 0xe8e   : > { %5357 = vtanh.f32 %v4694_v16 }
 0xe8f   : > { %5359 = vtanh.f32 %v4688_v50 }
 0xe90   : > { %5361 = vtanh.f32 %v4699_v23 }
 0xe99   : > { %v5356_v4 = vpop.eup %5355 }
 0xe9a   : > { %v4692_v38 = vmul.f32 0.5, %v5356_v4 }
 0xe9b   : > { %v5358_v31 = vpop.eup %5357 }
 0xe9c   : > { %v4693_v18 = vadd.f32 0.5, %v4692_v38  ;;  %v4696_v17 = vmul.f32 0.5, %v5358_v31  ;;  %v5360_v0 = vpop.eup %5359  ;;  %v5091_v38 = vld [vmem:[%s8324_s8] ss:$0 sm:$0xff] }
 0xe9d   : > { %v5362_v28 = vpop.eup %5361 }
 0xe9e   : > { %v4697_v24 = vadd.f32 0.5, %v4696_v17  ;;  %v4704_v12 = vmul.f32 %v5360_v0, %v4693_v18  ;;  %v4701_v57 = vmul.f32 0.5, %v5362_v28 }
 0xea0   : > { %v4703_v21 = vmul.f32 %v4697_v24, %v8145_v3  ;;  %v4702_v37 = vadd.f32 0.5, %v4701_v57  ;;  %v4890_v3 = vld [vmem:[%s8323_s7 + $0x70] sm:$0xff] }
 0xea2   : > { %v8222_v25 = vadd.f32 %v4704_v12, %v4703_v21 }
 0xea4   : > { %5363 = vtanh.f32 %v8222_v25 }
 0xeb1   : > { %v5364_v1 = vpop.eup %5363 }
 0xeb2   : > { %v4707_v19 = vmul.f32 %v5364_v1, %v4702_v37 }
 0xeb4   : > { %4777 = vmatmul.mubr.f32.vlgmr.msra.gmra.mxu0 %v4707_v19  ;;  %4848 = vmatmul.mubr.f32.vlgmr.msra.gmra.mxu1 %v4707_v19 }
 0xeb5   : > { %5112 = vmatpush3.msra.mxu0 %v4891_v22  ;;  %5143 = vmatprep.mubr.msk.f32.mxu0 %vm5586_vm0, %v8992_v48 }
 0xeb6   : > { %5113 = vmatprep.subr.mxu0 %v8992_v48 }
 0xeb7   : > { %5114 = vmatpush3.msra.mxu0 %v4890_v3 }
 0xeb8   : > { %5115 = vmatprep.subr.mxu0 %v8992_v48 }
 0xeb9   : > { %5116 = vmatpush3.msra.mxu0 %v4889_v58 }
 0xeba   : > { %5117 = vmatprep.subr.mxu0 %v8992_v48 }
 0xebb   : > { %5118 = vmatpush3.msra.mxu0 %v4888_v2 }
 0xebc   : > { %5119 = vmatprep.subr.mxu0 %v8992_v48 }
 0xebd   : > { %5120 = vmatpush3.msra.mxu0 %v4887_v62 }
 0xebe   : > { %5121 = vmatprep.subr.mxu0 %v8992_v48 }
 0xebf   : > { %5122 = vmatpush3.msra.mxu0 %v4886_v27 }
 0xec0   : > { %5123 = vmatprep.subr.mxu0 %v8992_v48 }
 0xec1   : > { %5124 = vmatpush3.msra.mxu0 %v4885_v32 }
 0xec2   : > { %5125 = vmatprep.subr.mxu0 %v8992_v48 }
 0xec3   : > { %5126 = vmatpush3.msra.mxu0 %v4884_v29 }
 0xec4   : > { %5127 = vmatprep.subr.mxu0 %v8992_v48 }
 0xec5   : > { %5128 = vmatpush3.msra.mxu0 %v4883_v15 }
 0xec6   : > { %5129 = vmatprep.subr.mxu0 %v8992_v48 }
 0xec7   : > { %5130 = vmatpush3.msra.mxu0 %v4882_v26 }
 0xec8   : > { %5131 = vmatprep.subr.mxu0 %v8992_v48 }
 0xec9   : > { %5132 = vmatpush3.msra.mxu0 %v4881_v36 }
 0xeca   : > { %5133 = vmatprep.subr.mxu0 %v8992_v48 }
 0xecb   : > { %5134 = vmatpush3.msra.mxu0 %v4880_v33 }
 0xecc   : > { %5135 = vmatprep.subr.mxu0 %v8992_v48 }
 0xecd   : > { %5136 = vmatpush3.msra.mxu0 %v4879_v14 }
 0xece   : > { %5137 = vmatprep.subr.mxu0 %v8992_v48 }
 0xecf   : > { %5138 = vmatpush3.msra.mxu0 %v4878_v30 }
 0xed0   : > { %5139 = vmatprep.subr.mxu0 %v8992_v48 }
 0xed1   : > { %5140 = vmatpush3.msra.mxu0 %v4877_v35 }
 0xed2   : > { %5141 = vmatprep.subr.mxu0 %v8992_v48 }
 0xed3   : > { %5142 = vmatpush3.msra.mxu0 %v4876_v34 }
 0xf74   : > { %v4778_v42 = vpop.f32.mrf.mxu0  ;;  %v4849_v46 = vpop.f32.mrf.mxu1 }
 0xf75   : > { %v4854_v45 = vadd.f32 %v4778_v42, %v3359_v39  ;;  %v4856_v7 = vadd.f32 %v4849_v46, %v3448_v52 }
 0xf76   : > { %v4780_v47 = vpop.f32.mrf.mxu0  ;;  %v4851_v48 = vpop.f32.mrf.mxu1 }
 0xf77   : > { %v4858_v53 = vmul.f32 0.5, %v4854_v45  ;;  %v4855_v54 = vadd.f32 %v4780_v47, %v3361_v44  ;;  %v4857_v13 = vadd.f32 %v4851_v48, %v3450_v60 }
 0xf79   : > { %5365 = vtanh.f32 %v4858_v53  ;;  %v4862_v10 = vmul.f32 0.5, %v4855_v54  ;;  %v4867_v11 = vmul.f32 0.5, %v4857_v13 }
 0xf7b   : > { %5367 = vtanh.f32 %v4862_v10 }
 0xf7c   : > { %5369 = vtanh.f32 %v4856_v7 }
 0xf7d   : > { %5371 = vtanh.f32 %v4867_v11 }
 0xf86   : > { %v5366_v55 = vpop.eup %5365 }
 0xf87   : > { %v4860_v59 = vmul.f32 0.5, %v5366_v55 }
 0xf88   : > { %v5368_v56 = vpop.eup %5367 }
 0xf89   : > { %v4861_v6 = vadd.f32 0.5, %v4860_v59  ;;  %v4864_v8 = vmul.f32 0.5, %v5368_v56  ;;  %v5370_v5 = vpop.eup %5369 }
 0xf8a   : > { %v5372_v63 = vpop.eup %5371 }
 0xf8b   : > { %v4865_v50 = vadd.f32 0.5, %v4864_v8  ;;  %v4872_v16 = vmul.f32 %v5370_v5, %v4861_v6  ;;  %v4869_v20 = vmul.f32 0.5, %v5372_v63 }
 0xf8d   : > { %v4871_v9 = vmul.f32 %v4865_v50, %v8222_v25  ;;  %v4870_v41 = vadd.f32 0.5, %v4869_v20 }
 0xf8f   : > { %v4873_v61 = vadd.f32 %v4872_v16, %v4871_v9 }
 0xf91   : > { %5373 = vtanh.f32 %v4873_v61 }
 0xf9e   : > { %v5374_v23 = vpop.eup %5373 }
 0xf9f   : > { %v4875_v4 = vmul.f32 %v5374_v23, %v4870_v41 }
 0xfa1   : > { %5144 = vmatmul.mubr.f32.vlgmr.msra.gmra.mxu0 %v4875_v4 }
0x1061   : > { %v4965_v31 = vpop.f32.mrf.mxu0 }
0x1062   : > { %v4966_v18 = vadd.f32 %v5091_v38, %v4965_v31 }
0x1063   : > { %v5145_v17 = vpop.f32.mrf.mxu0 }
0x1064   : > { %4969 = vst [vmem:[%s452_s21] sm:$0xff] %v4966_v18 }
0x1065 PF: > { %p19_p6 = scmp.ge.s32.totalorder %s5656_s13, 4   ;;  %s9004_s30 = smov %s5573_s10 }
0x1066   : > { %s9005_s10 = smov %s5666_s16  ;;  %s9006_s11 = smov %s5656_s13 }
0x1067   :  { %21 = sbr.rel (!%p19_p6) target bundleno = 4 (0x4), region = 161 }
0x106c   :  { %4989 = vsyncpa [#allocation6], 1 }
0x106d   :  { %4991 = vsyncpa [#allocation6 + $0x1], 1 }
0x106e   :  { %4992 = vsyncpa [#allocation8], 1 }
0x106f   :  { %4993 = vsyncpa [#allocation11], 1 }

</bundles_post_ra>
